<compile_context>
chip_gen: v7x
topology: tpu7x:2x2x1
jax: 0.10.0
libtpu: 0.0.40
codegen_flags: <defaults>
</compile_context>

<pallas_src>
import jax
import jax.numpy as jnp
from jax import lax
from jax.experimental import pallas as pl
from jax.experimental.pallas import tpu as pltpu
import numpy as np

EPS = 1e-5  # PyTorch LayerNorm default eps


def ca4_kernel(x0_ref, y_ref, wq_ref, bq_ref, wk_ref, bk_ref, wv_ref, bv_ref,
               o_ref, k_scr, v_scr):
    B, D = x0_ref.shape
    M = y_ref.shape[0]            # B * (S - 1), slice-major: row = (i-1)*B + b
    S1 = M // B

    def ln_hat(z):
        # LayerNorm WITHOUT the affine part (gamma/beta are folded into the weights).
        mu = jnp.mean(z, axis=-1, keepdims=True)
        var = jnp.mean((z - mu) ** 2, axis=-1, keepdims=True)
        return (z - mu) * lax.rsqrt(var + EPS)

    # ---- prologue: K/V for ALL S-1 fusion slices, hoisted out of the serial x-carry.
    yhat = ln_hat(y_ref[...])                                               # (M, D)
    k_scr[...] = jnp.dot(yhat, wk_ref[...],
                         preferred_element_type=jnp.float32) + bk_ref[...]  # (M, D)
    v_scr[...] = jnp.dot(yhat, wv_ref[...],
                         preferred_element_type=jnp.float32) + bv_ref[...]  # (M, D)

    wq = wq_ref[...]   # (D, D) == scale * gamma[:,None] * Wq^T
    bq = bq_ref[...]   # (1, D) == scale * (beta @ Wq^T)
    x = x0_ref[...]    # (B, D) running accumulator (carried in registers/VMEM values)

    # ---- serial fusion loop, unrolled at trace time (S is small).
    for j in range(S1):
        kj = k_scr[pl.ds(j * B, B), :]                     # (B, D)
        vj = v_scr[pl.ds(j * B, B), :]                     # (B, D)

        # q already carries `scale` (folded into wq/bq in the wrapper).
        qs = jnp.dot(ln_hat(x), wq, preferred_element_type=jnp.float32) + bq   # (B, D)

        # row-max of att[b,m,:] = qs[b,m]*k[b,:] computed algebraically (exact),
        # avoiding a reduce over the (B, D, D) tensor.
        kmax = jnp.max(kj, axis=-1, keepdims=True)         # (B, 1)
        kmin = jnp.min(kj, axis=-1, keepdims=True)         # (B, 1)
        rowmax = jnp.where(qs >= 0.0, qs * kmax, qs * kmin)                     # (B, D)

        e = jnp.exp(qs[:, :, None] * kj[:, None, :] - rowmax[:, :, None])       # (B, D, D)
        num = jnp.sum(e * vj[:, None, :], axis=-1)         # (B, D)
        den = jnp.sum(e, axis=-1)                          # (B, D)
        # softmax denominator folded into the final (B, D) result; exact reciprocal
        # (approx=True would deviate from PyTorch at ~1e-3 rel).
        x = x + num * pl.reciprocal(den, approx=False)

    o_ref[...] = x


def ca4_forward(t, params):
    B, S, D = t.shape
    scale = params["scale"]
    g = params["gamma"].reshape(D, 1)
    b = params["beta"].reshape(1, D)
    wqT = params["wq"].T      # so that q = LN(x) @ Wq^T
    wkT = params["wk"].T
    wvT = params["wv"].T

    # Fold LN affine (gamma/beta) and `scale` into the projections (one-time XLA ops):
    #   LN(z) @ W^T = zhat @ (gamma[:,None] * W^T) + beta @ W^T
    wq_f = (g * wqT) * scale
    bq_f = (b @ wqT) * scale
    wk_f = g * wkT
    bk_f = b @ wkT
    wv_f = g * wvT
    bv_f = b @ wvT

    x0 = t[:, 0, :]                                                   # (B, D)
    # slice-major layout: row (i-1)*B + b -> contiguous (B, D) block per fusion step
    y_all = jnp.swapaxes(t[:, 1:, :], 0, 1).reshape((S - 1) * B, D)   # (B*(S-1), D)

    M = (S - 1) * B
    vmem = pl.BlockSpec(memory_space=pltpu.MemorySpace.VMEM)
    return pl.pallas_call(
        ca4_kernel,
        out_shape=jax.ShapeDtypeStruct((B, D), jnp.float32),
        in_specs=[vmem] * 8,
        out_specs=vmem,
        scratch_shapes=[pltpu.VMEM((M, D), jnp.float32),
                        pltpu.VMEM((M, D), jnp.float32)],
    )(x0, y_all, wq_f, bq_f, wk_f, bk_f, wv_f, bv_f)


def ca4_reference(t, params):
    """Pure-JAX replica of CA_4.forward (PyTorch semantics) for correctness checking."""
    gamma, beta = params["gamma"], params["beta"]
    wq, wk, wv = params["wq"], params["wk"], params["wv"]
    s = params["scale"]

    def ln(z):
        mu = jnp.mean(z, -1, keepdims=True)
        var = jnp.mean((z - mu) ** 2, -1, keepdims=True)
        return (z - mu) / jnp.sqrt(var + EPS) * gamma + beta

    x = t[:, 0, :]
    for i in range(1, t.shape[1]):
        y = t[:, i, :]
        q = ln(x) @ wq.T
        k = ln(y) @ wk.T
        v = ln(y) @ wv.T
        att = q[:, :, None] * k[:, None, :] * s
        att = jax.nn.softmax(att, axis=-1)
        a = jnp.einsum('bmn,bn->bm', att, v)
        x = x + a
    return x


if __name__ == "__main__":
    B, S, D = 2, 8, 32
    key = jax.random.PRNGKey(0)
    kt, kq, kk, kv, kg, kb = jax.random.split(key, 6)

    t = jax.random.normal(kt, (B, S, D), dtype=jnp.float32)

    # Deterministic synthetic parameters (shapes follow CAM.__init__ with dim=D).
    params = {
        "wq": 0.05 * jax.random.normal(kq, (D, D), dtype=jnp.float32),        # q.weight
        "wk": 0.05 * jax.random.normal(kk, (D, D), dtype=jnp.float32),        # k.weight
        "wv": 0.05 * jax.random.normal(kv, (D, D), dtype=jnp.float32),        # v.weight
        "gamma": 1.0 + 0.1 * jax.random.normal(kg, (D,), dtype=jnp.float32),  # norm1.weight
        "beta": 0.05 * jax.random.normal(kb, (D,), dtype=jnp.float32),        # norm1.bias
        "scale": jnp.float32(0.125),                                          # self.scale
    }
    # TODO(synk): norm2 / proj / mlp params exist in CAM.__init__ but are unused by CA_4.forward.

    out = jax.block_until_ready(ca4_forward(t, params))
    ref = jax.block_until_ready(ca4_reference(t, params))

    np.testing.assert_allclose(np.asarray(out), np.asarray(ref), rtol=1e-4, atol=5e-5)
    print("KERNEL_OK")
</pallas_src>

<mosaic_0001>
module attributes {stable_mosaic.version = 11 : i64} {
  func.func @ca4_kernel(%arg0: memref<2x32xf32, #tpu.memory_space<vmem>>, %arg1: memref<14x32xf32, #tpu.memory_space<vmem>>, %arg2: memref<32x32xf32, #tpu.memory_space<vmem>>, %arg3: memref<1x32xf32, #tpu.memory_space<vmem>>, %arg4: memref<32x32xf32, #tpu.memory_space<vmem>>, %arg5: memref<1x32xf32, #tpu.memory_space<vmem>>, %arg6: memref<32x32xf32, #tpu.memory_space<vmem>>, %arg7: memref<1x32xf32, #tpu.memory_space<vmem>>, %arg8: memref<2x32xf32, #tpu.memory_space<vmem>>, %arg9: memref<14x32xf32, #tpu.memory_space<vmem>>, %arg10: memref<14x32xf32, #tpu.memory_space<vmem>>) attributes {dimension_semantics = [], scalar_prefetch = 0 : i64, scratch_operands = 2 : i64, tpu.core_type = #tpu.core_type<tc>} {
    %c0 = arith.constant 0 : index
    %c0_0 = arith.constant 0 : index
    %0 = vector.load %arg1[%c0, %c0_0] : memref<14x32xf32, #tpu.memory_space<vmem>>, vector<14x32xf32>
    %cst = arith.constant dense<0.000000e+00> : vector<14xf32>
    %1 = vector.multi_reduction <add>, %0, %cst [1] : vector<14x32xf32> to vector<14xf32>
    %2 = vector.shape_cast %1 : vector<14xf32> to vector<14x1xf32>
    %cst_1 = arith.constant 3.200000e+01 : f32
    %3 = vector.broadcast %cst_1 : f32 to vector<14x1xf32>
    %4 = arith.divf %2, %3 : vector<14x1xf32>
    %5 = vector.broadcast %4 : vector<14x1xf32> to vector<14x32xf32>
    %6 = arith.subf %0, %5 : vector<14x32xf32>
    %7 = arith.mulf %6, %6 : vector<14x32xf32>
    %cst_2 = arith.constant dense<0.000000e+00> : vector<14xf32>
    %8 = vector.multi_reduction <add>, %7, %cst_2 [1] : vector<14x32xf32> to vector<14xf32>
    %9 = vector.shape_cast %8 : vector<14xf32> to vector<14x1xf32>
    %cst_3 = arith.constant 3.200000e+01 : f32
    %10 = vector.broadcast %cst_3 : f32 to vector<14x1xf32>
    %11 = arith.divf %9, %10 : vector<14x1xf32>
    %12 = vector.broadcast %4 : vector<14x1xf32> to vector<14x32xf32>
    %13 = arith.subf %0, %12 : vector<14x32xf32>
    %cst_4 = arith.constant 9.99999974E-6 : f32
    %14 = vector.broadcast %cst_4 : f32 to vector<14x1xf32>
    %15 = arith.addf %11, %14 : vector<14x1xf32>
    %16 = math.rsqrt %15 : vector<14x1xf32>
    %17 = vector.broadcast %16 : vector<14x1xf32> to vector<14x32xf32>
    %18 = arith.mulf %13, %17 : vector<14x32xf32>
    %c0_5 = arith.constant 0 : index
    %c0_6 = arith.constant 0 : index
    %19 = vector.load %arg4[%c0_5, %c0_6] : memref<32x32xf32, #tpu.memory_space<vmem>>, vector<32x32xf32>
    %cst_7 = arith.constant dense<0.000000e+00> : vector<14x32xf32>
    %20 = tpu.matmul %18, %19, %cst_7 {dimension_numbers = #tpu.dot_dimension_numbers<[1], [0], [0], [1], [0, 0, 1, 1], [], []>} : vector<14x32xf32>, vector<32x32xf32>, vector<14x32xf32> -> vector<14x32xf32>
    %c0_8 = arith.constant 0 : index
    %c0_9 = arith.constant 0 : index
    %21 = vector.load %arg5[%c0_8, %c0_9] : memref<1x32xf32, #tpu.memory_space<vmem>>, vector<1x32xf32>
    %22 = vector.broadcast %21 : vector<1x32xf32> to vector<14x32xf32>
    %23 = arith.addf %20, %22 : vector<14x32xf32>
    %c0_10 = arith.constant 0 : index
    %c0_11 = arith.constant 0 : index
    %24 = vector.load %arg9[%c0_10, %c0_11] : memref<14x32xf32, #tpu.memory_space<vmem>>, vector<14x32xf32>
    tpu.vector_store %arg9[%c0_10, %c0_11], %23 {strides = array<i32>} : memref<14x32xf32, #tpu.memory_space<vmem>>, vector<14x32xf32>,
    %c0_12 = arith.constant 0 : index
    %c0_13 = arith.constant 0 : index
    %25 = vector.load %arg6[%c0_12, %c0_13] : memref<32x32xf32, #tpu.memory_space<vmem>>, vector<32x32xf32>
    %cst_14 = arith.constant dense<0.000000e+00> : vector<14x32xf32>
    %26 = tpu.matmul %18, %25, %cst_14 {dimension_numbers = #tpu.dot_dimension_numbers<[1], [0], [0], [1], [0, 0, 1, 1], [], []>} : vector<14x32xf32>, vector<32x32xf32>, vector<14x32xf32> -> vector<14x32xf32>
    %c0_15 = arith.constant 0 : index
    %c0_16 = arith.constant 0 : index
    %27 = vector.load %arg7[%c0_15, %c0_16] : memref<1x32xf32, #tpu.memory_space<vmem>>, vector<1x32xf32>
    %28 = vector.broadcast %27 : vector<1x32xf32> to vector<14x32xf32>
    %29 = arith.addf %26, %28 : vector<14x32xf32>
    %c0_17 = arith.constant 0 : index
    %c0_18 = arith.constant 0 : index
    %30 = vector.load %arg10[%c0_17, %c0_18] : memref<14x32xf32, #tpu.memory_space<vmem>>, vector<14x32xf32>
    tpu.vector_store %arg10[%c0_17, %c0_18], %29 {strides = array<i32>} : memref<14x32xf32, #tpu.memory_space<vmem>>, vector<14x32xf32>,
    %c0_19 = arith.constant 0 : index
    %c0_20 = arith.constant 0 : index
    %31 = vector.load %arg2[%c0_19, %c0_20] : memref<32x32xf32, #tpu.memory_space<vmem>>, vector<32x32xf32>
    %c0_21 = arith.constant 0 : index
    %c0_22 = arith.constant 0 : index
    %32 = vector.load %arg3[%c0_21, %c0_22] : memref<1x32xf32, #tpu.memory_space<vmem>>, vector<1x32xf32>
    %c0_23 = arith.constant 0 : index
    %c0_24 = arith.constant 0 : index
    %33 = vector.load %arg0[%c0_23, %c0_24] : memref<2x32xf32, #tpu.memory_space<vmem>>, vector<2x32xf32>
    %c0_25 = arith.constant 0 : index
    %c0_26 = arith.constant 0 : index
    %34 = vector.load %arg9[%c0_25, %c0_26] : memref<14x32xf32, #tpu.memory_space<vmem>>, vector<2x32xf32>
    %c0_27 = arith.constant 0 : index
    %c0_28 = arith.constant 0 : index
    %35 = vector.load %arg10[%c0_27, %c0_28] : memref<14x32xf32, #tpu.memory_space<vmem>>, vector<2x32xf32>
    %cst_29 = arith.constant dense<0.000000e+00> : vector<2xf32>
    %36 = vector.multi_reduction <add>, %33, %cst_29 [1] : vector<2x32xf32> to vector<2xf32>
    %37 = vector.shape_cast %36 : vector<2xf32> to vector<2x1xf32>
    %cst_30 = arith.constant 3.200000e+01 : f32
    %38 = vector.broadcast %cst_30 : f32 to vector<2x1xf32>
    %39 = arith.divf %37, %38 : vector<2x1xf32>
    %40 = vector.broadcast %39 : vector<2x1xf32> to vector<2x32xf32>
    %41 = arith.subf %33, %40 : vector<2x32xf32>
    %42 = arith.mulf %41, %41 : vector<2x32xf32>
    %cst_31 = arith.constant dense<0.000000e+00> : vector<2xf32>
    %43 = vector.multi_reduction <add>, %42, %cst_31 [1] : vector<2x32xf32> to vector<2xf32>
    %44 = vector.shape_cast %43 : vector<2xf32> to vector<2x1xf32>
    %cst_32 = arith.constant 3.200000e+01 : f32
    %45 = vector.broadcast %cst_32 : f32 to vector<2x1xf32>
    %46 = arith.divf %44, %45 : vector<2x1xf32>
    %47 = vector.broadcast %39 : vector<2x1xf32> to vector<2x32xf32>
    %48 = arith.subf %33, %47 : vector<2x32xf32>
    %cst_33 = arith.constant 9.99999974E-6 : f32
    %49 = vector.broadcast %cst_33 : f32 to vector<2x1xf32>
    %50 = arith.addf %46, %49 : vector<2x1xf32>
    %51 = math.rsqrt %50 : vector<2x1xf32>
    %52 = vector.broadcast %51 : vector<2x1xf32> to vector<2x32xf32>
    %53 = arith.mulf %48, %52 : vector<2x32xf32>
    %cst_34 = arith.constant dense<0.000000e+00> : vector<2x32xf32>
    %54 = tpu.matmul %53, %31, %cst_34 {dimension_numbers = #tpu.dot_dimension_numbers<[1], [0], [0], [1], [0, 0, 1, 1], [], []>} : vector<2x32xf32>, vector<32x32xf32>, vector<2x32xf32> -> vector<2x32xf32>
    %55 = vector.broadcast %32 : vector<1x32xf32> to vector<2x32xf32>
    %56 = arith.addf %54, %55 : vector<2x32xf32>
    %cst_35 = arith.constant dense<0xFF800000> : vector<2xf32>
    %57 = vector.multi_reduction <maximumf>, %34, %cst_35 [1] : vector<2x32xf32> to vector<2xf32>
    %58 = vector.shape_cast %57 : vector<2xf32> to vector<2x1xf32>
    %cst_36 = arith.constant dense<0x7F800000> : vector<2xf32>
    %59 = vector.multi_reduction <minimumf>, %34, %cst_36 [1] : vector<2x32xf32> to vector<2xf32>
    %60 = vector.shape_cast %59 : vector<2xf32> to vector<2x1xf32>
    %cst_37 = arith.constant 0.000000e+00 : f32
    %61 = vector.broadcast %cst_37 : f32 to vector<2x32xf32>
    %62 = arith.cmpf oge, %56, %61 : vector<2x32xf32>
    %63 = vector.broadcast %58 : vector<2x1xf32> to vector<2x32xf32>
    %64 = arith.mulf %56, %63 : vector<2x32xf32>
    %65 = vector.broadcast %60 : vector<2x1xf32> to vector<2x32xf32>
    %66 = arith.mulf %56, %65 : vector<2x32xf32>
    %67 = arith.select %62, %64, %66 : vector<2x32xi1>, vector<2x32xf32>
    %68 = vector.shape_cast %56 : vector<2x32xf32> to vector<2x32x1xf32>
    %69 = vector.shape_cast %34 : vector<2x32xf32> to vector<2x1x32xf32>
    %70 = vector.broadcast %68 : vector<2x32x1xf32> to vector<2x32x32xf32>
    %71 = vector.broadcast %69 : vector<2x1x32xf32> to vector<2x32x32xf32>
    %72 = arith.mulf %70, %71 : vector<2x32x32xf32>
    %73 = vector.shape_cast %67 : vector<2x32xf32> to vector<2x32x1xf32>
    %74 = vector.broadcast %73 : vector<2x32x1xf32> to vector<2x32x32xf32>
    %75 = arith.subf %72, %74 : vector<2x32x32xf32>
    %76 = math.exp %75 : vector<2x32x32xf32>
    %77 = vector.shape_cast %35 : vector<2x32xf32> to vector<2x1x32xf32>
    %78 = vector.broadcast %77 : vector<2x1x32xf32> to vector<2x32x32xf32>
    %79 = arith.mulf %76, %78 : vector<2x32x32xf32>
    %cst_38 = arith.constant dense<0.000000e+00> : vector<2x32xf32>
    %80 = vector.multi_reduction <add>, %79, %cst_38 [2] : vector<2x32x32xf32> to vector<2x32xf32>
    %cst_39 = arith.constant dense<0.000000e+00> : vector<2x32xf32>
    %81 = vector.multi_reduction <add>, %76, %cst_39 [2] : vector<2x32x32xf32> to vector<2x32xf32>
    %82 = tpu.reciprocal %81 : vector<2x32xf32> -> vector<2x32xf32>
    %83 = arith.mulf %80, %82 : vector<2x32xf32>
    %84 = arith.addf %33, %83 : vector<2x32xf32>
    %c2 = arith.constant 2 : index
    %c0_40 = arith.constant 0 : index
    %85 = vector.load %arg9[%c2, %c0_40] : memref<14x32xf32, #tpu.memory_space<vmem>>, vector<2x32xf32>
    %c2_41 = arith.constant 2 : index
    %c0_42 = arith.constant 0 : index
    %86 = vector.load %arg10[%c2_41, %c0_42] : memref<14x32xf32, #tpu.memory_space<vmem>>, vector<2x32xf32>
    %cst_43 = arith.constant dense<0.000000e+00> : vector<2xf32>
    %87 = vector.multi_reduction <add>, %84, %cst_43 [1] : vector<2x32xf32> to vector<2xf32>
    %88 = vector.shape_cast %87 : vector<2xf32> to vector<2x1xf32>
    %cst_44 = arith.constant 3.200000e+01 : f32
    %89 = vector.broadcast %cst_44 : f32 to vector<2x1xf32>
    %90 = arith.divf %88, %89 : vector<2x1xf32>
    %91 = vector.broadcast %90 : vector<2x1xf32> to vector<2x32xf32>
    %92 = arith.subf %84, %91 : vector<2x32xf32>
    %93 = arith.mulf %92, %92 : vector<2x32xf32>
    %cst_45 = arith.constant dense<0.000000e+00> : vector<2xf32>
    %94 = vector.multi_reduction <add>, %93, %cst_45 [1] : vector<2x32xf32> to vector<2xf32>
    %95 = vector.shape_cast %94 : vector<2xf32> to vector<2x1xf32>
    %cst_46 = arith.constant 3.200000e+01 : f32
    %96 = vector.broadcast %cst_46 : f32 to vector<2x1xf32>
    %97 = arith.divf %95, %96 : vector<2x1xf32>
    %98 = vector.broadcast %90 : vector<2x1xf32> to vector<2x32xf32>
    %99 = arith.subf %84, %98 : vector<2x32xf32>
    %cst_47 = arith.constant 9.99999974E-6 : f32
    %100 = vector.broadcast %cst_47 : f32 to vector<2x1xf32>
    %101 = arith.addf %97, %100 : vector<2x1xf32>
    %102 = math.rsqrt %101 : vector<2x1xf32>
    %103 = vector.broadcast %102 : vector<2x1xf32> to vector<2x32xf32>
    %104 = arith.mulf %99, %103 : vector<2x32xf32>
    %cst_48 = arith.constant dense<0.000000e+00> : vector<2x32xf32>
    %105 = tpu.matmul %104, %31, %cst_48 {dimension_numbers = #tpu.dot_dimension_numbers<[1], [0], [0], [1], [0, 0, 1, 1], [], []>} : vector<2x32xf32>, vector<32x32xf32>, vector<2x32xf32> -> vector<2x32xf32>
    %106 = vector.broadcast %32 : vector<1x32xf32> to vector<2x32xf32>
    %107 = arith.addf %105, %106 : vector<2x32xf32>
    %cst_49 = arith.constant dense<0xFF800000> : vector<2xf32>
    %108 = vector.multi_reduction <maximumf>, %85, %cst_49 [1] : vector<2x32xf32> to vector<2xf32>
    %109 = vector.shape_cast %108 : vector<2xf32> to vector<2x1xf32>
    %cst_50 = arith.constant dense<0x7F800000> : vector<2xf32>
    %110 = vector.multi_reduction <minimumf>, %85, %cst_50 [1] : vector<2x32xf32> to vector<2xf32>
    %111 = vector.shape_cast %110 : vector<2xf32> to vector<2x1xf32>
    %cst_51 = arith.constant 0.000000e+00 : f32
    %112 = vector.broadcast %cst_51 : f32 to vector<2x32xf32>
    %113 = arith.cmpf oge, %107, %112 : vector<2x32xf32>
    %114 = vector.broadcast %109 : vector<2x1xf32> to vector<2x32xf32>
    %115 = arith.mulf %107, %114 : vector<2x32xf32>
    %116 = vector.broadcast %111 : vector<2x1xf32> to vector<2x32xf32>
    %117 = arith.mulf %107, %116 : vector<2x32xf32>
    %118 = arith.select %113, %115, %117 : vector<2x32xi1>, vector<2x32xf32>
    %119 = vector.shape_cast %107 : vector<2x32xf32> to vector<2x32x1xf32>
    %120 = vector.shape_cast %85 : vector<2x32xf32> to vector<2x1x32xf32>
    %121 = vector.broadcast %119 : vector<2x32x1xf32> to vector<2x32x32xf32>
    %122 = vector.broadcast %120 : vector<2x1x32xf32> to vector<2x32x32xf32>
    %123 = arith.mulf %121, %122 : vector<2x32x32xf32>
    %124 = vector.shape_cast %118 : vector<2x32xf32> to vector<2x32x1xf32>
    %125 = vector.broadcast %124 : vector<2x32x1xf32> to vector<2x32x32xf32>
    %126 = arith.subf %123, %125 : vector<2x32x32xf32>
    %127 = math.exp %126 : vector<2x32x32xf32>
    %128 = vector.shape_cast %86 : vector<2x32xf32> to vector<2x1x32xf32>
    %129 = vector.broadcast %128 : vector<2x1x32xf32> to vector<2x32x32xf32>
    %130 = arith.mulf %127, %129 : vector<2x32x32xf32>
    %cst_52 = arith.constant dense<0.000000e+00> : vector<2x32xf32>
    %131 = vector.multi_reduction <add>, %130, %cst_52 [2] : vector<2x32x32xf32> to vector<2x32xf32>
    %cst_53 = arith.constant dense<0.000000e+00> : vector<2x32xf32>
    %132 = vector.multi_reduction <add>, %127, %cst_53 [2] : vector<2x32x32xf32> to vector<2x32xf32>
    %133 = tpu.reciprocal %132 : vector<2x32xf32> -> vector<2x32xf32>
    %134 = arith.mulf %131, %133 : vector<2x32xf32>
    %135 = arith.addf %84, %134 : vector<2x32xf32>
    %c4 = arith.constant 4 : index
    %c0_54 = arith.constant 0 : index
    %136 = vector.load %arg9[%c4, %c0_54] : memref<14x32xf32, #tpu.memory_space<vmem>>, vector<2x32xf32>
    %c4_55 = arith.constant 4 : index
    %c0_56 = arith.constant 0 : index
    %137 = vector.load %arg10[%c4_55, %c0_56] : memref<14x32xf32, #tpu.memory_space<vmem>>, vector<2x32xf32>
    %cst_57 = arith.constant dense<0.000000e+00> : vector<2xf32>
    %138 = vector.multi_reduction <add>, %135, %cst_57 [1] : vector<2x32xf32> to vector<2xf32>
    %139 = vector.shape_cast %138 : vector<2xf32> to vector<2x1xf32>
    %cst_58 = arith.constant 3.200000e+01 : f32
    %140 = vector.broadcast %cst_58 : f32 to vector<2x1xf32>
    %141 = arith.divf %139, %140 : vector<2x1xf32>
    %142 = vector.broadcast %141 : vector<2x1xf32> to vector<2x32xf32>
    %143 = arith.subf %135, %142 : vector<2x32xf32>
    %144 = arith.mulf %143, %143 : vector<2x32xf32>
    %cst_59 = arith.constant dense<0.000000e+00> : vector<2xf32>
    %145 = vector.multi_reduction <add>, %144, %cst_59 [1] : vector<2x32xf32> to vector<2xf32>
    %146 = vector.shape_cast %145 : vector<2xf32> to vector<2x1xf32>
    %cst_60 = arith.constant 3.200000e+01 : f32
    %147 = vector.broadcast %cst_60 : f32 to vector<2x1xf32>
    %148 = arith.divf %146, %147 : vector<2x1xf32>
    %149 = vector.broadcast %141 : vector<2x1xf32> to vector<2x32xf32>
    %150 = arith.subf %135, %149 : vector<2x32xf32>
    %cst_61 = arith.constant 9.99999974E-6 : f32
    %151 = vector.broadcast %cst_61 : f32 to vector<2x1xf32>
    %152 = arith.addf %148, %151 : vector<2x1xf32>
    %153 = math.rsqrt %152 : vector<2x1xf32>
    %154 = vector.broadcast %153 : vector<2x1xf32> to vector<2x32xf32>
    %155 = arith.mulf %150, %154 : vector<2x32xf32>
    %cst_62 = arith.constant dense<0.000000e+00> : vector<2x32xf32>
    %156 = tpu.matmul %155, %31, %cst_62 {dimension_numbers = #tpu.dot_dimension_numbers<[1], [0], [0], [1], [0, 0, 1, 1], [], []>} : vector<2x32xf32>, vector<32x32xf32>, vector<2x32xf32> -> vector<2x32xf32>
    %157 = vector.broadcast %32 : vector<1x32xf32> to vector<2x32xf32>
    %158 = arith.addf %156, %157 : vector<2x32xf32>
    %cst_63 = arith.constant dense<0xFF800000> : vector<2xf32>
    %159 = vector.multi_reduction <maximumf>, %136, %cst_63 [1] : vector<2x32xf32> to vector<2xf32>
    %160 = vector.shape_cast %159 : vector<2xf32> to vector<2x1xf32>
    %cst_64 = arith.constant dense<0x7F800000> : vector<2xf32>
    %161 = vector.multi_reduction <minimumf>, %136, %cst_64 [1] : vector<2x32xf32> to vector<2xf32>
    %162 = vector.shape_cast %161 : vector<2xf32> to vector<2x1xf32>
    %cst_65 = arith.constant 0.000000e+00 : f32
    %163 = vector.broadcast %cst_65 : f32 to vector<2x32xf32>
    %164 = arith.cmpf oge, %158, %163 : vector<2x32xf32>
    %165 = vector.broadcast %160 : vector<2x1xf32> to vector<2x32xf32>
    %166 = arith.mulf %158, %165 : vector<2x32xf32>
    %167 = vector.broadcast %162 : vector<2x1xf32> to vector<2x32xf32>
    %168 = arith.mulf %158, %167 : vector<2x32xf32>
    %169 = arith.select %164, %166, %168 : vector<2x32xi1>, vector<2x32xf32>
    %170 = vector.shape_cast %158 : vector<2x32xf32> to vector<2x32x1xf32>
    %171 = vector.shape_cast %136 : vector<2x32xf32> to vector<2x1x32xf32>
    %172 = vector.broadcast %170 : vector<2x32x1xf32> to vector<2x32x32xf32>
    %173 = vector.broadcast %171 : vector<2x1x32xf32> to vector<2x32x32xf32>
    %174 = arith.mulf %172, %173 : vector<2x32x32xf32>
    %175 = vector.shape_cast %169 : vector<2x32xf32> to vector<2x32x1xf32>
    %176 = vector.broadcast %175 : vector<2x32x1xf32> to vector<2x32x32xf32>
    %177 = arith.subf %174, %176 : vector<2x32x32xf32>
    %178 = math.exp %177 : vector<2x32x32xf32>
    %179 = vector.shape_cast %137 : vector<2x32xf32> to vector<2x1x32xf32>
    %180 = vector.broadcast %179 : vector<2x1x32xf32> to vector<2x32x32xf32>
    %181 = arith.mulf %178, %180 : vector<2x32x32xf32>
    %cst_66 = arith.constant dense<0.000000e+00> : vector<2x32xf32>
    %182 = vector.multi_reduction <add>, %181, %cst_66 [2] : vector<2x32x32xf32> to vector<2x32xf32>
    %cst_67 = arith.constant dense<0.000000e+00> : vector<2x32xf32>
    %183 = vector.multi_reduction <add>, %178, %cst_67 [2] : vector<2x32x32xf32> to vector<2x32xf32>
    %184 = tpu.reciprocal %183 : vector<2x32xf32> -> vector<2x32xf32>
    %185 = arith.mulf %182, %184 : vector<2x32xf32>
    %186 = arith.addf %135, %185 : vector<2x32xf32>
    %c6 = arith.constant 6 : index
    %c0_68 = arith.constant 0 : index
    %187 = vector.load %arg9[%c6, %c0_68] : memref<14x32xf32, #tpu.memory_space<vmem>>, vector<2x32xf32>
    %c6_69 = arith.constant 6 : index
    %c0_70 = arith.constant 0 : index
    %188 = vector.load %arg10[%c6_69, %c0_70] : memref<14x32xf32, #tpu.memory_space<vmem>>, vector<2x32xf32>
    %cst_71 = arith.constant dense<0.000000e+00> : vector<2xf32>
    %189 = vector.multi_reduction <add>, %186, %cst_71 [1] : vector<2x32xf32> to vector<2xf32>
    %190 = vector.shape_cast %189 : vector<2xf32> to vector<2x1xf32>
    %cst_72 = arith.constant 3.200000e+01 : f32
    %191 = vector.broadcast %cst_72 : f32 to vector<2x1xf32>
    %192 = arith.divf %190, %191 : vector<2x1xf32>
    %193 = vector.broadcast %192 : vector<2x1xf32> to vector<2x32xf32>
    %194 = arith.subf %186, %193 : vector<2x32xf32>
    %195 = arith.mulf %194, %194 : vector<2x32xf32>
    %cst_73 = arith.constant dense<0.000000e+00> : vector<2xf32>
    %196 = vector.multi_reduction <add>, %195, %cst_73 [1] : vector<2x32xf32> to vector<2xf32>
    %197 = vector.shape_cast %196 : vector<2xf32> to vector<2x1xf32>
    %cst_74 = arith.constant 3.200000e+01 : f32
    %198 = vector.broadcast %cst_74 : f32 to vector<2x1xf32>
    %199 = arith.divf %197, %198 : vector<2x1xf32>
    %200 = vector.broadcast %192 : vector<2x1xf32> to vector<2x32xf32>
    %201 = arith.subf %186, %200 : vector<2x32xf32>
    %cst_75 = arith.constant 9.99999974E-6 : f32
    %202 = vector.broadcast %cst_75 : f32 to vector<2x1xf32>
    %203 = arith.addf %199, %202 : vector<2x1xf32>
    %204 = math.rsqrt %203 : vector<2x1xf32>
    %205 = vector.broadcast %204 : vector<2x1xf32> to vector<2x32xf32>
    %206 = arith.mulf %201, %205 : vector<2x32xf32>
    %cst_76 = arith.constant dense<0.000000e+00> : vector<2x32xf32>
    %207 = tpu.matmul %206, %31, %cst_76 {dimension_numbers = #tpu.dot_dimension_numbers<[1], [0], [0], [1], [0, 0, 1, 1], [], []>} : vector<2x32xf32>, vector<32x32xf32>, vector<2x32xf32> -> vector<2x32xf32>
    %208 = vector.broadcast %32 : vector<1x32xf32> to vector<2x32xf32>
    %209 = arith.addf %207, %208 : vector<2x32xf32>
    %cst_77 = arith.constant dense<0xFF800000> : vector<2xf32>
    %210 = vector.multi_reduction <maximumf>, %187, %cst_77 [1] : vector<2x32xf32> to vector<2xf32>
    %211 = vector.shape_cast %210 : vector<2xf32> to vector<2x1xf32>
    %cst_78 = arith.constant dense<0x7F800000> : vector<2xf32>
    %212 = vector.multi_reduction <minimumf>, %187, %cst_78 [1] : vector<2x32xf32> to vector<2xf32>
    %213 = vector.shape_cast %212 : vector<2xf32> to vector<2x1xf32>
    %cst_79 = arith.constant 0.000000e+00 : f32
    %214 = vector.broadcast %cst_79 : f32 to vector<2x32xf32>
    %215 = arith.cmpf oge, %209, %214 : vector<2x32xf32>
    %216 = vector.broadcast %211 : vector<2x1xf32> to vector<2x32xf32>
    %217 = arith.mulf %209, %216 : vector<2x32xf32>
    %218 = vector.broadcast %213 : vector<2x1xf32> to vector<2x32xf32>
    %219 = arith.mulf %209, %218 : vector<2x32xf32>
    %220 = arith.select %215, %217, %219 : vector<2x32xi1>, vector<2x32xf32>
    %221 = vector.shape_cast %209 : vector<2x32xf32> to vector<2x32x1xf32>
    %222 = vector.shape_cast %187 : vector<2x32xf32> to vector<2x1x32xf32>
    %223 = vector.broadcast %221 : vector<2x32x1xf32> to vector<2x32x32xf32>
    %224 = vector.broadcast %222 : vector<2x1x32xf32> to vector<2x32x32xf32>
    %225 = arith.mulf %223, %224 : vector<2x32x32xf32>
    %226 = vector.shape_cast %220 : vector<2x32xf32> to vector<2x32x1xf32>
    %227 = vector.broadcast %226 : vector<2x32x1xf32> to vector<2x32x32xf32>
    %228 = arith.subf %225, %227 : vector<2x32x32xf32>
    %229 = math.exp %228 : vector<2x32x32xf32>
    %230 = vector.shape_cast %188 : vector<2x32xf32> to vector<2x1x32xf32>
    %231 = vector.broadcast %230 : vector<2x1x32xf32> to vector<2x32x32xf32>
    %232 = arith.mulf %229, %231 : vector<2x32x32xf32>
    %cst_80 = arith.constant dense<0.000000e+00> : vector<2x32xf32>
    %233 = vector.multi_reduction <add>, %232, %cst_80 [2] : vector<2x32x32xf32> to vector<2x32xf32>
    %cst_81 = arith.constant dense<0.000000e+00> : vector<2x32xf32>
    %234 = vector.multi_reduction <add>, %229, %cst_81 [2] : vector<2x32x32xf32> to vector<2x32xf32>
    %235 = tpu.reciprocal %234 : vector<2x32xf32> -> vector<2x32xf32>
    %236 = arith.mulf %233, %235 : vector<2x32xf32>
    %237 = arith.addf %186, %236 : vector<2x32xf32>
    %c8 = arith.constant 8 : index
    %c0_82 = arith.constant 0 : index
    %238 = vector.load %arg9[%c8, %c0_82] : memref<14x32xf32, #tpu.memory_space<vmem>>, vector<2x32xf32>
    %c8_83 = arith.constant 8 : index
    %c0_84 = arith.constant 0 : index
    %239 = vector.load %arg10[%c8_83, %c0_84] : memref<14x32xf32, #tpu.memory_space<vmem>>, vector<2x32xf32>
    %cst_85 = arith.constant dense<0.000000e+00> : vector<2xf32>
    %240 = vector.multi_reduction <add>, %237, %cst_85 [1] : vector<2x32xf32> to vector<2xf32>
    %241 = vector.shape_cast %240 : vector<2xf32> to vector<2x1xf32>
    %cst_86 = arith.constant 3.200000e+01 : f32
    %242 = vector.broadcast %cst_86 : f32 to vector<2x1xf32>
    %243 = arith.divf %241, %242 : vector<2x1xf32>
    %244 = vector.broadcast %243 : vector<2x1xf32> to vector<2x32xf32>
    %245 = arith.subf %237, %244 : vector<2x32xf32>
    %246 = arith.mulf %245, %245 : vector<2x32xf32>
    %cst_87 = arith.constant dense<0.000000e+00> : vector<2xf32>
    %247 = vector.multi_reduction <add>, %246, %cst_87 [1] : vector<2x32xf32> to vector<2xf32>
    %248 = vector.shape_cast %247 : vector<2xf32> to vector<2x1xf32>
    %cst_88 = arith.constant 3.200000e+01 : f32
    %249 = vector.broadcast %cst_88 : f32 to vector<2x1xf32>
    %250 = arith.divf %248, %249 : vector<2x1xf32>
    %251 = vector.broadcast %243 : vector<2x1xf32> to vector<2x32xf32>
    %252 = arith.subf %237, %251 : vector<2x32xf32>
    %cst_89 = arith.constant 9.99999974E-6 : f32
    %253 = vector.broadcast %cst_89 : f32 to vector<2x1xf32>
    %254 = arith.addf %250, %253 : vector<2x1xf32>
    %255 = math.rsqrt %254 : vector<2x1xf32>
    %256 = vector.broadcast %255 : vector<2x1xf32> to vector<2x32xf32>
    %257 = arith.mulf %252, %256 : vector<2x32xf32>
    %cst_90 = arith.constant dense<0.000000e+00> : vector<2x32xf32>
    %258 = tpu.matmul %257, %31, %cst_90 {dimension_numbers = #tpu.dot_dimension_numbers<[1], [0], [0], [1], [0, 0, 1, 1], [], []>} : vector<2x32xf32>, vector<32x32xf32>, vector<2x32xf32> -> vector<2x32xf32>
    %259 = vector.broadcast %32 : vector<1x32xf32> to vector<2x32xf32>
    %260 = arith.addf %258, %259 : vector<2x32xf32>
    %cst_91 = arith.constant dense<0xFF800000> : vector<2xf32>
    %261 = vector.multi_reduction <maximumf>, %238, %cst_91 [1] : vector<2x32xf32> to vector<2xf32>
    %262 = vector.shape_cast %261 : vector<2xf32> to vector<2x1xf32>
    %cst_92 = arith.constant dense<0x7F800000> : vector<2xf32>
    %263 = vector.multi_reduction <minimumf>, %238, %cst_92 [1] : vector<2x32xf32> to vector<2xf32>
    %264 = vector.shape_cast %263 : vector<2xf32> to vector<2x1xf32>
    %cst_93 = arith.constant 0.000000e+00 : f32
    %265 = vector.broadcast %cst_93 : f32 to vector<2x32xf32>
    %266 = arith.cmpf oge, %260, %265 : vector<2x32xf32>
    %267 = vector.broadcast %262 : vector<2x1xf32> to vector<2x32xf32>
    %268 = arith.mulf %260, %267 : vector<2x32xf32>
    %269 = vector.broadcast %264 : vector<2x1xf32> to vector<2x32xf32>
    %270 = arith.mulf %260, %269 : vector<2x32xf32>
    %271 = arith.select %266, %268, %270 : vector<2x32xi1>, vector<2x32xf32>
    %272 = vector.shape_cast %260 : vector<2x32xf32> to vector<2x32x1xf32>
    %273 = vector.shape_cast %238 : vector<2x32xf32> to vector<2x1x32xf32>
    %274 = vector.broadcast %272 : vector<2x32x1xf32> to vector<2x32x32xf32>
    %275 = vector.broadcast %273 : vector<2x1x32xf32> to vector<2x32x32xf32>
    %276 = arith.mulf %274, %275 : vector<2x32x32xf32>
    %277 = vector.shape_cast %271 : vector<2x32xf32> to vector<2x32x1xf32>
    %278 = vector.broadcast %277 : vector<2x32x1xf32> to vector<2x32x32xf32>
    %279 = arith.subf %276, %278 : vector<2x32x32xf32>
    %280 = math.exp %279 : vector<2x32x32xf32>
    %281 = vector.shape_cast %239 : vector<2x32xf32> to vector<2x1x32xf32>
    %282 = vector.broadcast %281 : vector<2x1x32xf32> to vector<2x32x32xf32>
    %283 = arith.mulf %280, %282 : vector<2x32x32xf32>
    %cst_94 = arith.constant dense<0.000000e+00> : vector<2x32xf32>
    %284 = vector.multi_reduction <add>, %283, %cst_94 [2] : vector<2x32x32xf32> to vector<2x32xf32>
    %cst_95 = arith.constant dense<0.000000e+00> : vector<2x32xf32>
    %285 = vector.multi_reduction <add>, %280, %cst_95 [2] : vector<2x32x32xf32> to vector<2x32xf32>
    %286 = tpu.reciprocal %285 : vector<2x32xf32> -> vector<2x32xf32>
    %287 = arith.mulf %284, %286 : vector<2x32xf32>
    %288 = arith.addf %237, %287 : vector<2x32xf32>
    %c10 = arith.constant 10 : index
    %c0_96 = arith.constant 0 : index
    %289 = vector.load %arg9[%c10, %c0_96] : memref<14x32xf32, #tpu.memory_space<vmem>>, vector<2x32xf32>
    %c10_97 = arith.constant 10 : index
    %c0_98 = arith.constant 0 : index
    %290 = vector.load %arg10[%c10_97, %c0_98] : memref<14x32xf32, #tpu.memory_space<vmem>>, vector<2x32xf32>
    %cst_99 = arith.constant dense<0.000000e+00> : vector<2xf32>
    %291 = vector.multi_reduction <add>, %288, %cst_99 [1] : vector<2x32xf32> to vector<2xf32>
    %292 = vector.shape_cast %291 : vector<2xf32> to vector<2x1xf32>
    %cst_100 = arith.constant 3.200000e+01 : f32
    %293 = vector.broadcast %cst_100 : f32 to vector<2x1xf32>
    %294 = arith.divf %292, %293 : vector<2x1xf32>
    %295 = vector.broadcast %294 : vector<2x1xf32> to vector<2x32xf32>
    %296 = arith.subf %288, %295 : vector<2x32xf32>
    %297 = arith.mulf %296, %296 : vector<2x32xf32>
    %cst_101 = arith.constant dense<0.000000e+00> : vector<2xf32>
    %298 = vector.multi_reduction <add>, %297, %cst_101 [1] : vector<2x32xf32> to vector<2xf32>
    %299 = vector.shape_cast %298 : vector<2xf32> to vector<2x1xf32>
    %cst_102 = arith.constant 3.200000e+01 : f32
    %300 = vector.broadcast %cst_102 : f32 to vector<2x1xf32>
    %301 = arith.divf %299, %300 : vector<2x1xf32>
    %302 = vector.broadcast %294 : vector<2x1xf32> to vector<2x32xf32>
    %303 = arith.subf %288, %302 : vector<2x32xf32>
    %cst_103 = arith.constant 9.99999974E-6 : f32
    %304 = vector.broadcast %cst_103 : f32 to vector<2x1xf32>
    %305 = arith.addf %301, %304 : vector<2x1xf32>
    %306 = math.rsqrt %305 : vector<2x1xf32>
    %307 = vector.broadcast %306 : vector<2x1xf32> to vector<2x32xf32>
    %308 = arith.mulf %303, %307 : vector<2x32xf32>
    %cst_104 = arith.constant dense<0.000000e+00> : vector<2x32xf32>
    %309 = tpu.matmul %308, %31, %cst_104 {dimension_numbers = #tpu.dot_dimension_numbers<[1], [0], [0], [1], [0, 0, 1, 1], [], []>} : vector<2x32xf32>, vector<32x32xf32>, vector<2x32xf32> -> vector<2x32xf32>
    %310 = vector.broadcast %32 : vector<1x32xf32> to vector<2x32xf32>
    %311 = arith.addf %309, %310 : vector<2x32xf32>
    %cst_105 = arith.constant dense<0xFF800000> : vector<2xf32>
    %312 = vector.multi_reduction <maximumf>, %289, %cst_105 [1] : vector<2x32xf32> to vector<2xf32>
    %313 = vector.shape_cast %312 : vector<2xf32> to vector<2x1xf32>
    %cst_106 = arith.constant dense<0x7F800000> : vector<2xf32>
    %314 = vector.multi_reduction <minimumf>, %289, %cst_106 [1] : vector<2x32xf32> to vector<2xf32>
    %315 = vector.shape_cast %314 : vector<2xf32> to vector<2x1xf32>
    %cst_107 = arith.constant 0.000000e+00 : f32
    %316 = vector.broadcast %cst_107 : f32 to vector<2x32xf32>
    %317 = arith.cmpf oge, %311, %316 : vector<2x32xf32>
    %318 = vector.broadcast %313 : vector<2x1xf32> to vector<2x32xf32>
    %319 = arith.mulf %311, %318 : vector<2x32xf32>
    %320 = vector.broadcast %315 : vector<2x1xf32> to vector<2x32xf32>
    %321 = arith.mulf %311, %320 : vector<2x32xf32>
    %322 = arith.select %317, %319, %321 : vector<2x32xi1>, vector<2x32xf32>
    %323 = vector.shape_cast %311 : vector<2x32xf32> to vector<2x32x1xf32>
    %324 = vector.shape_cast %289 : vector<2x32xf32> to vector<2x1x32xf32>
    %325 = vector.broadcast %323 : vector<2x32x1xf32> to vector<2x32x32xf32>
    %326 = vector.broadcast %324 : vector<2x1x32xf32> to vector<2x32x32xf32>
    %327 = arith.mulf %325, %326 : vector<2x32x32xf32>
    %328 = vector.shape_cast %322 : vector<2x32xf32> to vector<2x32x1xf32>
    %329 = vector.broadcast %328 : vector<2x32x1xf32> to vector<2x32x32xf32>
    %330 = arith.subf %327, %329 : vector<2x32x32xf32>
    %331 = math.exp %330 : vector<2x32x32xf32>
    %332 = vector.shape_cast %290 : vector<2x32xf32> to vector<2x1x32xf32>
    %333 = vector.broadcast %332 : vector<2x1x32xf32> to vector<2x32x32xf32>
    %334 = arith.mulf %331, %333 : vector<2x32x32xf32>
    %cst_108 = arith.constant dense<0.000000e+00> : vector<2x32xf32>
    %335 = vector.multi_reduction <add>, %334, %cst_108 [2] : vector<2x32x32xf32> to vector<2x32xf32>
    %cst_109 = arith.constant dense<0.000000e+00> : vector<2x32xf32>
    %336 = vector.multi_reduction <add>, %331, %cst_109 [2] : vector<2x32x32xf32> to vector<2x32xf32>
    %337 = tpu.reciprocal %336 : vector<2x32xf32> -> vector<2x32xf32>
    %338 = arith.mulf %335, %337 : vector<2x32xf32>
    %339 = arith.addf %288, %338 : vector<2x32xf32>
    %c12 = arith.constant 12 : index
    %c0_110 = arith.constant 0 : index
    %340 = vector.load %arg9[%c12, %c0_110] : memref<14x32xf32, #tpu.memory_space<vmem>>, vector<2x32xf32>
    %c12_111 = arith.constant 12 : index
    %c0_112 = arith.constant 0 : index
    %341 = vector.load %arg10[%c12_111, %c0_112] : memref<14x32xf32, #tpu.memory_space<vmem>>, vector<2x32xf32>
    %cst_113 = arith.constant dense<0.000000e+00> : vector<2xf32>
    %342 = vector.multi_reduction <add>, %339, %cst_113 [1] : vector<2x32xf32> to vector<2xf32>
    %343 = vector.shape_cast %342 : vector<2xf32> to vector<2x1xf32>
    %cst_114 = arith.constant 3.200000e+01 : f32
    %344 = vector.broadcast %cst_114 : f32 to vector<2x1xf32>
    %345 = arith.divf %343, %344 : vector<2x1xf32>
    %346 = vector.broadcast %345 : vector<2x1xf32> to vector<2x32xf32>
    %347 = arith.subf %339, %346 : vector<2x32xf32>
    %348 = arith.mulf %347, %347 : vector<2x32xf32>
    %cst_115 = arith.constant dense<0.000000e+00> : vector<2xf32>
    %349 = vector.multi_reduction <add>, %348, %cst_115 [1] : vector<2x32xf32> to vector<2xf32>
    %350 = vector.shape_cast %349 : vector<2xf32> to vector<2x1xf32>
    %cst_116 = arith.constant 3.200000e+01 : f32
    %351 = vector.broadcast %cst_116 : f32 to vector<2x1xf32>
    %352 = arith.divf %350, %351 : vector<2x1xf32>
    %353 = vector.broadcast %345 : vector<2x1xf32> to vector<2x32xf32>
    %354 = arith.subf %339, %353 : vector<2x32xf32>
    %cst_117 = arith.constant 9.99999974E-6 : f32
    %355 = vector.broadcast %cst_117 : f32 to vector<2x1xf32>
    %356 = arith.addf %352, %355 : vector<2x1xf32>
    %357 = math.rsqrt %356 : vector<2x1xf32>
    %358 = vector.broadcast %357 : vector<2x1xf32> to vector<2x32xf32>
    %359 = arith.mulf %354, %358 : vector<2x32xf32>
    %cst_118 = arith.constant dense<0.000000e+00> : vector<2x32xf32>
    %360 = tpu.matmul %359, %31, %cst_118 {dimension_numbers = #tpu.dot_dimension_numbers<[1], [0], [0], [1], [0, 0, 1, 1], [], []>} : vector<2x32xf32>, vector<32x32xf32>, vector<2x32xf32> -> vector<2x32xf32>
    %361 = vector.broadcast %32 : vector<1x32xf32> to vector<2x32xf32>
    %362 = arith.addf %360, %361 : vector<2x32xf32>
    %cst_119 = arith.constant dense<0xFF800000> : vector<2xf32>
    %363 = vector.multi_reduction <maximumf>, %340, %cst_119 [1] : vector<2x32xf32> to vector<2xf32>
    %364 = vector.shape_cast %363 : vector<2xf32> to vector<2x1xf32>
    %cst_120 = arith.constant dense<0x7F800000> : vector<2xf32>
    %365 = vector.multi_reduction <minimumf>, %340, %cst_120 [1] : vector<2x32xf32> to vector<2xf32>
    %366 = vector.shape_cast %365 : vector<2xf32> to vector<2x1xf32>
    %cst_121 = arith.constant 0.000000e+00 : f32
    %367 = vector.broadcast %cst_121 : f32 to vector<2x32xf32>
    %368 = arith.cmpf oge, %362, %367 : vector<2x32xf32>
    %369 = vector.broadcast %364 : vector<2x1xf32> to vector<2x32xf32>
    %370 = arith.mulf %362, %369 : vector<2x32xf32>
    %371 = vector.broadcast %366 : vector<2x1xf32> to vector<2x32xf32>
    %372 = arith.mulf %362, %371 : vector<2x32xf32>
    %373 = arith.select %368, %370, %372 : vector<2x32xi1>, vector<2x32xf32>
    %374 = vector.shape_cast %362 : vector<2x32xf32> to vector<2x32x1xf32>
    %375 = vector.shape_cast %340 : vector<2x32xf32> to vector<2x1x32xf32>
    %376 = vector.broadcast %374 : vector<2x32x1xf32> to vector<2x32x32xf32>
    %377 = vector.broadcast %375 : vector<2x1x32xf32> to vector<2x32x32xf32>
    %378 = arith.mulf %376, %377 : vector<2x32x32xf32>
    %379 = vector.shape_cast %373 : vector<2x32xf32> to vector<2x32x1xf32>
    %380 = vector.broadcast %379 : vector<2x32x1xf32> to vector<2x32x32xf32>
    %381 = arith.subf %378, %380 : vector<2x32x32xf32>
    %382 = math.exp %381 : vector<2x32x32xf32>
    %383 = vector.shape_cast %341 : vector<2x32xf32> to vector<2x1x32xf32>
    %384 = vector.broadcast %383 : vector<2x1x32xf32> to vector<2x32x32xf32>
    %385 = arith.mulf %382, %384 : vector<2x32x32xf32>
    %cst_122 = arith.constant dense<0.000000e+00> : vector<2x32xf32>
    %386 = vector.multi_reduction <add>, %385, %cst_122 [2] : vector<2x32x32xf32> to vector<2x32xf32>
    %cst_123 = arith.constant dense<0.000000e+00> : vector<2x32xf32>
    %387 = vector.multi_reduction <add>, %382, %cst_123 [2] : vector<2x32x32xf32> to vector<2x32xf32>
    %388 = tpu.reciprocal %387 : vector<2x32xf32> -> vector<2x32xf32>
    %389 = arith.mulf %386, %388 : vector<2x32xf32>
    %390 = arith.addf %339, %389 : vector<2x32xf32>
    %c0_124 = arith.constant 0 : index
    %c0_125 = arith.constant 0 : index
    %391 = vector.load %arg8[%c0_124, %c0_125] : memref<2x32xf32, #tpu.memory_space<vmem>>, vector<2x32xf32>
    tpu.vector_store %arg8[%c0_124, %c0_125], %390 {strides = array<i32>} : memref<2x32xf32, #tpu.memory_space<vmem>>, vector<2x32xf32>,
    return
  }
}

</mosaic_0001>

<bundles_post_ra>
// kernel: tpu_custom_call.1
= control target key start
LH: loop header
LB: loop body
LE: loop exit
PB: predicated region body
PF: predicated region fallthrough
CT: control target
= control target key end

     0   :  { %13 = vsyncpa [#allocation5], 0  ;;  %s4439_s0 = inlined_call_operand.hbm [shape: f32[2,32], index: 0, kind: input, shape index: {}]   ;;  %s4440_s1 = inlined_call_operand.hbm [shape: f32[14,32], index: 1, kind: input, shape index: {}]   ;;  %s4441_s2 = inlined_call_operand.hbm [shape: f32[32,32], index: 2, kind: input, shape index: {}]   ;;  %s4442_s3 = inlined_call_operand.vmem [shape: f32[1,32], index: 3, kind: input, shape index: {}]   ;;  %s4443_s4 = inlined_call_operand.hbm [shape: f32[32,32], index: 4, kind: input, shape index: {}]   ;;  %s4444_s5 = inlined_call_operand.vmem [shape: f32[1,32], index: 5, kind: input, shape index: {}]   ;;  %s4445_s6 = inlined_call_operand.hbm [shape: f32[32,32], index: 6, kind: input, shape index: {}]   ;;  %s4446_s7 = inlined_call_operand.vmem [shape: f32[1,32], index: 7, kind: input, shape index: {}]   ;;  %s4447_s8 = inlined_call_operand.hbm [shape: f32[2,32], index: 8, kind: output, shape index: {}]  }
   0x1   :  { %14 = vsyncpa [#allocation8], 0 }
   0x2   :  { %15 = vsyncpa [#allocation11], 0 }
   0x3   :  { %16 = vsyncpa [#allocation6], 0  ;;  %s3729_s27 = smov [#allocation7]   ;;  %s3589_s9 = scalar_lea.hbm %s4440_s1, 256 }
   0x4   :  { %s32_s28 = sshll.u32 %s3729_s27, 4  ;;  %p3590_p0 = scmp.ne.s32.totalorder %s4440_s1, %s3589_s9  ;;  %s33_s28 = int_to_ptr.vmem [resolvable:$true] %s32_s28 }
   0x5   :  { %p3593_p1 = scmp.lt.u32.totalorder %s3589_s9, %s4440_s1 }
   0x7   :  { %p3595_p2 = pnand %p3593_p1, %p3590_p0 }
   0x9   :  { %3598 = shalt.err (!%p3595_p2)
}
   0xa   :  { %s3599_s14 = scalar_lea.vmem %s33_s28, 256  ;;  %p3604_p4 = scmp.lt.s32.totalorder %s33_s28, %s33_s28 }
   0xb   :  { %p3600_p3 = scmp.ne.s32.totalorder %s33_s28, %s3599_s14  ;;  %p3605_p5 = scmp.lt.s32.totalorder %s3599_s14, %s3599_s14 }
   0xd   :  { %p3606_p6 = por %p3605_p5, %p3604_p4 }
   0xf   :  { %p3607_p7 = pnand %p3606_p6, %p3600_p3 }
  0x11   :  { %3610 = shalt.err (!%p3607_p7)
}
  0x12   :  { %s3730_s15 = smov 128   ;;  %s3731_s16 = smov 8  }
  0x13   :  { %38 = dma.hbm_to_vmem [thread:$0]  %s4440_s1, 256, %s33_s28, [#allocation8], %s3730_s15, %s3730_s15, %s3731_s16  }
  0x14   :  { %s3732_s19 = smov [#allocation10]   ;;  %s3733_s21 = smov [#allocation4]  }
  0x15   :  { %s58_s20 = sshll.u32 %s3732_s19, 4  ;;  %s23_s22 = sshll.u32 %s3733_s21, 4  ;;  %s59_s20 = int_to_ptr.vmem [resolvable:$true] %s58_s20  ;;  %s24_s22 = int_to_ptr.vmem [resolvable:$true] %s23_s22 }
  0x16   :  { %s3611_s25 = scalar_lea.hbm %s4443_s4, 512 }
  0x17   :  { %p3612_p8 = scmp.ne.s32.totalorder %s4443_s4, %s3611_s25  ;;  %p3615_p9 = scmp.lt.u32.totalorder %s3611_s25, %s4443_s4 }
  0x19   :  { %p3617_p10 = pnand %p3615_p9, %p3612_p8 }
  0x1b   :  { %3620 = shalt.err (!%p3617_p10)
}
  0x1c   :  { %s3621_s1 = scalar_lea.vmem %s59_s20, 512  ;;  %p3626_p12 = scmp.lt.s32.totalorder %s59_s20, %s59_s20 }
  0x1d   :  { %p3622_p11 = scmp.ne.s32.totalorder %s59_s20, %s3621_s1  ;;  %p3627_p13 = scmp.lt.s32.totalorder %s3621_s1, %s3621_s1 }
  0x1f   :  { %p3628_p0 = por %p3627_p13, %p3626_p12 }
  0x21   :  { %p3629_p1 = pnand %p3628_p0, %p3622_p11 }
  0x23   :  { %3632 = shalt.err (!%p3629_p1)
}
  0x24   :  { %64 = dma.hbm_to_vmem [thread:$0]  %s4443_s4, 512, %s59_s20, [#allocation11], %s3730_s15, %s3730_s15, %s3731_s16  }
  0x25   :  { %s3633_s12 = scalar_lea.hbm %s4439_s0, 32 }
  0x26   :  { %p3634_p2 = scmp.ne.s32.totalorder %s4439_s0, %s3633_s12  ;;  %p3637_p3 = scmp.lt.u32.totalorder %s3633_s12, %s4439_s0 }
  0x28   :  { %p3639_p4 = pnand %p3637_p3, %p3634_p2 }
  0x2a   :  { %3642 = shalt.err (!%p3639_p4)
}
  0x2b   :  { %s3643_s19 = scalar_lea.vmem %s24_s22, 32  ;;  %p3648_p6 = scmp.lt.s32.totalorder %s24_s22, %s24_s22 }
  0x2c   :  { %p3644_p5 = scmp.ne.s32.totalorder %s24_s22, %s3643_s19  ;;  %p3649_p7 = scmp.lt.s32.totalorder %s3643_s19, %s3643_s19 }
  0x2e   :  { %p3650_p8 = por %p3649_p7, %p3648_p6 }
  0x30   :  { %p3651_p9 = pnand %p3650_p8, %p3644_p5 }
  0x32   :  { %3654 = shalt.err (!%p3651_p9)
}
  0x33   :  { %26 = dma.hbm_to_vmem [thread:$0]  %s4439_s0, 32, %s24_s22, [#allocation5]  }
  0x34   :  { %s3734_s21 = smov [#allocation9]   ;;  %s3735_s24 = smov [#allocation12]  }
  0x35   :  { %s44_s23 = sshll.u32 %s3734_s21, 4  ;;  %s72_s25 = sshll.u32 %s3735_s24, 4  ;;  %s45_s23 = int_to_ptr.vmem [resolvable:$true] %s44_s23  ;;  %s73_s25 = int_to_ptr.vmem [resolvable:$true] %s72_s25 }
  0x36   :  { %s3655_s29 = scalar_lea.hbm %s4441_s2, 512 }
  0x37   :  { %p3656_p10 = scmp.ne.s32.totalorder %s4441_s2, %s3655_s29  ;;  %p3659_p11 = scmp.lt.u32.totalorder %s3655_s29, %s4441_s2 }
  0x39   :  { %p3661_p12 = pnand %p3659_p11, %p3656_p10 }
  0x3b   :  { %3664 = shalt.err (!%p3661_p12)
}
  0x3c   :  { %s3665_s0 = scalar_lea.vmem %s45_s23, 512  ;;  %p3670_p0 = scmp.lt.s32.totalorder %s45_s23, %s45_s23 }
  0x3d   :  { %p3666_p13 = scmp.ne.s32.totalorder %s45_s23, %s3665_s0  ;;  %p3671_p1 = scmp.lt.s32.totalorder %s3665_s0, %s3665_s0 }
  0x3f   :  { %p3672_p2 = por %p3671_p1, %p3670_p0 }
  0x41   :  { %p3673_p3 = pnand %p3672_p2, %p3666_p13 }
  0x43   :  { %3676 = shalt.err (!%p3673_p3)
}
  0x44   :  { %50 = dma.hbm_to_vmem [thread:$0]  %s4441_s2, 512, %s45_s23, [#allocation8], %s3730_s15, %s3730_s15, %s3731_s16  }
  0x45   :  { %s3677_s13 = scalar_lea.hbm %s4445_s6, 512 }
  0x46   :  { %p3678_p4 = scmp.ne.s32.totalorder %s4445_s6, %s3677_s13  ;;  %p3681_p5 = scmp.lt.u32.totalorder %s3677_s13, %s4445_s6 }
  0x48   :  { %p3683_p6 = pnand %p3681_p5, %p3678_p4 }
  0x4a   :  { %3686 = shalt.err (!%p3683_p6)
}
  0x4b   :  { %s3687_s4 = scalar_lea.vmem %s73_s25, 512  ;;  %p3692_p8 = scmp.lt.s32.totalorder %s73_s25, %s73_s25 }
  0x4c   :  { %p3688_p7 = scmp.ne.s32.totalorder %s73_s25, %s3687_s4  ;;  %p3693_p9 = scmp.lt.s32.totalorder %s3687_s4, %s3687_s4 }
  0x4e   :  { %p3694_p10 = por %p3693_p9, %p3692_p8 }
  0x50   :  { %p3695_p11 = pnand %p3694_p10, %p3688_p7 }
  0x52   :  { %3698 = shalt.err (!%p3695_p11)
}
  0x53   :  { %78 = dma.hbm_to_vmem [thread:$0]  %s4445_s6, 512, %s73_s25, [#allocation11], %s3730_s15, %s3730_s15, %s3731_s16  }
  0x54   :  { %3721 = dma.done.wait [#allocation5], 32  }
  0x55   :  { %3722 = vsyncadd [#allocation5], 4294967264 }
  0x56   :  { %3723 = dma.done.wait [#allocation8], 768  }
  0x57   :  { %3724 = vsyncadd [#allocation8], 4294966528 }
  0x58   :  { %3725 = dma.done.wait [#allocation11], 1024  }
  0x59   :  { %3726 = vsyncadd [#allocation11], 4294966272  ;;  %vm98_vm0 = vcmask 261120   ;;  %v96_v0 = vld [vmem:[#allocation7] sm:$0xff]  ;;  %v97_v1 = vld [vmem:[#allocation7 + $0x8] sm:$0x3f]  ;;  %v420_v60 = vlaneseq }
  0x5a   :  { %vm102_vm1 = vcmask 259072   ;;  %v99_v2 = vsel %vm98_vm0, %v96_v0, 0.0  ;;  %v3860_v4 = vld [vmem:[#allocation4] sm:$0x3]  ;;  %vm317_vm2 = vcmask 254976   ;;  %v127_v21 = vld [vmem:[#allocation10] sm:$0xff] }
  0x5b   :  { %100 = vadd.xlane.f32.xlu0 %v99_v2  ;;  %v103_v3 = vsel %vm102_vm1, %v97_v1, 0.0  ;;  %v318_v5 = vsel %vm317_vm2, %v3860_v4, 0.0  ;;  %v128_v22 = vld [vmem:[#allocation10 + $0x8] sm:$0xff]  ;;  %v221_v24 = vld [vmem:[#allocation12] sm:$0xff]  ;;  %v129_v27 = vld [vmem:[#allocation10 + $0x10] sm:$0xff]  ;;  %v3736_v33 = vmov 0.0|0.0  }
  0x5c   :  { %v3267_v23 = vpack.c.bf16 %v128_v22, %v127_v21  ;;  %v222_v25 = vld [vmem:[#allocation12 + $0x8] sm:$0xff]  ;;  %v130_v28 = vld [vmem:[#allocation10 + $0x18] sm:$0xff]  ;;  %v223_v30 = vld [vmem:[#allocation12 + $0x10] sm:$0xff]  ;;  %vm3737_vm3 = vmmov 0   ;;  %v3738_v53 = vmov 0.0   ;;  %vm685_vm5 = vcmask 130112  }
  0x5d   :  { %v3275_v26 = vpack.c.bf16 %v222_v25, %v221_v24  ;;  %v3271_v29 = vpack.c.bf16 %v130_v28, %v129_v27  ;;  %v224_v31 = vld [vmem:[#allocation12 + $0x18] sm:$0xff]  ;;  %v309_v45 = vld [vmem:[#allocation9] sm:$0xff]  ;;  %v310_v46 = vld [vmem:[#allocation9 + $0x8] sm:$0xff]  ;;  %v3739_v61 = vmov 1966171168   ;;  %vm692_vm6 = vcmask 195712  }
  0x5e   :  { %3268 = vmatprep.subr.bf16.mxu0 %v3267_v23  ;;  %v3279_v32 = vpack.c.bf16 %v224_v31, %v223_v30  ;;  %v3876_v48 = vpack.c.bf16 %v310_v46, %v309_v45  ;;  %v311_v50 = vld [vmem:[#allocation9 + $0x10] sm:$0xff]  ;;  %v312_v51 = vld [vmem:[#allocation9 + $0x18] sm:$0xff]  ;;  %v3100_v56 = vld [vmem:[%s4444_s5] ss:$0 sm:$0xff]  ;;  %v460_v62 = vunpack.c.l.s4 %v3739_v61  ;;  %vm699_vm7 = vcmask 261312  }
  0x5f   :  { %104 = vadd.xlane.f32.xlu0 %v103_v3  ;;  %3270 = vmatpush3.bf16.msra.mxu0 %v3267_v23  ;;  %v3881_v52 = vpack.c.bf16 %v312_v51, %v311_v50  ;;  %v3103_v57 = vld [vmem:[%s4446_s7] ss:$0 sm:$0xff]  ;;  %vm720_vm8 = vcmask 1041409  }
  0x60   :  { %3276 = vmatprep.subr.bf16.mxu1 %v3275_v26  ;;  %3272 = vmatprep.subr.bf16.mxu0 %v3271_v29  ;;  %v3954_v25 = vld [vmem:[%s4442_s3] ss:$0 sm:$0xff] }
  0x61   :  { %3278 = vmatpush3.bf16.msra.mxu1 %v3275_v26 }
  0x62   :  { %3280 = vmatprep.subr.bf16.mxu1 %v3279_v32 }
  0x63   :  { %319 = vadd.xlane.f32.xlu0 %v318_v5  ;;  %3274 = vmatpush3.bf16.msra.mxu0 %v3271_v29 }
  0x64   :  { %3283 = vmatprep.subr.bf16.mxu0 %v3736_v33 }
  0x65   :  { %3282 = vmatpush3.bf16.msra.mxu1 %v3279_v32 }
  0x66   :  { %3289 = vmatprep.subr.bf16.mxu1 %v3736_v33 }
  0xe8   :  { %v101_v6 = vpop.xlane.xlu0 %100 }
  0xe9   :  { %v107_v7 = vmul.f32 0.03125, %v101_v6  ;;  %v3913_v6 = vshrl.u32 %v420_v60, 7 }
  0xeb   :  { %v109_v8 = vsub.f32 %v96_v0, %v107_v7  ;;  %v461_v7 = vunpack.c.0.s8 %v460_v62  ;;  %v3967_v31 = vsub.s32 0, %v3913_v6 }
  0xec   :  { %v105_v9 = vpop.xlane.xlu0 %104 }
  0xed   :  { %v108_v10 = vmul.f32 0.03125, %v105_v9  ;;  %v111_v11 = vmul.f32 %v109_v8, %v109_v8  ;;  %v3916_v9 = vsub.s32 %v461_v7, %v3913_v6 }
  0xef   :  { %v110_v12 = vsub.f32 %v97_v1, %v108_v10  ;;  %v113_v13 = vsel %vm98_vm0, %v111_v11, 0.0 }
  0xf0   :  { %114 = vadd.xlane.f32.xlu1 %v113_v13  ;;  %v320_v14 = vpop.xlane.xlu0 %319 }
  0xf1   :  { %v321_v15 = vmul.f32 0.03125, %v320_v14  ;;  %v112_v16 = vmul.f32 %v110_v12, %v110_v12 }
  0xf3   :  { %v3866_v17 = vsub.f32 %v3860_v4, %v321_v15  ;;  %v116_v18 = vsel %vm102_vm1, %v112_v16, 0.0 }
  0xf4   :  { %117 = vadd.xlane.f32.xlu1 %v116_v18 }
  0xf5   :  { %v323_v19 = vmul.f32 %v3866_v17, %v3866_v17 }
  0xf7   :  { %v324_v20 = vsel %vm317_vm2, %v323_v19, 0.0 }
  0xf8   :  { %325 = vadd.xlane.f32.xlu1 %v324_v20 }
 0x17d   :  { %v115_v34 = vpop.xlane.xlu1 %114 }
 0x17e   :  { %v119_v35 = vmul.f32 0.03125, %v115_v34 }
 0x180   :  { %v121_v36 = vadd.f32 1e-05, %v119_v35 }
 0x181   :  { %v118_v37 = vpop.xlane.xlu1 %117 }
 0x182   :  { %3337 = vrsqrt.f32 %v121_v36  ;;  %v120_v38 = vmul.f32 0.03125, %v118_v37 }
 0x184   :  { %v122_v39 = vadd.f32 1e-05, %v120_v38 }
 0x185   :  { %v326_v40 = vpop.xlane.xlu1 %325 }
 0x186   :  { %3339 = vrsqrt.f32 %v122_v39  ;;  %v327_v41 = vmul.f32 0.03125, %v326_v40  ;;  %v3983_v39 = vsub.s32 1, %v3913_v6 }
 0x188   :  { %v328_v42 = vadd.f32 1e-05, %v327_v41 }
 0x18a   :  { %3341 = vrsqrt.f32 %v328_v42 }
 0x18c   :  { %v3338_v43 = vpop.eup %3337 }
 0x18d   :  { %v125_v44 = vmul.f32 %v3338_v43, %v109_v8 }
 0x18f   :  { %3176 = vmatprep.mubr.msk.f32.mxu0 %vm98_vm0, %v125_v44  ;;  %3187 = vmatprep.mubr.msk.f32.mxu1 %vm98_vm0, %v125_v44 }
 0x190   :  { %v3340_v47 = vpop.eup %3339 }
 0x191   :  { %v126_v49 = vmul.f32 %v3340_v47, %v110_v12 }
 0x193   :  { %3177 = vmatmul.mubr.msk.f32.vlgmr.msra.gmra.mrb[0].mxu0 %vm98_vm0, %v126_v49  ;;  %3188 = vmatmul.mubr.msk.f32.vlgmr.msra.gmra.mrb[0].mxu1 %vm98_vm0, %v126_v49 }
 0x194   :  { %3285 = vmatpush3.bf16.msra.mxu0 %v3876_v48  ;;  %3198 = vmatprep.mubr.msk.f32.mxu0 %vm3737_vm3, %v3738_v53  ;;  %v3342_v54 = vpop.eup %3341 }
 0x195   :  { %3286 = vmatprep.subr.bf16.mxu0 %v3736_v33  ;;  %3291 = vmatpush3.bf16.msra.mxu1 %v3876_v48  ;;  %v330_v55 = vmul.f32 %v3342_v54, %v3866_v17 }
 0x196   :  { %3292 = vmatprep.subr.bf16.mxu1 %v3736_v33  ;;  %3209 = vmatprep.mubr.msk.f32.mxu1 %vm3737_vm3, %v3738_v53 }
 0x198   :  { %3288 = vmatpush3.bf16.msra.mxu0 %v3881_v52 }
 0x199   :  { %3294 = vmatpush3.bf16.msra.mxu1 %v3881_v52  ;;  %3295 = vmatprep.subr.bf16.mxu0 %v3736_v33 }
 0x19a   :  { %3301 = vmatprep.subr.bf16.mxu1 %v3736_v33 }
 0x19b   :  { %3199 = vmatmul.mubr.msk.f32.vlgmr.msra.gmra.mrb[2].mxu0 %vm98_vm0, %v330_v55 }
 0x19c   :  { %3297 = vmatpush3.bf16.msra.mxu0 %v3876_v48  ;;  %3220 = vmatprep.mubr.msk.f32.mxu0 %vm3737_vm3, %v3738_v53 }
 0x19d   :  { %3298 = vmatprep.subr.bf16.mxu0 %v3736_v33 }
 0x1a0   :  { %3300 = vmatpush3.bf16.msra.mxu0 %v3881_v52 }
 0x1a1   :  { %3307 = vmatprep.subr.bf16.mxu0 %v3736_v33 }
 0x266   :  { %v3178_v58 = vpop.f32.mrb[0].mxu0  ;;  %v3189_v59 = vpop.f32.mrb[0].mxu1 }
 0x267   :  { %v216_v63 = vadd.f32 %v3178_v58, %v3100_v56  ;;  %v304_v0 = vadd.f32 %v3189_v59, %v3103_v57  ;;  %v210_v1 = vpop.f32.mrb[1].mxu0  ;;  %v298_v2 = vpop.f32.mrb[1].mxu1 }
 0x268   :  { %v211_v3 = vadd.f32 %v3100_v56, %v210_v1  ;;  %v299_v5 = vadd.f32 %v3103_v57, %v298_v2 }
 0x269   :  { %220 = vst.msk [vmem:[#allocation2 + $0x8] sm:$0x3f] %vm102_vm1, %v216_v63  ;;  %308 = vst.msk [vmem:[#allocation3 + $0x8] sm:$0x3f] %vm102_vm1, %v304_v0 }
 0x26a   :  { %219 = vst.msk [vmem:[#allocation2] sm:$0xff] %vm98_vm0, %v211_v3  ;;  %307 = vst.msk [vmem:[#allocation3] sm:$0xff] %vm98_vm0, %v299_v5 }
 0x26e   :  { %v406_v8 = vpop.f32.mrb[2].mxu0 }
 0x26f   :  { %v3200_v10 = vpop.f32.mrb[3].mxu0  ;;  %v407_v30 = vadd.f32 %v3954_v25, %v406_v8 }
 0x270   :  { %v3949_v24 = vld.sshfl [vmem:[#allocation2 + $0x8] sm:$0x11 pattern:$0x75316420] }
 0x271   :  { %v3918_v11 = vld [vmem:[#allocation2] sm:$0x3]  ;;  %v3920_v12 = vld [vmem:[#allocation2 + $0x2] sm:$0x3]  ;;  %v3934_v18 = vld [vmem:[#allocation2 + $0x4] sm:$0x3]  ;;  %v2047_v34 = vcombine.high %v3949_v24, %v3949_v24  ;;  %v2054_v35 = vrot.slane %v3949_v24, %v3916_v9  ;;  %v423_v38 = vrot.slane %v407_v30, %v3967_v31  ;;  %v442_v45 = vrot.slane %v407_v30, %v3983_v39 }
 0x272   :  { %v410_v13 = vsel %vm317_vm2, %v3918_v11, -inf  ;;  %v413_v14 = vsel %vm317_vm2, %v3918_v11, inf  ;;  %v3928_v15 = vrot.slane %v3920_v12, %v3916_v9  ;;  %v3939_v20 = vld.sshfl [vmem:[#allocation2 + $0x6] sm:$0x11 pattern:$0x75316420]  ;;  %v3943_v21 = vrot.slane %v3934_v18, %v3916_v9 }
 0x273   :  { %411 = vmax.xlane.f32.xlu0 %v410_v13  ;;  %414 = vmin.xlane.f32.xlu1 %v413_v14  ;;  %v1654_v27 = vcombine.high %v3939_v20, %v3939_v20  ;;  %v1661_v28 = vrot.slane %v3939_v20, %v3916_v9  ;;  %v3963_v29 = vld.sshfl [vmem:[#allocation2 + $0xa] sm:$0x11 pattern:$0x75316420]  ;;  %v3979_v37 = vrot.slane %v2047_v34, %v3916_v9  ;;  %vm416_vm4 = vcmp.ge.f32.partialorder %v407_v30, 0.0 }
 0x274   :  { %v868_v16 = vcombine.high %v3928_v15, %v3928_v15  ;;  %v875_v17 = vrot.slane %v3928_v15, %v3916_v9  ;;  %v1261_v22 = vcombine.high %v3943_v21, %v3943_v21  ;;  %v1268_v23 = vrot.slane %v3943_v21, %v3916_v9  ;;  %v3976_v36 = vld.sshfl [vmem:[#allocation2 + $0xc] sm:$0x11 pattern:$0x75316420] }
 0x275   :  { %v3970_v32 = vrot.slane %v1654_v27, %v3916_v9  ;;  %v2440_v40 = vcombine.high %v3963_v29, %v3963_v29  ;;  %v2447_v41 = vrot.slane %v3963_v29, %v3916_v9  ;;  %v2833_v43 = vcombine.high %v3976_v36, %v3976_v36 }
 0x276   :  { %v3937_v19 = vrot.slane %v868_v16, %v3916_v9  ;;  %v3957_v26 = vrot.slane %v1261_v22, %v3916_v9  ;;  %v2840_v44 = vrot.slane %v3976_v36, %v3916_v9  ;;  %v465_v62 = vrot.slane %v3918_v11, %v3916_v9 }
 0x277   :  { %v3990_v42 = vrot.slane %v2440_v40, %v3916_v9  ;;  %v3998_v46 = vrot.slane %v2833_v43, %v3916_v9 }
 0x278   :  { %v466_v1 = vcombine.high %v465_v62, %v465_v62  ;;  %v473_v2 = vrot.slane %v465_v62, %v3916_v9 }
 0x27a   :  { %v480_v7 = vrot.slane %v466_v1, %v3916_v9  ;;  %v484_v8 = vrot.slane %v473_v2, %v3967_v31 }
 0x27c   :  { %v488_v22 = vrot.slane %v480_v7, %v3967_v31 }
 0x284   :  { %429 = vbcast.lane.b32.xlu1 %v423_v38, 264 }
 0x288   :  { %444 = vbcast.lane.b32.xlu1 %v442_v45, 256 }
 0x289   :  { %425 = vbcast.lane.b32.xlu0 %v423_v38, 256 }
 0x28c   :  { %448 = vbcast.lane.b32.xlu1 %v442_v45, 264 }
 0x28d   :  { %433 = vbcast.lane.b32.xlu0 %v423_v38, 272 }
 0x290   :  { %452 = vbcast.lane.b32.xlu1 %v442_v45, 272 }
 0x291   :  { %437 = vbcast.lane.b32.xlu0 %v423_v38, 280 }
 0x294   :  { %456 = vbcast.lane.b32.xlu1 %v442_v45, 280 }
 0x300   :  { %v415_v47 = vpop.xlane.xlu1 %414  ;;  %v412_v49 = vpop.xlane.xlu0 %411 }
 0x301   :  { %v418_v50 = vmul.f32 %v415_v47, %v407_v30  ;;  %v417_v51 = vmul.f32 %v412_v49, %v407_v30 }
 0x303   :  { %v419_v54 = vsel %vm416_vm4, %v417_v51, %v418_v50 }
 0x304   :  { %v502_v55 = vrot.slane %v419_v54, %v3967_v31  ;;  %v521_v56 = vrot.slane %v419_v54, %v3983_v39  ;;  %v430_v57 = vpop.permute.xlu1 %429  ;;  %v426_v59 = vpop.permute.xlu0 %425 }
 0x305   :  { %v492_v10 = vmul.f32 %v484_v8, %v430_v57  ;;  %v491_v13 = vmul.f32 %v484_v8, %v426_v59 }
 0x306   :  { %508 = vbcast.lane.b32.xlu1 %v502_v55, 264  ;;  %504 = vbcast.lane.b32.xlu0 %v502_v55, 256 }
 0x308   :  { %v445_v58 = vpop.permute.xlu1 %444  ;;  %v434_v63 = vpop.permute.xlu0 %433 }
 0x309   :  { %v495_v11 = vmul.f32 %v488_v22, %v445_v58  ;;  %v493_v50 = vmul.f32 %v484_v8, %v434_v63 }
 0x30a   :  { %527 = vbcast.lane.b32.xlu1 %v521_v56, 264  ;;  %523 = vbcast.lane.b32.xlu0 %v521_v56, 256 }
 0x30c   :  { %v449_v61 = vpop.permute.xlu1 %448  ;;  %v438_v3 = vpop.permute.xlu0 %437 }
 0x30d   :  { %v496_v34 = vmul.f32 %v488_v22, %v449_v61  ;;  %v494_v1 = vmul.f32 %v484_v8, %v438_v3 }
 0x30e   :  { %531 = vbcast.lane.b32.xlu1 %v521_v56, 272  ;;  %512 = vbcast.lane.b32.xlu0 %v502_v55, 272 }
 0x310   :  { %v453_v0 = vpop.permute.xlu1 %452 }
 0x311   :  { %v497_v51 = vmul.f32 %v488_v22, %v453_v0 }
 0x312   :  { %535 = vbcast.lane.b32.xlu1 %v521_v56, 280  ;;  %516 = vbcast.lane.b32.xlu0 %v502_v55, 280 }
 0x314   :  { %v457_v5 = vpop.permute.xlu1 %456 }
 0x315   :  { %v498_v58 = vmul.f32 %v488_v22, %v457_v5  ;;  %v3108_v5 = vld.sshfl [vmem:[#allocation3] sm:$0x11 pattern:$0x75316420] }
 0x378   :  { %v509_v14 = vpop.permute.xlu1 %508  ;;  %v505_v16 = vpop.permute.xlu0 %504 }
 0x379   :  { %v538_v27 = vsub.f32 %v492_v10, %v509_v14  ;;  %v537_v30 = vsub.f32 %v491_v13, %v505_v16 }
 0x37b   :  { %v547_v38 = vmul.f32 1.442695, %v538_v27  ;;  %v545_v40 = vmul.f32 1.442695, %v537_v30 }
 0x37c   :  { %v528_v43 = vpop.permute.xlu1 %527  ;;  %v524_v45 = vpop.permute.xlu0 %523 }
 0x37d   :  { %3343 = vpow2.f32 %v547_v38  ;;  %v542_v47 = vsub.f32 %v496_v34, %v528_v43  ;;  %v541_v49 = vsub.f32 %v495_v11, %v524_v45  ;;  %v576_v34 = vrot.slane %v3108_v5, %v3916_v9 }
 0x37e   :  { %3345 = vpow2.f32 %v545_v40  ;;  %v569_v38 = vcombine.high %v3108_v5, %v3108_v5 }
 0x37f   :  { %v553_v54 = vmul.f32 1.442695, %v541_v49  ;;  %v555_v55 = vmul.f32 1.442695, %v542_v47  ;;  %v587_v49 = vrot.slane %v576_v34, %v3967_v31 }
 0x380   :  { %v532_v56 = vpop.permute.xlu1 %531  ;;  %v513_v57 = vpop.permute.xlu0 %512 }
 0x381   :  { %v543_v59 = vsub.f32 %v497_v51, %v532_v56  ;;  %v539_v62 = vsub.f32 %v493_v50, %v513_v57  ;;  %3347 = vpow2.f32 %v553_v54  ;;  %v583_v50 = vrot.slane %v569_v38, %v3916_v9 }
 0x382   :  { %3349 = vpow2.f32 %v555_v55 }
 0x383   :  { %v557_v61 = vmul.f32 1.442695, %v543_v59  ;;  %v549_v2 = vmul.f32 1.442695, %v539_v62  ;;  %v591_v59 = vrot.slane %v583_v50, %v3967_v31  ;;  %v675_v50 = vand.u32 127, %v420_v60 }
 0x384   :  { %v536_v7 = vpop.permute.xlu1 %535  ;;  %v517_v10 = vpop.permute.xlu0 %516 }
 0x385   :  { %3351 = vpow2.f32 %v557_v61  ;;  %v544_v13 = vsub.f32 %v498_v58, %v536_v7  ;;  %v540_v14 = vsub.f32 %v494_v1, %v517_v10 }
 0x386   :  { %3353 = vpow2.f32 %v549_v2 }
 0x387   :  { %v3344_v16 = vpop.eup %3343  ;;  %v559_v63 = vmul.f32 1.442695, %v544_v13  ;;  %v551_v27 = vmul.f32 1.442695, %v540_v14 }
 0x388   :  { %v3346_v0 = vpop.eup %3345  ;;  %v629_v30 = vsel %vm98_vm0, %v3344_v16, 0.0  ;;  %v595_v55 = vmul.f32 %v3344_v16, %v587_v49 }
 0x389   :  { %3355 = vpow2.f32 %v559_v63  ;;  %630 = vadd.xlane.f32.xlu1 %v629_v30  ;;  %v626_v3 = vsel %vm98_vm0, %v3346_v0, 0.0  ;;  %v594_v61 = vmul.f32 %v3346_v0, %v587_v49 }
 0x38a   :  { %627 = vadd.xlane.f32.xlu0 %v626_v3  ;;  %3357 = vpow2.f32 %v551_v27  ;;  %v605_v62 = vsel %vm98_vm0, %v595_v55, 0.0 }
 0x38b   :  { %v3348_v8 = vpop.eup %3347  ;;  %v602_v10 = vsel %vm98_vm0, %v594_v61, 0.0 }
 0x38c   :  { %v638_v22 = vsel %vm98_vm0, %v3348_v8, 0.0  ;;  %v3350_v11 = vpop.eup %3349  ;;  %v598_v13 = vmul.f32 %v3348_v8, %v591_v59 }
 0x38d   :  { %v641_v45 = vsel %vm98_vm0, %v3350_v11, 0.0  ;;  %v599_v1 = vmul.f32 %v3350_v11, %v591_v59 }
 0x38e   :  { %639 = vadd.xlane.f32.xlu0 %v638_v22  ;;  %v614_v63 = vsel %vm98_vm0, %v598_v13, 0.0 }
 0x38f   :  { %v3352_v40 = vpop.eup %3351  ;;  %v617_v2 = vsel %vm98_vm0, %v599_v1, 0.0 }
 0x390   :  { %v644_v43 = vsel %vm98_vm0, %v3352_v40, 0.0  ;;  %v3354_v47 = vpop.eup %3353  ;;  %v600_v7 = vmul.f32 %v3352_v40, %v591_v59 }
 0x391   :  { %645 = vadd.xlane.f32.xlu1 %v644_v43  ;;  %v632_v56 = vsel %vm98_vm0, %v3354_v47, 0.0  ;;  %v596_v27 = vmul.f32 %v3354_v47, %v587_v49 }
 0x392   :  { %642 = vadd.xlane.f32.xlu0 %v641_v45  ;;  %v620_v14 = vsel %vm98_vm0, %v600_v7, 0.0 }
 0x393   :  { %v3356_v51 = vpop.eup %3355  ;;  %v608_v0 = vsel %vm98_vm0, %v596_v27, 0.0 }
 0x394   :  { %v647_v54 = vsel %vm98_vm0, %v3356_v51, 0.0  ;;  %v3358_v57 = vpop.eup %3357  ;;  %v601_v16 = vmul.f32 %v3356_v51, %v591_v59  ;;  %v680_v59 = vadd.s32 4294967288, %v675_v50 }
 0x395   :  { %648 = vadd.xlane.f32.xlu1 %v647_v54  ;;  %v635_v58 = vsel %vm98_vm0, %v3358_v57, 0.0  ;;  %v597_v3 = vmul.f32 %v3358_v57, %v587_v49 }
 0x396   :  { %633 = vadd.xlane.f32.xlu0 %v632_v56  ;;  %v623_v30 = vsel %vm98_vm0, %v601_v16, 0.0  ;;  %v4033_v27 = vsub.s32 %v680_v59, %v3913_v6 }
 0x397   :  { %v611_v5 = vsel %vm98_vm0, %v597_v3, 0.0 }
 0x399   :  { %606 = vadd.xlane.f32.xlu1 %v605_v62  ;;  %v687_v62 = vadd.s32 4294967280, %v675_v50 }
 0x39a   :  { %636 = vadd.xlane.f32.xlu0 %v635_v58  ;;  %v694_v58 = vadd.s32 4294967272, %v675_v50 }
 0x39c   :  { %v4039_v3 = vsub.s32 %v694_v58, %v3913_v6 }
 0x39d   :  { %618 = vadd.xlane.f32.xlu1 %v617_v2 }
 0x39e   :  { %603 = vadd.xlane.f32.xlu0 %v602_v10 }
 0x3a1   :  { %621 = vadd.xlane.f32.xlu1 %v620_v14  ;;  %v4030_v14 = vsub.s32 %v675_v50, %v3913_v6 }
 0x3a2   :  { %615 = vadd.xlane.f32.xlu0 %v614_v63 }
 0x3a5   :  { %624 = vadd.xlane.f32.xlu1 %v623_v30  ;;  %v4036_v30 = vsub.s32 %v687_v62, %v3913_v6 }
 0x3a6   :  { %609 = vadd.xlane.f32.xlu0 %v608_v0 }
 0x3aa   :  { %612 = vadd.xlane.f32.xlu0 %v611_v5 }
 0x416   :  { %v631_v22 = vpop.xlane.xlu1 %630 }
 0x417   :  { %v628_v8 = vpop.xlane.xlu0 %627  ;;  %3359 = vrcp.f32 %v631_v22 }
 0x41b   :  { %v640_v11 = vpop.xlane.xlu0 %639 }
 0x41c   :  { %3361 = vrcp.f32 %v640_v11 }
 0x41e   :  { %v646_v34 = vpop.xlane.xlu1 %645 }
 0x41f   :  { %v643_v38 = vpop.xlane.xlu0 %642 }
 0x420   :  { %3363 = vrcp.f32 %v643_v38 }
 0x421   :  { %3365 = vrcp.f32 %v628_v8  ;;  %v3360_v54 = vpop.eup %3359 }
 0x422   :  { %v649_v40 = vpop.xlane.xlu1 %648  ;;  %3367 = vrcp.f32 %v646_v34 }
 0x423   :  { %v634_v43 = vpop.xlane.xlu0 %633  ;;  %3369 = vrcp.f32 %v649_v40 }
 0x424   :  { %3371 = vrcp.f32 %v634_v43 }
 0x426   :  { %v607_v45 = vpop.xlane.xlu1 %606  ;;  %v3362_v55 = vpop.eup %3361 }
 0x427   :  { %v637_v47 = vpop.xlane.xlu0 %636  ;;  %v659_v8 = vmul.f32 %v3360_v54, %v607_v45 }
 0x428   :  { %3373 = vrcp.f32 %v637_v47 }
 0x429   :  { %v684_v6 = vrot.slane %v659_v8, %v4033_v27 }
 0x42a   :  { %v619_v49 = vpop.xlane.xlu1 %618  ;;  %v3364_v57 = vpop.eup %3363 }
 0x42b   :  { %v604_v51 = vpop.xlane.xlu0 %603  ;;  %v3366_v61 = vpop.eup %3365  ;;  %v663_v13 = vmul.f32 %v3364_v57, %v619_v49 }
 0x42c   :  { %v3368_v7 = vpop.eup %3367  ;;  %v658_v16 = vmul.f32 %v3366_v61, %v604_v51 }
 0x42d   :  { %v3370_v10 = vpop.eup %3369  ;;  %v708_v38 = vrot.slane %v663_v13, %v4033_v27 }
 0x42e   :  { %v622_v56 = vpop.xlane.xlu1 %621  ;;  %v3372_v63 = vpop.eup %3371  ;;  %v679_v40 = vrot.slane %v658_v16, %v4030_v14 }
 0x42f   :  { %v616_v1 = vpop.xlane.xlu0 %615  ;;  %v664_v0 = vmul.f32 %v3368_v7, %v622_v56  ;;  %v812_v7 = vsel %vm317_vm2, %v3920_v12, -inf }
 0x430   :  { %v662_v2 = vmul.f32 %v3362_v55, %v616_v1  ;;  %v686_v55 = vsel %vm685_vm5, %v684_v6, %v679_v40 }
 0x431   :  { %v713_v47 = vrot.slane %v664_v0, %v4036_v30 }
 0x432   :  { %v625_v60 = vpop.xlane.xlu1 %624  ;;  %v704_v22 = vrot.slane %v662_v2, %v4030_v14  ;;  %v3374_v43 = vpop.eup %3373 }
 0x433   :  { %v610_v5 = vpop.xlane.xlu0 %609  ;;  %v665_v11 = vmul.f32 %v3370_v10, %v625_v60 }
 0x434   :  { %v660_v34 = vmul.f32 %v3372_v63, %v610_v5  ;;  %v709_v45 = vsel %vm685_vm5, %v708_v38, %v704_v22 }
 0x435   :  { %v718_v51 = vrot.slane %v665_v11, %v4039_v3  ;;  %v714_v59 = vsel %vm692_vm6, %v713_v47, %v709_v45 }
 0x436   :  { %v691_v49 = vrot.slane %v660_v34, %v4036_v30 }
 0x437   :  { %v613_v50 = vpop.xlane.xlu0 %612  ;;  %v719_v1 = vsel %vm699_vm7, %v718_v51, %v714_v59 }
 0x438   :  { %v661_v54 = vmul.f32 %v3374_v43, %v613_v50  ;;  %v693_v57 = vsel %vm692_vm6, %v691_v49, %v686_v55 }
 0x43a   :  { %v698_v56 = vrot.slane %v661_v54, %v4039_v3 }
 0x43c   :  { %v700_v62 = vsel %vm699_vm7, %v698_v56, %v693_v57 }
 0x43d   :  { %v721_v58 = vsel %vm720_vm8, %v719_v1, %v700_v62 }
 0x43e   :  { %v4057_v61 = vadd.f32 %v721_v58, %v3860_v4  ;;  %v815_v4 = vsel %vm317_vm2, %v3920_v12, inf  ;;  %v886_v58 = vrot.slane %v875_v17, %v3967_v31 }
 0x440   :  { %v726_v2 = vsel %vm317_vm2, %v4057_v61, 0.0 }
 0x441   :  { %727 = vadd.xlane.f32.xlu0 %v726_v2 }
 0x445   :  { %813 = vmax.xlane.f32.xlu0 %v812_v7 }
 0x4ce   :  { %v728_v10 = vpop.xlane.xlu0 %727 }
 0x4cf   :  { %v729_v13 = vmul.f32 0.03125, %v728_v10 }
 0x4d1   :  { %v730_v16 = vsub.f32 %v4057_v61, %v729_v13  ;;  %v890_v13 = vrot.slane %v3937_v19, %v3967_v31 }
 0x4d2   :  { %v814_v43 = vpop.xlane.xlu0 %813 }
 0x4d3   :  { %v731_v60 = vmul.f32 %v730_v16, %v730_v16 }
 0x4d5   :  { %v732_v63 = vsel %vm317_vm2, %v731_v60, 0.0 }
 0x4d6   :  { %733 = vadd.xlane.f32.xlu1 %v732_v63 }
 0x4da   :  { %816 = vmin.xlane.f32.xlu1 %v815_v4 }
 0x563   :  { %v734_v0 = vpop.xlane.xlu1 %733 }
 0x564   :  { %v735_v5 = vmul.f32 0.03125, %v734_v0 }
 0x566   :  { %v736_v8 = vadd.f32 1e-05, %v735_v5 }
 0x567   :  { %v817_v47 = vpop.xlane.xlu1 %816 }
 0x568   :  { %3375 = vrsqrt.f32 %v736_v8 }
 0x572   :  { %v3376_v22 = vpop.eup %3375 }
 0x573   :  { %v738_v11 = vmul.f32 %v3376_v22, %v730_v16 }
 0x575   :  { %3210 = vmatmul.mubr.msk.f32.vlgmr.msra.gmra.mrb[2].mxu1 %vm98_vm0, %v738_v11 }
 0x576   :  { %3303 = vmatpush3.bf16.msra.mxu1 %v3876_v48  ;;  %3231 = vmatprep.mubr.msk.f32.mxu1 %vm3737_vm3, %v3738_v53 }
 0x577   :  { %3304 = vmatprep.subr.bf16.mxu1 %v3736_v33 }
 0x57a   :  { %3306 = vmatpush3.bf16.msra.mxu1 %v3881_v52 }
 0x57b   :  { %3313 = vmatprep.subr.bf16.mxu1 %v3736_v33 }
 0x648   :  { %v808_v12 = vpop.f32.mrb[2].mxu1 }
 0x649   :  { %v809_v34 = vadd.f32 %v3954_v25, %v808_v12  ;;  %v3211_v38 = vpop.f32.mrb[3].mxu1  ;;  %v3110_v12 = vld.sshfl [vmem:[#allocation3 + $0x2] sm:$0x11 pattern:$0x75316420] }
 0x64b   :  { %v825_v40 = vrot.slane %v809_v34, %v3967_v31  ;;  %v844_v49 = vrot.slane %v809_v34, %v3983_v39  ;;  %v819_v50 = vmul.f32 %v814_v43, %v809_v34  ;;  %v820_v6 = vmul.f32 %v817_v47, %v809_v34 }
 0x64c   :  { %vm818_vm9 = vcmp.ge.f32.partialorder %v809_v34, 0.0  ;;  %v971_v43 = vcombine.high %v3110_v12, %v3110_v12 }
 0x64d   :  { %831 = vbcast.lane.b32.xlu1 %v825_v40, 264  ;;  %827 = vbcast.lane.b32.xlu0 %v825_v40, 256  ;;  %v821_v45 = vsel %vm818_vm9, %v819_v50, %v820_v6 }
 0x64e   :  { %v904_v51 = vrot.slane %v821_v45, %v3967_v31  ;;  %v923_v54 = vrot.slane %v821_v45, %v3983_v39 }
 0x651   :  { %846 = vbcast.lane.b32.xlu1 %v844_v49, 256  ;;  %835 = vbcast.lane.b32.xlu0 %v825_v40, 272 }
 0x655   :  { %850 = vbcast.lane.b32.xlu1 %v844_v49, 264  ;;  %839 = vbcast.lane.b32.xlu0 %v825_v40, 280  ;;  %v978_v40 = vrot.slane %v3110_v12, %v3916_v9 }
 0x659   :  { %854 = vbcast.lane.b32.xlu1 %v844_v49, 272  ;;  %906 = vbcast.lane.b32.xlu0 %v904_v51, 256 }
 0x65d   :  { %858 = vbcast.lane.b32.xlu1 %v844_v49, 280  ;;  %925 = vbcast.lane.b32.xlu0 %v923_v54, 256 }
 0x661   :  { %910 = vbcast.lane.b32.xlu1 %v904_v51, 264  ;;  %914 = vbcast.lane.b32.xlu0 %v904_v51, 272 }
 0x665   :  { %929 = vbcast.lane.b32.xlu1 %v923_v54, 264  ;;  %918 = vbcast.lane.b32.xlu0 %v904_v51, 280 }
 0x669   :  { %933 = vbcast.lane.b32.xlu1 %v923_v54, 272 }
 0x66d   :  { %937 = vbcast.lane.b32.xlu1 %v923_v54, 280 }
 0x6bf   :  { %v832_v55 = vpop.permute.xlu1 %831  ;;  %v828_v56 = vpop.permute.xlu0 %827 }
 0x6c0   :  { %v893_v2 = vmul.f32 %v886_v58, %v828_v56  ;;  %v894_v8 = vmul.f32 %v886_v58, %v832_v55  ;;  %v989_v55 = vrot.slane %v978_v40, %v3967_v31  ;;  %v985_v56 = vrot.slane %v971_v43, %v3916_v9 }
 0x6c3   :  { %v847_v57 = vpop.permute.xlu1 %846  ;;  %v836_v59 = vpop.permute.xlu0 %835 }
 0x6c4   :  { %v897_v60 = vmul.f32 %v890_v13, %v847_v57  ;;  %v895_v22 = vmul.f32 %v886_v58, %v836_v59 }
 0x6c7   :  { %v851_v62 = vpop.permute.xlu1 %850  ;;  %v840_v1 = vpop.permute.xlu0 %839 }
 0x6c8   :  { %v898_v19 = vmul.f32 %v890_v13, %v851_v62  ;;  %v896_v47 = vmul.f32 %v886_v58, %v840_v1 }
 0x6cb   :  { %v855_v7 = vpop.permute.xlu1 %854  ;;  %v907_v10 = vpop.permute.xlu0 %906 }
 0x6cc   :  { %v939_v16 = vsub.f32 %v893_v2, %v907_v10  ;;  %v899_v59 = vmul.f32 %v890_v13, %v855_v7 }
 0x6ce   :  { %v947_v63 = vmul.f32 1.442695, %v939_v16 }
 0x6cf   :  { %v859_v4 = vpop.permute.xlu1 %858  ;;  %v926_v0 = vpop.permute.xlu0 %925 }
 0x6d0   :  { %3377 = vpow2.f32 %v947_v63  ;;  %v943_v5 = vsub.f32 %v897_v60, %v926_v0  ;;  %v993_v60 = vrot.slane %v985_v56, %v3967_v31  ;;  %v900_v0 = vmul.f32 %v890_v13, %v859_v4 }
 0x6d2   :  { %v955_v11 = vmul.f32 1.442695, %v943_v5 }
 0x6d3   :  { %v911_v34 = vpop.permute.xlu1 %910  ;;  %v915_v15 = vpop.permute.xlu0 %914 }
 0x6d4   :  { %3379 = vpow2.f32 %v955_v11  ;;  %v940_v17 = vsub.f32 %v894_v8, %v911_v34  ;;  %v941_v38 = vsub.f32 %v895_v22, %v915_v15 }
 0x6d6   :  { %v949_v49 = vmul.f32 1.442695, %v940_v17  ;;  %v951_v50 = vmul.f32 1.442695, %v941_v38 }
 0x6d7   :  { %v930_v6 = vpop.permute.xlu1 %929  ;;  %v919_v45 = vpop.permute.xlu0 %918 }
 0x6d8   :  { %3381 = vpow2.f32 %v949_v49  ;;  %v944_v51 = vsub.f32 %v898_v19, %v930_v6  ;;  %v942_v54 = vsub.f32 %v896_v47, %v919_v45 }
 0x6d9   :  { %3383 = vpow2.f32 %v951_v50 }
 0x6da   :  { %v3378_v57 = vpop.eup %3377  ;;  %v957_v2 = vmul.f32 1.442695, %v944_v51  ;;  %v953_v10 = vmul.f32 1.442695, %v942_v54 }
 0x6db   :  { %v934_v16 = vpop.permute.xlu1 %933  ;;  %v1028_v62 = vsel %vm98_vm0, %v3378_v57, 0.0  ;;  %v996_v1 = vmul.f32 %v3378_v57, %v989_v55 }
 0x6dc   :  { %3385 = vpow2.f32 %v957_v2  ;;  %v945_v58 = vsub.f32 %v899_v59, %v934_v16  ;;  %1029 = vadd.xlane.f32.xlu0 %v1028_v62 }
 0x6dd   :  { %3387 = vpow2.f32 %v953_v10 }
 0x6de   :  { %v3380_v63 = vpop.eup %3379  ;;  %v959_v5 = vmul.f32 1.442695, %v945_v58 }
 0x6df   :  { %v938_v8 = vpop.permute.xlu1 %937  ;;  %v1040_v22 = vsel %vm98_vm0, %v3380_v63, 0.0  ;;  %v1000_v11 = vmul.f32 %v3380_v63, %v993_v60 }
 0x6e0   :  { %3389 = vpow2.f32 %v959_v5  ;;  %v946_v7 = vsub.f32 %v900_v0, %v938_v8  ;;  %1041 = vadd.xlane.f32.xlu0 %v1040_v22 }
 0x6e1   :  { %v1016_v10 = vsel %vm98_vm0, %v1000_v11, 0.0 }
 0x6e2   :  { %v3382_v12 = vpop.eup %3381  ;;  %v961_v34 = vmul.f32 1.442695, %v946_v7 }
 0x6e3   :  { %v3384_v15 = vpop.eup %3383  ;;  %v1031_v17 = vsel %vm98_vm0, %v3382_v12, 0.0  ;;  %v997_v38 = vmul.f32 %v3382_v12, %v989_v55 }
 0x6e4   :  { %3391 = vpow2.f32 %v961_v34  ;;  %1032 = vadd.xlane.f32.xlu1 %v1031_v17  ;;  %v998_v40 = vmul.f32 %v3384_v15, %v989_v55  ;;  %v1034_v6 = vsel %vm98_vm0, %v3384_v15, 0.0 }
 0x6e5   :  { %v1007_v59 = vsel %vm98_vm0, %v997_v38, 0.0 }
 0x6e6   :  { %v3386_v43 = vpop.eup %3385  ;;  %v1010_v62 = vsel %vm98_vm0, %v998_v40, 0.0 }
 0x6e7   :  { %v3388_v19 = vpop.eup %3387  ;;  %v1043_v13 = vsel %vm98_vm0, %v3386_v43, 0.0  ;;  %v1001_v4 = vmul.f32 %v3386_v43, %v993_v60 }
 0x6e8   :  { %1044 = vadd.xlane.f32.xlu0 %v1043_v13  ;;  %v999_v47 = vmul.f32 %v3388_v19, %v989_v55  ;;  %v1037_v56 = vsel %vm98_vm0, %v3388_v19, 0.0  ;;  %v1004_v55 = vsel %vm98_vm0, %v996_v1, 0.0 }
 0x6e9   :  { %v1019_v2 = vsel %vm98_vm0, %v1001_v4, 0.0 }
 0x6ea   :  { %v3390_v49 = vpop.eup %3389 }
 0x6eb   :  { %v1046_v50 = vsel %vm98_vm0, %v3390_v49, 0.0  ;;  %v1002_v45 = vmul.f32 %v3390_v49, %v993_v60 }
 0x6ec   :  { %1047 = vadd.xlane.f32.xlu1 %v1046_v50  ;;  %1035 = vadd.xlane.f32.xlu0 %v1034_v6 }
 0x6ed   :  { %v1022_v16 = vsel %vm98_vm0, %v1002_v45, 0.0 }
 0x6ee   :  { %v3392_v51 = vpop.eup %3391 }
 0x6ef   :  { %v1049_v54 = vsel %vm98_vm0, %v3392_v51, 0.0  ;;  %v1003_v57 = vmul.f32 %v3392_v51, %v993_v60  ;;  %v1013_v60 = vsel %vm98_vm0, %v999_v47, 0.0 }
 0x6f0   :  { %1050 = vadd.xlane.f32.xlu1 %v1049_v54  ;;  %1038 = vadd.xlane.f32.xlu0 %v1037_v56 }
 0x6f1   :  { %v1025_v58 = vsel %vm98_vm0, %v1003_v57, 0.0 }
 0x6f4   :  { %1008 = vadd.xlane.f32.xlu1 %v1007_v59  ;;  %1005 = vadd.xlane.f32.xlu0 %v1004_v55 }
 0x6f8   :  { %1020 = vadd.xlane.f32.xlu1 %v1019_v2  ;;  %1017 = vadd.xlane.f32.xlu0 %v1016_v10 }
 0x6fc   :  { %1023 = vadd.xlane.f32.xlu1 %v1022_v16  ;;  %1011 = vadd.xlane.f32.xlu0 %v1010_v62 }
 0x700   :  { %1026 = vadd.xlane.f32.xlu1 %v1025_v58  ;;  %1014 = vadd.xlane.f32.xlu0 %v1013_v60 }
 0x769   :  { %v1030_v1 = vpop.xlane.xlu0 %1029 }
 0x76a   :  { %3393 = vrcp.f32 %v1030_v1 }
 0x76d   :  { %v1042_v63 = vpop.xlane.xlu0 %1041 }
 0x76e   :  { %3395 = vrcp.f32 %v1042_v63 }
 0x771   :  { %v1033_v0 = vpop.xlane.xlu1 %1032 }
 0x772   :  { %3397 = vrcp.f32 %v1033_v0 }
 0x774   :  { %v3394_v15 = vpop.eup %3393 }
 0x775   :  { %v1045_v5 = vpop.xlane.xlu0 %1044 }
 0x776   :  { %3399 = vrcp.f32 %v1045_v5 }
 0x778   :  { %v3396_v17 = vpop.eup %3395 }
 0x779   :  { %v1048_v8 = vpop.xlane.xlu1 %1047  ;;  %v1036_v22 = vpop.xlane.xlu0 %1035 }
 0x77a   :  { %3401 = vrcp.f32 %v1048_v8 }
 0x77b   :  { %3403 = vrcp.f32 %v1036_v22 }
 0x77c   :  { %v3398_v43 = vpop.eup %3397 }
 0x77d   :  { %v1051_v11 = vpop.xlane.xlu1 %1050  ;;  %v1039_v7 = vpop.xlane.xlu0 %1038 }
 0x77e   :  { %3405 = vrcp.f32 %v1051_v11 }
 0x77f   :  { %3407 = vrcp.f32 %v1039_v7 }
 0x780   :  { %v3400_v19 = vpop.eup %3399 }
 0x781   :  { %v1009_v12 = vpop.xlane.xlu1 %1008  ;;  %v1006_v34 = vpop.xlane.xlu0 %1005 }
 0x782   :  { %v1061_v4 = vmul.f32 %v3398_v43, %v1009_v12  ;;  %v1060_v47 = vmul.f32 %v3394_v15, %v1006_v34  ;;  %v1205_v43 = vsel %vm317_vm2, %v3934_v18, -inf }
 0x784   :  { %v3402_v13 = vpop.eup %3401  ;;  %v1083_v59 = vrot.slane %v1061_v4, %v4033_v27  ;;  %v1079_v55 = vrot.slane %v1060_v47, %v4030_v14 }
 0x785   :  { %v1021_v38 = vpop.xlane.xlu1 %1020  ;;  %v1018_v40 = vpop.xlane.xlu0 %1017 }
 0x786   :  { %v1065_v49 = vmul.f32 %v3400_v19, %v1021_v38  ;;  %v1064_v50 = vmul.f32 %v3396_v17, %v1018_v40  ;;  %v3404_v6 = vpop.eup %3403  ;;  %v1084_v5 = vsel %vm685_vm5, %v1083_v59, %v1079_v55 }
 0x788   :  { %v3406_v57 = vpop.eup %3405  ;;  %v1102_v2 = vrot.slane %v1065_v49, %v4033_v27  ;;  %v1098_v10 = vrot.slane %v1064_v50, %v4030_v14 }
 0x789   :  { %v1024_v45 = vpop.xlane.xlu1 %1023  ;;  %v1012_v51 = vpop.xlane.xlu0 %1011 }
 0x78a   :  { %v1066_v54 = vmul.f32 %v3402_v13, %v1024_v45  ;;  %v1062_v56 = vmul.f32 %v3404_v6, %v1012_v51  ;;  %v3408_v16 = vpop.eup %3407  ;;  %v1103_v8 = vsel %vm685_vm5, %v1102_v2, %v1098_v10 }
 0x78c   :  { %v1107_v62 = vrot.slane %v1066_v54, %v4036_v30  ;;  %v1088_v58 = vrot.slane %v1062_v56, %v4036_v30 }
 0x78d   :  { %v1027_v60 = vpop.xlane.xlu1 %1026  ;;  %v1015_v1 = vpop.xlane.xlu0 %1014 }
 0x78e   :  { %v1067_v63 = vmul.f32 %v3406_v57, %v1027_v60  ;;  %v1063_v0 = vmul.f32 %v3408_v16, %v1015_v1  ;;  %v1108_v7 = vsel %vm692_vm6, %v1107_v62, %v1103_v8  ;;  %v1089_v12 = vsel %vm692_vm6, %v1088_v58, %v1084_v5 }
 0x790   :  { %v1112_v22 = vrot.slane %v1067_v63, %v4039_v3  ;;  %v1093_v11 = vrot.slane %v1063_v0, %v4039_v3 }
 0x792   :  { %v1094_v34 = vsel %vm699_vm7, %v1093_v11, %v1089_v12  ;;  %v1113_v15 = vsel %vm699_vm7, %v1112_v22, %v1108_v7  ;;  %v1279_v11 = vrot.slane %v1268_v23, %v3967_v31 }
 0x793   :  { %v1114_v17 = vsel %vm720_vm8, %v1113_v15, %v1094_v34  ;;  %v1283_v15 = vrot.slane %v3957_v26, %v3967_v31 }
 0x794   :  { %v4121_v38 = vadd.f32 %v1114_v17, %v4057_v61  ;;  %v1208_v61 = vsel %vm317_vm2, %v3934_v18, inf }
 0x796   :  { %v1119_v40 = vsel %vm317_vm2, %v4121_v38, 0.0 }
 0x797   :  { %1120 = vadd.xlane.f32.xlu0 %v1119_v40 }
 0x79b   :  { %1206 = vmax.xlane.f32.xlu0 %v1205_v43 }
 0x824   :  { %v1121_v19 = vpop.xlane.xlu0 %1120 }
 0x825   :  { %v1122_v13 = vmul.f32 0.03125, %v1121_v19 }
 0x827   :  { %v1123_v4 = vsub.f32 %v4121_v38, %v1122_v13 }
 0x828   :  { %v1207_v55 = vpop.xlane.xlu0 %1206 }
 0x829   :  { %v1124_v47 = vmul.f32 %v1123_v4, %v1123_v4 }
 0x82b   :  { %v1125_v49 = vsel %vm317_vm2, %v1124_v47, 0.0 }
 0x82c   :  { %1126 = vadd.xlane.f32.xlu1 %v1125_v49 }
 0x830   :  { %1209 = vmin.xlane.f32.xlu1 %v1208_v61 }
 0x8b9   :  { %v1127_v50 = vpop.xlane.xlu1 %1126 }
 0x8ba   :  { %v1128_v6 = vmul.f32 0.03125, %v1127_v50  ;;  %v3112_v50 = vld.sshfl [vmem:[#allocation3 + $0x4] sm:$0x11 pattern:$0x75316420] }
 0x8bc   :  { %v1129_v45 = vadd.f32 1e-05, %v1128_v6 }
 0x8bd   :  { %v1210_v2 = vpop.xlane.xlu1 %1209 }
 0x8be   :  { %3409 = vrsqrt.f32 %v1129_v45 }
 0x8c8   :  { %v3410_v51 = vpop.eup %3409 }
 0x8c9   :  { %v1131_v54 = vmul.f32 %v3410_v51, %v1123_v4  ;;  %v1371_v51 = vrot.slane %v3112_v50, %v3916_v9 }
 0x8cb   :  { %3221 = vmatmul.mubr.msk.f32.vlgmr.msra.gmra.mrb[4].mxu0 %vm98_vm0, %v1131_v54  ;;  %v1364_v54 = vcombine.high %v3112_v50, %v3112_v50 }
 0x8cc   :  { %3309 = vmatpush3.bf16.msra.mxu0 %v3876_v48  ;;  %3242 = vmatprep.mubr.msk.f32.mxu0 %vm3737_vm3, %v3738_v53 }
 0x8cd   :  { %3310 = vmatprep.subr.bf16.mxu0 %v3736_v33 }
 0x8d0   :  { %3312 = vmatpush3.bf16.msra.mxu0 %v3881_v52 }
 0x8d1   :  { %3319 = vmatprep.subr.bf16.mxu0 %v3736_v33 }
 0x99e   :  { %v1201_v18 = vpop.f32.mrb[4].mxu0 }
 0x99f   :  { %v1202_v56 = vadd.f32 %v3954_v25, %v1201_v18  ;;  %v3222_v57 = vpop.f32.mrb[5].mxu0 }
 0x9a1   :  { %v1218_v59 = vrot.slane %v1202_v56, %v3967_v31  ;;  %v1237_v10 = vrot.slane %v1202_v56, %v3983_v39  ;;  %v1212_v16 = vmul.f32 %v1207_v55, %v1202_v56  ;;  %v1213_v62 = vmul.f32 %v1210_v2, %v1202_v56 }
 0x9a2   :  { %vm1211_vm10 = vcmp.ge.f32.partialorder %v1202_v56, 0.0 }
 0x9a3   :  { %1224 = vbcast.lane.b32.xlu1 %v1218_v59, 264  ;;  %1220 = vbcast.lane.b32.xlu0 %v1218_v59, 256  ;;  %v1214_v58 = vsel %vm1211_vm10, %v1212_v16, %v1213_v62  ;;  %v1382_v16 = vrot.slane %v1371_v51, %v3967_v31  ;;  %v1378_v62 = vrot.slane %v1364_v54, %v3916_v9 }
 0x9a4   :  { %v1297_v60 = vrot.slane %v1214_v58, %v3967_v31  ;;  %v1316_v25 = vrot.slane %v1214_v58, %v3983_v39 }
 0x9a7   :  { %1239 = vbcast.lane.b32.xlu1 %v1237_v10, 256  ;;  %1228 = vbcast.lane.b32.xlu0 %v1218_v59, 272 }
 0x9ab   :  { %1243 = vbcast.lane.b32.xlu1 %v1237_v10, 264  ;;  %1232 = vbcast.lane.b32.xlu0 %v1218_v59, 280 }
 0x9af   :  { %1247 = vbcast.lane.b32.xlu1 %v1237_v10, 272  ;;  %1299 = vbcast.lane.b32.xlu0 %v1297_v60, 256 }
 0x9b3   :  { %1251 = vbcast.lane.b32.xlu1 %v1237_v10, 280  ;;  %1318 = vbcast.lane.b32.xlu0 %v1316_v25, 256 }
 0x9b7   :  { %1303 = vbcast.lane.b32.xlu1 %v1297_v60, 264  ;;  %1307 = vbcast.lane.b32.xlu0 %v1297_v60, 272 }
 0x9bb   :  { %1322 = vbcast.lane.b32.xlu1 %v1316_v25, 264  ;;  %1311 = vbcast.lane.b32.xlu0 %v1297_v60, 280 }
 0x9bf   :  { %1326 = vbcast.lane.b32.xlu1 %v1316_v25, 272 }
 0x9c3   :  { %1330 = vbcast.lane.b32.xlu1 %v1316_v25, 280 }
 0xa15   :  { %v1225_v1 = vpop.permute.xlu1 %1224  ;;  %v1221_v63 = vpop.permute.xlu0 %1220 }
 0xa16   :  { %v1286_v7 = vmul.f32 %v1279_v11, %v1221_v63  ;;  %v1287_v47 = vmul.f32 %v1279_v11, %v1225_v1 }
 0xa19   :  { %v1240_v0 = vpop.permute.xlu1 %1239  ;;  %v1229_v5 = vpop.permute.xlu0 %1228 }
 0xa1a   :  { %v1290_v40 = vmul.f32 %v1283_v15, %v1240_v0  ;;  %v1288_v49 = vmul.f32 %v1279_v11, %v1229_v5 }
 0xa1d   :  { %v1244_v8 = vpop.permute.xlu1 %1243  ;;  %v1233_v22 = vpop.permute.xlu0 %1232 }
 0xa1e   :  { %v1291_v26 = vmul.f32 %v1283_v15, %v1244_v8  ;;  %v1289_v18 = vmul.f32 %v1279_v11, %v1233_v22  ;;  %v1386_v22 = vrot.slane %v1378_v62, %v3967_v31 }
 0xa21   :  { %v1248_v12 = vpop.permute.xlu1 %1247  ;;  %v1300_v34 = vpop.permute.xlu0 %1299 }
 0xa22   :  { %v1332_v17 = vsub.f32 %v1286_v7, %v1300_v34  ;;  %v1292_v60 = vmul.f32 %v1283_v15, %v1248_v12 }
 0xa24   :  { %v1340_v43 = vmul.f32 1.442695, %v1332_v17 }
 0xa25   :  { %v1252_v19 = vpop.permute.xlu1 %1251  ;;  %v1319_v13 = vpop.permute.xlu0 %1318 }
 0xa26   :  { %3411 = vpow2.f32 %v1340_v43  ;;  %v1336_v4 = vsub.f32 %v1290_v40, %v1319_v13  ;;  %v1293_v7 = vmul.f32 %v1283_v15, %v1252_v19 }
 0xa28   :  { %v1348_v61 = vmul.f32 1.442695, %v1336_v4 }
 0xa29   :  { %v1304_v6 = vpop.permute.xlu1 %1303  ;;  %v1308_v21 = vpop.permute.xlu0 %1307 }
 0xa2a   :  { %3413 = vpow2.f32 %v1348_v61  ;;  %v1333_v23 = vsub.f32 %v1287_v47, %v1304_v6  ;;  %v1334_v45 = vsub.f32 %v1288_v49, %v1308_v21 }
 0xa2c   :  { %v1342_v56 = vmul.f32 1.442695, %v1333_v23  ;;  %v1344_v57 = vmul.f32 1.442695, %v1334_v45 }
 0xa2d   :  { %v1323_v59 = vpop.permute.xlu1 %1322  ;;  %v1312_v55 = vpop.permute.xlu0 %1311 }
 0xa2e   :  { %3415 = vpow2.f32 %v1342_v56  ;;  %v1337_v2 = vsub.f32 %v1291_v26, %v1323_v59  ;;  %v1335_v10 = vsub.f32 %v1289_v18, %v1312_v55 }
 0xa2f   :  { %3417 = vpow2.f32 %v1344_v57 }
 0xa30   :  { %v3412_v58 = vpop.eup %3411  ;;  %v1350_v25 = vmul.f32 1.442695, %v1337_v2  ;;  %v1346_v1 = vmul.f32 1.442695, %v1335_v10 }
 0xa31   :  { %v1327_v63 = vpop.permute.xlu1 %1326  ;;  %v1421_v0 = vsel %vm98_vm0, %v3412_v58, 0.0  ;;  %v1389_v5 = vmul.f32 %v3412_v58, %v1382_v16 }
 0xa32   :  { %3419 = vpow2.f32 %v1350_v25  ;;  %v1338_v8 = vsub.f32 %v1292_v60, %v1327_v63  ;;  %1422 = vadd.xlane.f32.xlu0 %v1421_v0 }
 0xa33   :  { %3421 = vpow2.f32 %v1346_v1  ;;  %v1397_v2 = vsel %vm98_vm0, %v1389_v5, 0.0 }
 0xa34   :  { %v3414_v11 = vpop.eup %3413  ;;  %v1352_v34 = vmul.f32 1.442695, %v1338_v8 }
 0xa35   :  { %v1331_v17 = vpop.permute.xlu1 %1330  ;;  %v1433_v40 = vsel %vm98_vm0, %v3414_v11, 0.0  ;;  %v1393_v43 = vmul.f32 %v3414_v11, %v1386_v22 }
 0xa36   :  { %3423 = vpow2.f32 %v1352_v34  ;;  %v1339_v12 = vsub.f32 %v1293_v7, %v1331_v17  ;;  %1434 = vadd.xlane.f32.xlu0 %v1433_v40 }
 0xa38   :  { %v3416_v13 = vpop.eup %3415  ;;  %v1354_v4 = vmul.f32 1.442695, %v1339_v12 }
 0xa39   :  { %v3418_v47 = vpop.eup %3417  ;;  %v1424_v49 = vsel %vm98_vm0, %v3416_v13, 0.0  ;;  %v1390_v61 = vmul.f32 %v3416_v13, %v1382_v16 }
 0xa3a   :  { %3425 = vpow2.f32 %v1354_v4  ;;  %1425 = vadd.xlane.f32.xlu1 %v1424_v49  ;;  %v1391_v50 = vmul.f32 %v3418_v47, %v1382_v16  ;;  %v1427_v54 = vsel %vm98_vm0, %v3418_v47, 0.0 }
 0xa3b   :  { %v1400_v55 = vsel %vm98_vm0, %v1390_v61, 0.0 }
 0xa3c   :  { %v3420_v6 = vpop.eup %3419  ;;  %v1403_v58 = vsel %vm98_vm0, %v1391_v50, 0.0 }
 0xa3d   :  { %v3422_v21 = vpop.eup %3421  ;;  %v1436_v15 = vsel %vm98_vm0, %v3420_v6, 0.0  ;;  %v1394_v19 = vmul.f32 %v3420_v6, %v1386_v22 }
 0xa3e   :  { %1437 = vadd.xlane.f32.xlu0 %v1436_v15  ;;  %v1392_v23 = vmul.f32 %v3422_v21, %v1382_v16  ;;  %v1430_v57 = vsel %vm98_vm0, %v3422_v21, 0.0  ;;  %v1409_v16 = vsel %vm98_vm0, %v1393_v43, 0.0 }
 0xa3f   :  { %v1412_v10 = vsel %vm98_vm0, %v1394_v19, 0.0 }
 0xa40   :  { %v3424_v45 = vpop.eup %3423  ;;  %v1406_v25 = vsel %vm98_vm0, %v1392_v23, 0.0 }
 0xa41   :  { %v1439_v51 = vsel %vm98_vm0, %v3424_v45, 0.0  ;;  %v1395_v26 = vmul.f32 %v3424_v45, %v1386_v22 }
 0xa42   :  { %1440 = vadd.xlane.f32.xlu1 %v1439_v51  ;;  %1428 = vadd.xlane.f32.xlu0 %v1427_v54 }
 0xa43   :  { %v1415_v62 = vsel %vm98_vm0, %v1395_v26, 0.0 }
 0xa44   :  { %v3426_v18 = vpop.eup %3425 }
 0xa45   :  { %v1442_v56 = vsel %vm98_vm0, %v3426_v18, 0.0  ;;  %v1396_v59 = vmul.f32 %v3426_v18, %v1386_v22 }
 0xa46   :  { %1443 = vadd.xlane.f32.xlu1 %v1442_v56  ;;  %1431 = vadd.xlane.f32.xlu0 %v1430_v57 }
 0xa47   :  { %v1418_v60 = vsel %vm98_vm0, %v1396_v59, 0.0 }
 0xa4a   :  { %1401 = vadd.xlane.f32.xlu1 %v1400_v55  ;;  %1398 = vadd.xlane.f32.xlu0 %v1397_v2 }
 0xa4e   :  { %1413 = vadd.xlane.f32.xlu1 %v1412_v10  ;;  %1410 = vadd.xlane.f32.xlu0 %v1409_v16 }
 0xa52   :  { %1416 = vadd.xlane.f32.xlu1 %v1415_v62  ;;  %1404 = vadd.xlane.f32.xlu0 %v1403_v58 }
 0xa56   :  { %1419 = vadd.xlane.f32.xlu1 %v1418_v60  ;;  %1407 = vadd.xlane.f32.xlu0 %v1406_v25 }
 0xabf   :  { %v1423_v1 = vpop.xlane.xlu0 %1422 }
 0xac0   :  { %3427 = vrcp.f32 %v1423_v1 }
 0xac3   :  { %v1435_v63 = vpop.xlane.xlu0 %1434 }
 0xac4   :  { %3429 = vrcp.f32 %v1435_v63 }
 0xac7   :  { %v1426_v0 = vpop.xlane.xlu1 %1425 }
 0xac8   :  { %3431 = vrcp.f32 %v1426_v0 }
 0xaca   :  { %v3428_v40 = vpop.eup %3427 }
 0xacb   :  { %v1438_v5 = vpop.xlane.xlu0 %1437 }
 0xacc   :  { %3433 = vrcp.f32 %v1438_v5 }
 0xace   :  { %v3430_v43 = vpop.eup %3429 }
 0xacf   :  { %v1441_v8 = vpop.xlane.xlu1 %1440  ;;  %v1429_v22 = vpop.xlane.xlu0 %1428 }
 0xad0   :  { %3435 = vrcp.f32 %v1441_v8 }
 0xad1   :  { %3437 = vrcp.f32 %v1429_v22 }
 0xad2   :  { %v3432_v4 = vpop.eup %3431 }
 0xad3   :  { %v1444_v11 = vpop.xlane.xlu1 %1443  ;;  %v1432_v7 = vpop.xlane.xlu0 %1431 }
 0xad4   :  { %3439 = vrcp.f32 %v1444_v11 }
 0xad5   :  { %3441 = vrcp.f32 %v1432_v7 }
 0xad6   :  { %v3434_v47 = vpop.eup %3433 }
 0xad7   :  { %v1402_v34 = vpop.xlane.xlu1 %1401  ;;  %v1399_v17 = vpop.xlane.xlu0 %1398 }
 0xad8   :  { %v1454_v61 = vmul.f32 %v3432_v4, %v1402_v34  ;;  %v1453_v50 = vmul.f32 %v3428_v40, %v1399_v17  ;;  %v3579_v17 = vld [vmem:[#allocation2 + $0x6] sm:$0x3] }
 0xad9   :  { %v1598_v40 = vsel %vm317_vm2, %v3579_v17, -inf }
 0xada   :  { %v3436_v49 = vpop.eup %3435  ;;  %v1476_v26 = vrot.slane %v1454_v61, %v4033_v27  ;;  %v1472_v18 = vrot.slane %v1453_v50, %v4030_v14 }
 0xadb   :  { %v1414_v12 = vpop.xlane.xlu1 %1413  ;;  %v1411_v13 = vpop.xlane.xlu0 %1410 }
 0xadc   :  { %v1458_v6 = vmul.f32 %v3434_v47, %v1414_v12  ;;  %v1457_v21 = vmul.f32 %v3430_v43, %v1411_v13  ;;  %v3438_v15 = vpop.eup %3437  ;;  %v1477_v60 = vsel %vm685_vm5, %v1476_v26, %v1472_v18 }
 0xade   :  { %v3440_v54 = vpop.eup %3439  ;;  %v1495_v56 = vrot.slane %v1458_v6, %v4033_v27  ;;  %v1491_v57 = vrot.slane %v1457_v21, %v4030_v14 }
 0xadf   :  { %v1417_v19 = vpop.xlane.xlu1 %1416  ;;  %v1405_v23 = vpop.xlane.xlu0 %1404 }
 0xae0   :  { %v1459_v45 = vmul.f32 %v3436_v49, %v1417_v19  ;;  %v1455_v51 = vmul.f32 %v3438_v15, %v1405_v23  ;;  %v3442_v59 = vpop.eup %3441  ;;  %v1496_v25 = vsel %vm685_vm5, %v1495_v56, %v1491_v57  ;;  %v1601_v49 = vsel %vm317_vm2, %v3579_v17, inf  ;;  %v4202_v19 = vld [vmem:[%s4442_s3] ss:$0 sm:$0xff] }
 0xae2   :  { %v1500_v55 = vrot.slane %v1459_v45, %v4036_v30  ;;  %v1481_v2 = vrot.slane %v1455_v51, %v4036_v30 }
 0xae3   :  { %v1420_v10 = vpop.xlane.xlu1 %1419  ;;  %v1408_v16 = vpop.xlane.xlu0 %1407 }
 0xae4   :  { %v1460_v62 = vmul.f32 %v3440_v54, %v1420_v10  ;;  %v1456_v58 = vmul.f32 %v3442_v59, %v1408_v16  ;;  %v1501_v0 = vsel %vm692_vm6, %v1500_v55, %v1496_v25  ;;  %v1482_v5 = vsel %vm692_vm6, %v1481_v2, %v1477_v60 }
 0xae6   :  { %v1505_v1 = vrot.slane %v1460_v62, %v4039_v3  ;;  %v1486_v63 = vrot.slane %v1456_v58, %v4039_v3 }
 0xae8   :  { %v1506_v8 = vsel %vm699_vm7, %v1505_v1, %v1501_v0  ;;  %v1487_v22 = vsel %vm699_vm7, %v1486_v63, %v1482_v5  ;;  %v1672_v1 = vrot.slane %v1661_v28, %v3967_v31 }
 0xae9   :  { %v1507_v11 = vsel %vm720_vm8, %v1506_v8, %v1487_v22  ;;  %v1676_v8 = vrot.slane %v3970_v32, %v3967_v31 }
 0xaea   :  { %v4185_v7 = vadd.f32 %v1507_v11, %v4121_v38 }
 0xaec   :  { %v1512_v34 = vsel %vm317_vm2, %v4185_v7, 0.0 }
 0xaed   :  { %1513 = vadd.xlane.f32.xlu0 %v1512_v34 }
 0xaf1   :  { %1599 = vmax.xlane.f32.xlu0 %v1598_v40 }
 0xb7a   :  { %v1514_v43 = vpop.xlane.xlu0 %1513 }
 0xb7b   :  { %v1515_v12 = vmul.f32 0.03125, %v1514_v43 }
 0xb7d   :  { %v1516_v13 = vsub.f32 %v4185_v7, %v1515_v12 }
 0xb7e   :  { %v1600_v54 = vpop.xlane.xlu0 %1599 }
 0xb7f   :  { %v1517_v4 = vmul.f32 %v1516_v13, %v1516_v13 }
 0xb81   :  { %v1518_v47 = vsel %vm317_vm2, %v1517_v4, 0.0 }
 0xb82   :  { %1519 = vadd.xlane.f32.xlu1 %v1518_v47  ;;  %v3114_v47 = vld.sshfl [vmem:[#allocation3 + $0x6] sm:$0x11 pattern:$0x75316420] }
 0xb86   :  { %1602 = vmin.xlane.f32.xlu1 %v1601_v49 }
 0xc0f   :  { %v1520_v38 = vpop.xlane.xlu1 %1519 }
 0xc10   :  { %v1521_v61 = vmul.f32 0.03125, %v1520_v38 }
 0xc12   :  { %v1522_v50 = vadd.f32 1e-05, %v1521_v61  ;;  %v1764_v61 = vrot.slane %v3114_v47, %v3916_v9 }
 0xc13   :  { %v1603_v26 = vpop.xlane.xlu1 %1602 }
 0xc14   :  { %3443 = vrsqrt.f32 %v1522_v50  ;;  %v1757_v50 = vcombine.high %v3114_v47, %v3114_v47 }
 0xc1e   :  { %v3444_v6 = vpop.eup %3443 }
 0xc1f   :  { %v1524_v21 = vmul.f32 %v3444_v6, %v1516_v13 }
 0xc21   :  { %3232 = vmatmul.mubr.msk.f32.vlgmr.msra.gmra.mrb[4].mxu1 %vm98_vm0, %v1524_v21 }
 0xc22   :  { %3315 = vmatpush3.bf16.msra.mxu1 %v3876_v48  ;;  %3253 = vmatprep.mubr.msk.f32.mxu1 %vm3737_vm3, %v3738_v53 }
 0xc23   :  { %3316 = vmatprep.subr.bf16.mxu1 %v3736_v33 }
 0xc26   :  { %3318 = vmatpush3.bf16.msra.mxu1 %v3881_v52 }
 0xcf4   :  { %v1594_v15 = vpop.f32.mrb[4].mxu1 }
 0xcf5   :  { %v1595_v23 = vadd.f32 %v4202_v19, %v1594_v15  ;;  %v3233_v45 = vpop.f32.mrb[5].mxu1 }
 0xcf7   :  { %v1611_v51 = vrot.slane %v1595_v23, %v3967_v31  ;;  %v1630_v18 = vrot.slane %v1595_v23, %v3983_v39  ;;  %v1605_v56 = vmul.f32 %v1600_v54, %v1595_v23  ;;  %v1606_v57 = vmul.f32 %v1603_v26, %v1595_v23 }
 0xcf8   :  { %vm1604_vm11 = vcmp.ge.f32.partialorder %v1595_v23, 0.0  ;;  %v1775_v26 = vrot.slane %v1764_v61, %v3967_v31 }
 0xcf9   :  { %1617 = vbcast.lane.b32.xlu1 %v1611_v51, 264  ;;  %1613 = vbcast.lane.b32.xlu0 %v1611_v51, 256  ;;  %v1607_v59 = vsel %vm1604_vm11, %v1605_v56, %v1606_v57 }
 0xcfa   :  { %v1690_v55 = vrot.slane %v1607_v59, %v3967_v31  ;;  %v1709_v2 = vrot.slane %v1607_v59, %v3983_v39 }
 0xcfd   :  { %1632 = vbcast.lane.b32.xlu1 %v1630_v18, 256  ;;  %1621 = vbcast.lane.b32.xlu0 %v1611_v51, 272 }
 0xd01   :  { %1636 = vbcast.lane.b32.xlu1 %v1630_v18, 264  ;;  %1625 = vbcast.lane.b32.xlu0 %v1611_v51, 280 }
 0xd05   :  { %1640 = vbcast.lane.b32.xlu1 %v1630_v18, 272  ;;  %1692 = vbcast.lane.b32.xlu0 %v1690_v55, 256 }
 0xd09   :  { %1644 = vbcast.lane.b32.xlu1 %v1630_v18, 280  ;;  %1711 = vbcast.lane.b32.xlu0 %v1709_v2, 256  ;;  %v1771_v18 = vrot.slane %v1757_v50, %v3916_v9 }
 0xd0d   :  { %1696 = vbcast.lane.b32.xlu1 %v1690_v55, 264  ;;  %1700 = vbcast.lane.b32.xlu0 %v1690_v55, 272 }
 0xd11   :  { %1715 = vbcast.lane.b32.xlu1 %v1709_v2, 264  ;;  %1704 = vbcast.lane.b32.xlu0 %v1690_v55, 280 }
 0xd15   :  { %1719 = vbcast.lane.b32.xlu1 %v1709_v2, 272 }
 0xd19   :  { %1723 = vbcast.lane.b32.xlu1 %v1709_v2, 280 }
 0xd6b   :  { %v1618_v10 = vpop.permute.xlu1 %1617  ;;  %v1614_v16 = vpop.permute.xlu0 %1613 }
 0xd6c   :  { %v1679_v63 = vmul.f32 %v1672_v1, %v1614_v16  ;;  %v1680_v12 = vmul.f32 %v1672_v1, %v1618_v10 }
 0xd6f   :  { %v1633_v62 = vpop.permute.xlu1 %1632  ;;  %v1622_v58 = vpop.permute.xlu0 %1621 }
 0xd70   :  { %v1683_v11 = vmul.f32 %v1676_v8, %v1633_v62  ;;  %v1681_v13 = vmul.f32 %v1672_v1, %v1622_v58  ;;  %v1779_v58 = vrot.slane %v1771_v18, %v3967_v31 }
 0xd73   :  { %v1637_v60 = vpop.permute.xlu1 %1636  ;;  %v1626_v25 = vpop.permute.xlu0 %1625 }
 0xd74   :  { %v1684_v32 = vmul.f32 %v1676_v8, %v1637_v60  ;;  %v1682_v6 = vmul.f32 %v1672_v1, %v1626_v25 }
 0xd77   :  { %v1641_v0 = vpop.permute.xlu1 %1640  ;;  %v1693_v5 = vpop.permute.xlu0 %1692 }
 0xd78   :  { %v1725_v22 = vsub.f32 %v1679_v63, %v1693_v5  ;;  %v1685_v57 = vmul.f32 %v1676_v8, %v1641_v0 }
 0xd7a   :  { %v1733_v34 = vmul.f32 1.442695, %v1725_v22 }
 0xd7b   :  { %v1645_v17 = vpop.permute.xlu1 %1644  ;;  %v1712_v40 = vpop.permute.xlu0 %1711 }
 0xd7c   :  { %3445 = vpow2.f32 %v1733_v34  ;;  %v1729_v43 = vsub.f32 %v1683_v11, %v1712_v40  ;;  %v1686_v25 = vmul.f32 %v1676_v8, %v1645_v17 }
 0xd7e   :  { %v1741_v4 = vmul.f32 1.442695, %v1729_v43 }
 0xd7f   :  { %v1697_v49 = vpop.permute.xlu1 %1696  ;;  %v1701_v20 = vpop.permute.xlu0 %1700 }
 0xd80   :  { %3447 = vpow2.f32 %v1741_v4  ;;  %v1726_v28 = vsub.f32 %v1680_v12, %v1697_v49  ;;  %v1727_v38 = vsub.f32 %v1681_v13, %v1701_v20 }
 0xd82   :  { %v1735_v21 = vmul.f32 1.442695, %v1726_v28  ;;  %v1737_v15 = vmul.f32 1.442695, %v1727_v38 }
 0xd83   :  { %v1716_v23 = vpop.permute.xlu1 %1715  ;;  %v1705_v45 = vpop.permute.xlu0 %1704 }
 0xd84   :  { %3449 = vpow2.f32 %v1735_v21  ;;  %v1730_v51 = vsub.f32 %v1684_v32, %v1716_v23  ;;  %v1728_v54 = vsub.f32 %v1682_v6, %v1705_v45 }
 0xd85   :  { %3451 = vpow2.f32 %v1737_v15 }
 0xd86   :  { %v3446_v56 = vpop.eup %3445  ;;  %v1743_v59 = vmul.f32 1.442695, %v1730_v51  ;;  %v1739_v55 = vmul.f32 1.442695, %v1728_v54 }
 0xd87   :  { %v1720_v2 = vpop.permute.xlu1 %1719  ;;  %v1814_v10 = vsel %vm98_vm0, %v3446_v56, 0.0  ;;  %v1782_v16 = vmul.f32 %v3446_v56, %v1775_v26 }
 0xd88   :  { %3453 = vpow2.f32 %v1743_v59  ;;  %v1731_v62 = vsub.f32 %v1685_v57, %v1720_v2  ;;  %1815 = vadd.xlane.f32.xlu0 %v1814_v10 }
 0xd89   :  { %3455 = vpow2.f32 %v1739_v55  ;;  %v1790_v23 = vsel %vm98_vm0, %v1782_v16, 0.0 }
 0xd8a   :  { %v3448_v60 = vpop.eup %3447  ;;  %v1745_v1 = vmul.f32 1.442695, %v1731_v62 }
 0xd8b   :  { %v1724_v63 = vpop.permute.xlu1 %1723  ;;  %v1826_v5 = vsel %vm98_vm0, %v3448_v60, 0.0  ;;  %v1786_v22 = vmul.f32 %v3448_v60, %v1779_v58 }
 0xd8c   :  { %3457 = vpow2.f32 %v1745_v1  ;;  %v1732_v0 = vsub.f32 %v1686_v25, %v1724_v63  ;;  %1827 = vadd.xlane.f32.xlu0 %v1826_v5 }
 0xd8d   :  { %v1802_v51 = vsel %vm98_vm0, %v1786_v22, 0.0 }
 0xd8e   :  { %v3450_v11 = vpop.eup %3449  ;;  %v1747_v34 = vmul.f32 1.442695, %v1732_v0 }
 0xd8f   :  { %v3452_v40 = vpop.eup %3451  ;;  %v1817_v43 = vsel %vm98_vm0, %v3450_v11, 0.0  ;;  %v1783_v12 = vmul.f32 %v3450_v11, %v1775_v26 }
 0xd90   :  { %3459 = vpow2.f32 %v1747_v34  ;;  %1818 = vadd.xlane.f32.xlu1 %v1817_v43  ;;  %v1784_v13 = vmul.f32 %v3452_v40, %v1775_v26  ;;  %v1820_v38 = vsel %vm98_vm0, %v3452_v40, 0.0 }
 0xd91   :  { %v1793_v15 = vsel %vm98_vm0, %v1783_v12, 0.0 }
 0xd92   :  { %v3454_v4 = vpop.eup %3453 }
 0xd93   :  { %v3456_v47 = vpop.eup %3455  ;;  %v1829_v8 = vsel %vm98_vm0, %v3454_v4, 0.0  ;;  %v1787_v17 = vmul.f32 %v3454_v4, %v1779_v58 }
 0xd94   :  { %1830 = vadd.xlane.f32.xlu0 %v1829_v8  ;;  %v1785_v49 = vmul.f32 %v3456_v47, %v1775_v26  ;;  %v1823_v6 = vsel %vm98_vm0, %v3456_v47, 0.0  ;;  %v1796_v26 = vsel %vm98_vm0, %v1784_v13, 0.0 }
 0xd95   :  { %v1805_v45 = vsel %vm98_vm0, %v1787_v17, 0.0 }
 0xd96   :  { %v3458_v20 = vpop.eup %3457  ;;  %v1799_v56 = vsel %vm98_vm0, %v1785_v49, 0.0 }
 0xd97   :  { %v1832_v28 = vsel %vm98_vm0, %v3458_v20, 0.0  ;;  %v1788_v61 = vmul.f32 %v3458_v20, %v1779_v58 }
 0xd98   :  { %1833 = vadd.xlane.f32.xlu1 %v1832_v28  ;;  %1821 = vadd.xlane.f32.xlu0 %v1820_v38 }
 0xd99   :  { %v1808_v54 = vsel %vm98_vm0, %v1788_v61, 0.0 }
 0xd9a   :  { %v3460_v50 = vpop.eup %3459 }
 0xd9b   :  { %v1835_v32 = vsel %vm98_vm0, %v3460_v50, 0.0  ;;  %v1789_v21 = vmul.f32 %v3460_v50, %v1779_v58 }
 0xd9c   :  { %1836 = vadd.xlane.f32.xlu1 %v1835_v32  ;;  %1824 = vadd.xlane.f32.xlu0 %v1823_v6 }
 0xd9d   :  { %v1811_v18 = vsel %vm98_vm0, %v1789_v21, 0.0 }
 0xda0   :  { %1794 = vadd.xlane.f32.xlu1 %v1793_v15  ;;  %1791 = vadd.xlane.f32.xlu0 %v1790_v23 }
 0xda4   :  { %1806 = vadd.xlane.f32.xlu1 %v1805_v45  ;;  %1803 = vadd.xlane.f32.xlu0 %v1802_v51 }
 0xda8   :  { %1809 = vadd.xlane.f32.xlu1 %v1808_v54  ;;  %1797 = vadd.xlane.f32.xlu0 %v1796_v26 }
 0xdac   :  { %1812 = vadd.xlane.f32.xlu1 %v1811_v18  ;;  %1800 = vadd.xlane.f32.xlu0 %v1799_v56 }
 0xe15   :  { %v1816_v57 = vpop.xlane.xlu0 %1815 }
 0xe16   :  { %3461 = vrcp.f32 %v1816_v57 }
 0xe19   :  { %v1828_v59 = vpop.xlane.xlu0 %1827 }
 0xe1a   :  { %3463 = vrcp.f32 %v1828_v59 }
 0xe1d   :  { %v1819_v55 = vpop.xlane.xlu1 %1818 }
 0xe1e   :  { %3465 = vrcp.f32 %v1819_v55 }
 0xe20   :  { %v3462_v1 = vpop.eup %3461 }
 0xe21   :  { %v1831_v2 = vpop.xlane.xlu0 %1830 }
 0xe22   :  { %3467 = vrcp.f32 %v1831_v2 }
 0xe24   :  { %v3464_v63 = vpop.eup %3463 }
 0xe25   :  { %v1834_v10 = vpop.xlane.xlu1 %1833  ;;  %v1822_v16 = vpop.xlane.xlu0 %1821 }
 0xe26   :  { %3469 = vrcp.f32 %v1834_v10 }
 0xe27   :  { %3471 = vrcp.f32 %v1822_v16 }
 0xe28   :  { %v3466_v0 = vpop.eup %3465 }
 0xe29   :  { %v1837_v62 = vpop.xlane.xlu1 %1836  ;;  %v1825_v58 = vpop.xlane.xlu0 %1824 }
 0xe2a   :  { %3473 = vrcp.f32 %v1837_v62 }
 0xe2b   :  { %3475 = vrcp.f32 %v1825_v58  ;;  %v3581_v58 = vld [vmem:[#allocation2 + $0x8] sm:$0x3] }
 0xe2c   :  { %v3468_v11 = vpop.eup %3467 }
 0xe2d   :  { %v1795_v60 = vpop.xlane.xlu1 %1794  ;;  %v1792_v25 = vpop.xlane.xlu0 %1791 }
 0xe2e   :  { %v1847_v40 = vmul.f32 %v3466_v0, %v1795_v60  ;;  %v1846_v43 = vmul.f32 %v3462_v1, %v1792_v25  ;;  %v1991_v60 = vsel %vm317_vm2, %v3581_v58, -inf  ;;  %v1994_v0 = vsel %vm317_vm2, %v3581_v58, inf }
 0xe30   :  { %v3470_v34 = vpop.eup %3469  ;;  %v1869_v28 = vrot.slane %v1847_v40, %v4033_v27  ;;  %v1865_v38 = vrot.slane %v1846_v43, %v4030_v14 }
 0xe31   :  { %v1807_v5 = vpop.xlane.xlu1 %1806  ;;  %v1804_v22 = vpop.xlane.xlu0 %1803 }
 0xe32   :  { %v1851_v12 = vmul.f32 %v3468_v11, %v1807_v5  ;;  %v1850_v13 = vmul.f32 %v3464_v63, %v1804_v22  ;;  %v3472_v4 = vpop.eup %3471  ;;  %v1870_v54 = vsel %vm685_vm5, %v1869_v28, %v1865_v38 }
 0xe34   :  { %v3474_v20 = vpop.eup %3473  ;;  %v1888_v61 = vrot.slane %v1851_v12, %v4033_v27  ;;  %v1884_v50 = vrot.slane %v1850_v13, %v4030_v14 }
 0xe35   :  { %v1810_v47 = vpop.xlane.xlu1 %1809  ;;  %v1798_v8 = vpop.xlane.xlu0 %1797 }
 0xe36   :  { %v1852_v17 = vmul.f32 %v3470_v34, %v1810_v47  ;;  %v1848_v49 = vmul.f32 %v3472_v4, %v1798_v8  ;;  %v3476_v32 = vpop.eup %3475  ;;  %v1889_v26 = vsel %vm685_vm5, %v1888_v61, %v1884_v50 }
 0xe38   :  { %v1893_v6 = vrot.slane %v1852_v17, %v4036_v30  ;;  %v1874_v21 = vrot.slane %v1848_v49, %v4036_v30 }
 0xe39   :  { %v1813_v15 = vpop.xlane.xlu1 %1812  ;;  %v1801_v23 = vpop.xlane.xlu0 %1800 }
 0xe3a   :  { %v1853_v45 = vmul.f32 %v3474_v20, %v1813_v15  ;;  %v1849_v51 = vmul.f32 %v3476_v32, %v1801_v23  ;;  %v1894_v57 = vsel %vm692_vm6, %v1893_v6, %v1889_v26  ;;  %v1875_v59 = vsel %vm692_vm6, %v1874_v21, %v1870_v54 }
 0xe3b   :  { %v2065_v21 = vrot.slane %v2054_v35, %v3967_v31 }
 0xe3c   :  { %v1898_v18 = vrot.slane %v1853_v45, %v4039_v3  ;;  %v1879_v56 = vrot.slane %v1849_v51, %v4039_v3  ;;  %v2069_v51 = vrot.slane %v3979_v37, %v3967_v31 }
 0xe3e   :  { %v1899_v55 = vsel %vm699_vm7, %v1898_v18, %v1894_v57  ;;  %v1880_v2 = vsel %vm699_vm7, %v1879_v56, %v1875_v59 }
 0xe3f   :  { %v1900_v10 = vsel %vm720_vm8, %v1899_v55, %v1880_v2 }
 0xe40   :  { %v4251_v16 = vadd.f32 %v1900_v10, %v4185_v7 }
 0xe42   :  { %v1905_v62 = vsel %vm317_vm2, %v4251_v16, 0.0 }
 0xe43   :  { %1906 = vadd.xlane.f32.xlu0 %v1905_v62  ;;  %v3116_v62 = vld.sshfl [vmem:[#allocation3 + $0x8] sm:$0x11 pattern:$0x75316420] }
 0xe47   :  { %1992 = vmax.xlane.f32.xlu0 %v1991_v60 }
 0xed0   :  { %v1907_v25 = vpop.xlane.xlu0 %1906 }
 0xed1   :  { %v1908_v1 = vmul.f32 0.03125, %v1907_v25  ;;  %v2157_v25 = vrot.slane %v3116_v62, %v3916_v9 }
 0xed3   :  { %v1909_v63 = vsub.f32 %v4251_v16, %v1908_v1  ;;  %v2150_v1 = vcombine.high %v3116_v62, %v3116_v62 }
 0xed4   :  { %v1993_v8 = vpop.xlane.xlu0 %1992 }
 0xed5   :  { %v1910_v5 = vmul.f32 %v1909_v63, %v1909_v63 }
 0xed7   :  { %v1911_v22 = vsel %vm317_vm2, %v1910_v5, 0.0 }
 0xed8   :  { %1912 = vadd.xlane.f32.xlu1 %v1911_v22 }
 0xedc   :  { %1995 = vmin.xlane.f32.xlu1 %v1994_v0 }
 0xf65   :  { %v1913_v7 = vpop.xlane.xlu1 %1912 }
 0xf66   :  { %v1914_v11 = vmul.f32 0.03125, %v1913_v7 }
 0xf68   :  { %v1915_v34 = vadd.f32 1e-05, %v1914_v11 }
 0xf69   :  { %v1996_v17 = vpop.xlane.xlu1 %1995 }
 0xf6a   :  { %3477 = vrsqrt.f32 %v1915_v34 }
 0xf74   :  { %v3478_v40 = vpop.eup %3477 }
 0xf75   :  { %v1917_v43 = vmul.f32 %v3478_v40, %v1909_v63  ;;  %v2168_v40 = vrot.slane %v2157_v25, %v3967_v31 }
 0xf77   :  { %3243 = vmatmul.mubr.msk.f32.vlgmr.msra.gmra.mrb[6].mxu0 %vm98_vm0, %v1917_v43  ;;  %v2164_v43 = vrot.slane %v2150_v1, %v3916_v9 }
 0xf78   :  { %3321 = vmatpush3.bf16.msra.mxu0 %v3876_v48  ;;  %3264 = vmatprep.mubr.msk.f32.mxu0 %vm3737_vm3, %v3738_v53 }
 0xf79   :  { %3322 = vmatprep.subr.bf16.mxu0 %v3736_v33 }
 0xf7c   :  { %3324 = vmatpush3.bf16.msra.mxu0 %v3881_v52 }
0x104a   :  { %v1987_v12 = vpop.f32.mrb[6].mxu0 }
0x104b   :  { %v1988_v13 = vadd.f32 %v4202_v19, %v1987_v12  ;;  %v3244_v4 = vpop.f32.mrb[7].mxu0 }
0x104d   :  { %v2004_v47 = vrot.slane %v1988_v13, %v3967_v31  ;;  %v2023_v49 = vrot.slane %v1988_v13, %v3983_v39  ;;  %v1998_v48 = vmul.f32 %v1993_v8, %v1988_v13  ;;  %v1999_v20 = vmul.f32 %v1996_v17, %v1988_v13 }
0x104e   :  { %vm1997_vm12 = vcmp.ge.f32.partialorder %v1988_v13, 0.0 }
0x104f   :  { %2010 = vbcast.lane.b32.xlu1 %v2004_v47, 264  ;;  %2006 = vbcast.lane.b32.xlu0 %v2004_v47, 256  ;;  %v2000_v33 = vsel %vm1997_vm12, %v1998_v48, %v1999_v20  ;;  %v2172_v20 = vrot.slane %v2164_v43, %v3967_v31 }
0x1050   :  { %v2083_v52 = vrot.slane %v2000_v33, %v3967_v31  ;;  %v2102_v53 = vrot.slane %v2000_v33, %v3983_v39 }
0x1053   :  { %2025 = vbcast.lane.b32.xlu1 %v2023_v49, 256  ;;  %2014 = vbcast.lane.b32.xlu0 %v2004_v47, 272 }
0x1057   :  { %2029 = vbcast.lane.b32.xlu1 %v2023_v49, 264  ;;  %2018 = vbcast.lane.b32.xlu0 %v2004_v47, 280 }
0x105b   :  { %2033 = vbcast.lane.b32.xlu1 %v2023_v49, 272  ;;  %2085 = vbcast.lane.b32.xlu0 %v2083_v52, 256 }
0x105f   :  { %2037 = vbcast.lane.b32.xlu1 %v2023_v49, 280  ;;  %2104 = vbcast.lane.b32.xlu0 %v2102_v53, 256 }
0x1063   :  { %2089 = vbcast.lane.b32.xlu1 %v2083_v52, 264  ;;  %2093 = vbcast.lane.b32.xlu0 %v2083_v52, 272 }
0x1067   :  { %2108 = vbcast.lane.b32.xlu1 %v2102_v53, 264  ;;  %2097 = vbcast.lane.b32.xlu0 %v2083_v52, 280 }
0x106b   :  { %2112 = vbcast.lane.b32.xlu1 %v2102_v53, 272 }
0x106f   :  { %2116 = vbcast.lane.b32.xlu1 %v2102_v53, 280 }
0x10c1   :  { %v2011_v28 = vpop.permute.xlu1 %2010  ;;  %v2007_v38 = vpop.permute.xlu0 %2006 }
0x10c2   :  { %v2072_v15 = vmul.f32 %v2065_v21, %v2007_v38  ;;  %v2073_v55 = vmul.f32 %v2065_v21, %v2011_v28 }
0x10c5   :  { %v2026_v61 = vpop.permute.xlu1 %2025  ;;  %v2015_v50 = vpop.permute.xlu0 %2014 }
0x10c6   :  { %v2076_v26 = vmul.f32 %v2069_v51, %v2026_v61  ;;  %v2074_v2 = vmul.f32 %v2065_v21, %v2015_v50 }
0x10c9   :  { %v2030_v32 = vpop.permute.xlu1 %2029  ;;  %v2019_v6 = vpop.permute.xlu0 %2018 }
0x10ca   :  { %v2077_v37 = vmul.f32 %v2069_v51, %v2030_v32  ;;  %v2075_v63 = vmul.f32 %v2065_v21, %v2019_v6 }
0x10cd   :  { %v2034_v23 = vpop.permute.xlu1 %2033  ;;  %v2086_v45 = vpop.permute.xlu0 %2085 }
0x10ce   :  { %v2118_v54 = vsub.f32 %v2072_v15, %v2086_v45  ;;  %v2078_v13 = vmul.f32 %v2069_v51, %v2034_v23 }
0x10d0   :  { %v2126_v18 = vmul.f32 1.442695, %v2118_v54 }
0x10d1   :  { %v2038_v56 = vpop.permute.xlu1 %2037  ;;  %v2105_v57 = vpop.permute.xlu0 %2104 }
0x10d2   :  { %3479 = vpow2.f32 %v2126_v18  ;;  %v2122_v59 = vsub.f32 %v2076_v26, %v2105_v57  ;;  %v2079_v52 = vmul.f32 %v2069_v51, %v2038_v56 }
0x10d4   :  { %v2134_v10 = vmul.f32 1.442695, %v2122_v59 }
0x10d5   :  { %v2090_v58 = vpop.permute.xlu1 %2089  ;;  %v2094_v24 = vpop.permute.xlu0 %2093 }
0x10d6   :  { %3481 = vpow2.f32 %v2134_v10  ;;  %v2119_v35 = vsub.f32 %v2073_v55, %v2090_v58  ;;  %v2120_v60 = vsub.f32 %v2074_v2, %v2094_v24 }
0x10d8   :  { %v2128_v5 = vmul.f32 1.442695, %v2119_v35  ;;  %v2130_v22 = vmul.f32 1.442695, %v2120_v60 }
0x10d9   :  { %v2109_v0 = vpop.permute.xlu1 %2108  ;;  %v2098_v7 = vpop.permute.xlu0 %2097 }
0x10da   :  { %3483 = vpow2.f32 %v2128_v5  ;;  %v2123_v11 = vsub.f32 %v2077_v37, %v2109_v0  ;;  %v2121_v34 = vsub.f32 %v2075_v63, %v2098_v7 }
0x10db   :  { %3485 = vpow2.f32 %v2130_v22 }
0x10dc   :  { %v3480_v12 = vpop.eup %3479  ;;  %v2136_v4 = vmul.f32 1.442695, %v2123_v11  ;;  %v2132_v47 = vmul.f32 1.442695, %v2121_v34 }
0x10dd   :  { %v2113_v8 = vpop.permute.xlu1 %2112  ;;  %v2207_v17 = vsel %vm98_vm0, %v3480_v12, 0.0  ;;  %v2175_v49 = vmul.f32 %v3480_v12, %v2168_v40 }
0x10de   :  { %3487 = vpow2.f32 %v2136_v4  ;;  %v2124_v48 = vsub.f32 %v2078_v13, %v2113_v8  ;;  %2208 = vadd.xlane.f32.xlu0 %v2207_v17 }
0x10df   :  { %3489 = vpow2.f32 %v2132_v47  ;;  %v2183_v60 = vsel %vm98_vm0, %v2175_v49, 0.0 }
0x10e0   :  { %v3482_v33 = vpop.eup %3481  ;;  %v2138_v53 = vmul.f32 1.442695, %v2124_v48 }
0x10e1   :  { %v2117_v28 = vpop.permute.xlu1 %2116  ;;  %v2219_v38 = vsel %vm98_vm0, %v3482_v33, 0.0  ;;  %v2179_v61 = vmul.f32 %v3482_v33, %v2172_v20 }
0x10e2   :  { %3491 = vpow2.f32 %v2138_v53  ;;  %v2125_v50 = vsub.f32 %v2079_v52, %v2117_v28  ;;  %2220 = vadd.xlane.f32.xlu0 %v2219_v38 }
0x10e3   :  { %v2195_v1 = vsel %vm98_vm0, %v2179_v61, 0.0 }
0x10e4   :  { %v3484_v32 = vpop.eup %3483  ;;  %v2140_v6 = vmul.f32 1.442695, %v2125_v50 }
0x10e5   :  { %v3486_v21 = vpop.eup %3485  ;;  %v2210_v15 = vsel %vm98_vm0, %v3484_v32, 0.0  ;;  %v2176_v23 = vmul.f32 %v3484_v32, %v2168_v40 }
0x10e6   :  { %3493 = vpow2.f32 %v2140_v6  ;;  %2211 = vadd.xlane.f32.xlu1 %v2210_v15  ;;  %v2177_v45 = vmul.f32 %v3486_v21, %v2168_v40  ;;  %v2213_v55 = vsel %vm98_vm0, %v3486_v21, 0.0 }
0x10e7   :  { %v2186_v35 = vsel %vm98_vm0, %v2176_v23, 0.0 }
0x10e8   :  { %v3488_v54 = vpop.eup %3487  ;;  %v2189_v63 = vsel %vm98_vm0, %v2177_v45, 0.0 }
0x10e9   :  { %v3490_v26 = vpop.eup %3489  ;;  %v2222_v51 = vsel %vm98_vm0, %v3488_v54, 0.0  ;;  %v2180_v18 = vmul.f32 %v3488_v54, %v2172_v20 }
0x10ea   :  { %2223 = vadd.xlane.f32.xlu0 %v2222_v51  ;;  %v2178_v56 = vmul.f32 %v3490_v26, %v2168_v40  ;;  %v2216_v58 = vsel %vm98_vm0, %v3490_v26, 0.0 }
0x10eb   :  { %v2198_v25 = vsel %vm98_vm0, %v2180_v18, 0.0 }
0x10ec   :  { %v3492_v57 = vpop.eup %3491  ;;  %v2192_v22 = vsel %vm98_vm0, %v2178_v56, 0.0 }
0x10ed   :  { %v2225_v59 = vsel %vm98_vm0, %v3492_v57, 0.0  ;;  %v2181_v2 = vmul.f32 %v3492_v57, %v2172_v20 }
0x10ee   :  { %2226 = vadd.xlane.f32.xlu1 %v2225_v59  ;;  %2214 = vadd.xlane.f32.xlu0 %v2213_v55 }
0x10ef   :  { %v2201_v37 = vsel %vm98_vm0, %v2181_v2, 0.0 }
0x10f0   :  { %v3494_v10 = vpop.eup %3493 }
0x10f1   :  { %v2228_v62 = vsel %vm98_vm0, %v3494_v10, 0.0  ;;  %v2182_v24 = vmul.f32 %v3494_v10, %v2172_v20 }
0x10f2   :  { %2229 = vadd.xlane.f32.xlu1 %v2228_v62  ;;  %2217 = vadd.xlane.f32.xlu0 %v2216_v58 }
0x10f3   :  { %v2204_v5 = vsel %vm98_vm0, %v2182_v24, 0.0 }
0x10f6   :  { %2187 = vadd.xlane.f32.xlu1 %v2186_v35  ;;  %2184 = vadd.xlane.f32.xlu0 %v2183_v60 }
0x10fa   :  { %2199 = vadd.xlane.f32.xlu1 %v2198_v25  ;;  %2196 = vadd.xlane.f32.xlu0 %v2195_v1 }
0x10fe   :  { %2202 = vadd.xlane.f32.xlu1 %v2201_v37  ;;  %2190 = vadd.xlane.f32.xlu0 %v2189_v63 }
0x1102   :  { %2205 = vadd.xlane.f32.xlu1 %v2204_v5  ;;  %2193 = vadd.xlane.f32.xlu0 %v2192_v22 }
0x116b   :  { %v2209_v0 = vpop.xlane.xlu0 %2208 }
0x116c   :  { %3495 = vrcp.f32 %v2209_v0  ;;  %v3582_v0 = vld [vmem:[#allocation2 + $0xa] sm:$0x3] }
0x116f   :  { %v2221_v7 = vpop.xlane.xlu0 %2220 }
0x1170   :  { %3497 = vrcp.f32 %v2221_v7  ;;  %v2384_v7 = vsel %vm317_vm2, %v3582_v0, -inf }
0x1173   :  { %v2212_v11 = vpop.xlane.xlu1 %2211 }
0x1174   :  { %3499 = vrcp.f32 %v2212_v11 }
0x1176   :  { %v3496_v8 = vpop.eup %3495 }
0x1177   :  { %v2224_v34 = vpop.xlane.xlu0 %2223 }
0x1178   :  { %3501 = vrcp.f32 %v2224_v34 }
0x117a   :  { %v3498_v17 = vpop.eup %3497 }
0x117b   :  { %v2227_v40 = vpop.xlane.xlu1 %2226  ;;  %v2215_v43 = vpop.xlane.xlu0 %2214 }
0x117c   :  { %3503 = vrcp.f32 %v2227_v40 }
0x117d   :  { %3505 = vrcp.f32 %v2215_v43 }
0x117e   :  { %v3500_v20 = vpop.eup %3499 }
0x117f   :  { %v2230_v12 = vpop.xlane.xlu1 %2229  ;;  %v2218_v13 = vpop.xlane.xlu0 %2217 }
0x1180   :  { %3507 = vrcp.f32 %v2230_v12 }
0x1181   :  { %3509 = vrcp.f32 %v2218_v13  ;;  %v2387_v13 = vsel %vm317_vm2, %v3582_v0, inf }
0x1182   :  { %v3502_v33 = vpop.eup %3501 }
0x1183   :  { %v2188_v4 = vpop.xlane.xlu1 %2187  ;;  %v2185_v47 = vpop.xlane.xlu0 %2184 }
0x1184   :  { %v2240_v53 = vmul.f32 %v3500_v20, %v2188_v4  ;;  %v2239_v28 = vmul.f32 %v3496_v8, %v2185_v47 }
0x1186   :  { %v3504_v52 = vpop.eup %3503  ;;  %v2262_v45 = vrot.slane %v2240_v53, %v4033_v27  ;;  %v2258_v54 = vrot.slane %v2239_v28, %v4030_v14 }
0x1187   :  { %v2200_v49 = vpop.xlane.xlu1 %2199  ;;  %v2197_v48 = vpop.xlane.xlu0 %2196 }
0x1188   :  { %v2244_v38 = vmul.f32 %v3502_v33, %v2200_v49  ;;  %v2243_v61 = vmul.f32 %v3498_v17, %v2197_v48  ;;  %v3506_v50 = vpop.eup %3505  ;;  %v2263_v62 = vsel %vm685_vm5, %v2262_v45, %v2258_v54 }
0x118a   :  { %v3508_v23 = vpop.eup %3507  ;;  %v2281_v26 = vrot.slane %v2244_v38, %v4033_v27  ;;  %v2277_v51 = vrot.slane %v2243_v61, %v4030_v14 }
0x118b   :  { %v2203_v32 = vpop.xlane.xlu1 %2202  ;;  %v2191_v6 = vpop.xlane.xlu0 %2190 }
0x118c   :  { %v2245_v21 = vmul.f32 %v3504_v52, %v2203_v32  ;;  %v2241_v15 = vmul.f32 %v3506_v50, %v2191_v6  ;;  %v3510_v18 = vpop.eup %3509  ;;  %v2282_v58 = vsel %vm685_vm5, %v2281_v26, %v2277_v51  ;;  %v2458_v26 = vrot.slane %v2447_v41, %v3967_v31 }
0x118e   :  { %v2286_v56 = vrot.slane %v2245_v21, %v4036_v30  ;;  %v2267_v57 = vrot.slane %v2241_v15, %v4036_v30 }
0x118f   :  { %v2206_v59 = vpop.xlane.xlu1 %2205  ;;  %v2194_v55 = vpop.xlane.xlu0 %2193 }
0x1190   :  { %v2246_v2 = vmul.f32 %v3508_v23, %v2206_v59  ;;  %v2242_v10 = vmul.f32 %v3510_v18, %v2194_v55  ;;  %v2287_v60 = vsel %vm692_vm6, %v2286_v56, %v2282_v58  ;;  %v2268_v25 = vsel %vm692_vm6, %v2267_v57, %v2263_v62 }
0x1191   :  { %v2462_v57 = vrot.slane %v3990_v42, %v3967_v31 }
0x1192   :  { %v2291_v24 = vrot.slane %v2246_v2, %v4039_v3  ;;  %v2272_v35 = vrot.slane %v2242_v10, %v4039_v3 }
0x1194   :  { %v2292_v1 = vsel %vm699_vm7, %v2291_v24, %v2287_v60  ;;  %v2273_v37 = vsel %vm699_vm7, %v2272_v35, %v2268_v25  ;;  %v3118_v25 = vld.sshfl [vmem:[#allocation3 + $0xa] sm:$0x11 pattern:$0x75316420] }
0x1195   :  { %v2293_v63 = vsel %vm720_vm8, %v2292_v1, %v2273_v37 }
0x1196   :  { %v4312_v5 = vadd.f32 %v2293_v63, %v4251_v16  ;;  %v2550_v63 = vrot.slane %v3118_v25, %v3916_v9 }
0x1198   :  { %v2298_v22 = vsel %vm317_vm2, %v4312_v5, 0.0 }
0x1199   :  { %2299 = vadd.xlane.f32.xlu0 %v2298_v22  ;;  %v2543_v22 = vcombine.high %v3118_v25, %v3118_v25 }
0x119d   :  { %2385 = vmax.xlane.f32.xlu0 %v2384_v7 }
0x1226   :  { %v2300_v11 = vpop.xlane.xlu0 %2299 }
0x1227   :  { %v2301_v34 = vmul.f32 0.03125, %v2300_v11 }
0x1229   :  { %v2302_v40 = vsub.f32 %v4312_v5, %v2301_v34 }
0x122a   :  { %v2386_v52 = vpop.xlane.xlu0 %2385 }
0x122b   :  { %v2303_v43 = vmul.f32 %v2302_v40, %v2302_v40 }
0x122d   :  { %v2304_v12 = vsel %vm317_vm2, %v2303_v43, 0.0 }
0x122e   :  { %2305 = vadd.xlane.f32.xlu1 %v2304_v12 }
0x1232   :  { %2388 = vmin.xlane.f32.xlu1 %v2387_v13  ;;  %v2561_v13 = vrot.slane %v2550_v63, %v3967_v31 }
0x12bb   :  { %v2306_v16 = vpop.xlane.xlu1 %2305 }
0x12bc   :  { %v2307_v4 = vmul.f32 0.03125, %v2306_v16  ;;  %v2557_v16 = vrot.slane %v2543_v22, %v3916_v9 }
0x12be   :  { %v2308_v47 = vadd.f32 1e-05, %v2307_v4 }
0x12bf   :  { %v2389_v53 = vpop.xlane.xlu1 %2388 }
0x12c0   :  { %3511 = vrsqrt.f32 %v2308_v47 }
0x12ca   :  { %v3512_v8 = vpop.eup %3511 }
0x12cb   :  { %v2310_v17 = vmul.f32 %v3512_v8, %v2302_v40 }
0x12cd   :  { %3254 = vmatmul.mubr.msk.f32.vlgmr.msra.gmra.mrb[6].mxu1 %vm98_vm0, %v2310_v17 }
0x13a0   :  { %v2380_v49 = vpop.f32.mrb[6].mxu1 }
0x13a1   :  { %v2381_v48 = vadd.f32 %v4202_v19, %v2380_v49  ;;  %v3255_v20 = vpop.f32.mrb[7].mxu1 }
0x13a3   :  { %v2397_v33 = vrot.slane %v2381_v48, %v3967_v31  ;;  %v2416_v28 = vrot.slane %v2381_v48, %v3983_v39  ;;  %v2391_v38 = vmul.f32 %v2386_v52, %v2381_v48  ;;  %v2392_v61 = vmul.f32 %v2389_v53, %v2381_v48 }
0x13a4   :  { %vm2390_vm13 = vcmp.ge.f32.partialorder %v2381_v48, 0.0  ;;  %v2565_v52 = vrot.slane %v2557_v16, %v3967_v31 }
0x13a5   :  { %2403 = vbcast.lane.b32.xlu1 %v2397_v33, 264  ;;  %2399 = vbcast.lane.b32.xlu0 %v2397_v33, 256  ;;  %v2393_v50 = vsel %vm2390_vm13, %v2391_v38, %v2392_v61 }
0x13a6   :  { %v2476_v32 = vrot.slane %v2393_v50, %v3967_v31  ;;  %v2495_v19 = vrot.slane %v2393_v50, %v3983_v39 }
0x13a9   :  { %2418 = vbcast.lane.b32.xlu1 %v2416_v28, 256  ;;  %2407 = vbcast.lane.b32.xlu0 %v2397_v33, 272 }
0x13ad   :  { %2422 = vbcast.lane.b32.xlu1 %v2416_v28, 264  ;;  %2411 = vbcast.lane.b32.xlu0 %v2397_v33, 280 }
0x13b1   :  { %2426 = vbcast.lane.b32.xlu1 %v2416_v28, 272  ;;  %2478 = vbcast.lane.b32.xlu0 %v2476_v32, 256 }
0x13b5   :  { %2430 = vbcast.lane.b32.xlu1 %v2416_v28, 280  ;;  %2497 = vbcast.lane.b32.xlu0 %v2495_v19, 256 }
0x13b9   :  { %2482 = vbcast.lane.b32.xlu1 %v2476_v32, 264  ;;  %2486 = vbcast.lane.b32.xlu0 %v2476_v32, 272 }
0x13bd   :  { %2501 = vbcast.lane.b32.xlu1 %v2495_v19, 264  ;;  %2490 = vbcast.lane.b32.xlu0 %v2476_v32, 280 }
0x13c1   :  { %2505 = vbcast.lane.b32.xlu1 %v2495_v19, 272 }
0x13c5   :  { %2509 = vbcast.lane.b32.xlu1 %v2495_v19, 280 }
0x1417   :  { %v2404_v6 = vpop.permute.xlu1 %2403  ;;  %v2400_v21 = vpop.permute.xlu0 %2399 }
0x1418   :  { %v2465_v51 = vmul.f32 %v2458_v26, %v2400_v21  ;;  %v2466_v24 = vmul.f32 %v2458_v26, %v2404_v6 }
0x141b   :  { %v2419_v15 = vpop.permute.xlu1 %2418  ;;  %v2408_v23 = vpop.permute.xlu0 %2407 }
0x141c   :  { %v2469_v55 = vmul.f32 %v2462_v57, %v2419_v15  ;;  %v2467_v35 = vmul.f32 %v2458_v26, %v2408_v23 }
0x141f   :  { %v2423_v45 = vpop.permute.xlu1 %2422  ;;  %v2412_v54 = vpop.permute.xlu0 %2411 }
0x1420   :  { %v2470_v42 = vmul.f32 %v2462_v57, %v2423_v45  ;;  %v2468_v0 = vmul.f32 %v2458_v26, %v2412_v54 }
0x1423   :  { %v2427_v18 = vpop.permute.xlu1 %2426  ;;  %v2479_v56 = vpop.permute.xlu0 %2478 }
0x1424   :  { %v2511_v59 = vsub.f32 %v2465_v51, %v2479_v56  ;;  %v2471_v47 = vmul.f32 %v2462_v57, %v2427_v18 }
0x1426   :  { %v2519_v2 = vmul.f32 1.442695, %v2511_v59 }
0x1427   :  { %v2431_v10 = vpop.permute.xlu1 %2430  ;;  %v2498_v62 = vpop.permute.xlu0 %2497 }
0x1428   :  { %3513 = vpow2.f32 %v2519_v2  ;;  %v2515_v58 = vsub.f32 %v2469_v55, %v2498_v62  ;;  %v2472_v28 = vmul.f32 %v2462_v57, %v2431_v10 }
0x142a   :  { %v2527_v60 = vmul.f32 1.442695, %v2515_v58 }
0x142b   :  { %v2483_v1 = vpop.permute.xlu1 %2482  ;;  %v2487_v29 = vpop.permute.xlu0 %2486 }
0x142c   :  { %3515 = vpow2.f32 %v2527_v60  ;;  %v2512_v41 = vsub.f32 %v2466_v24, %v2483_v1  ;;  %v2513_v37 = vsub.f32 %v2467_v35, %v2487_v29 }
0x142e   :  { %v2521_v7 = vmul.f32 1.442695, %v2512_v41  ;;  %v2523_v11 = vmul.f32 1.442695, %v2513_v37 }
0x142f   :  { %v2502_v34 = vpop.permute.xlu1 %2501  ;;  %v2491_v40 = vpop.permute.xlu0 %2490 }
0x1430   :  { %3517 = vpow2.f32 %v2521_v7  ;;  %v2516_v43 = vsub.f32 %v2470_v42, %v2502_v34  ;;  %v2514_v12 = vsub.f32 %v2468_v0, %v2491_v40 }
0x1431   :  { %3519 = vpow2.f32 %v2523_v11 }
0x1432   :  { %v3514_v4 = vpop.eup %3513  ;;  %v2529_v8 = vmul.f32 1.442695, %v2516_v43  ;;  %v2525_v17 = vmul.f32 1.442695, %v2514_v12 }
0x1433   :  { %v2506_v49 = vpop.permute.xlu1 %2505  ;;  %v2600_v48 = vsel %vm98_vm0, %v3514_v4, 0.0  ;;  %v2568_v20 = vmul.f32 %v3514_v4, %v2561_v13 }
0x1434   :  { %3521 = vpow2.f32 %v2529_v8  ;;  %v2517_v33 = vsub.f32 %v2471_v47, %v2506_v49  ;;  %2601 = vadd.xlane.f32.xlu0 %v2600_v48 }
0x1435   :  { %3523 = vpow2.f32 %v2525_v17  ;;  %v2576_v25 = vsel %vm98_vm0, %v2568_v20, 0.0 }
0x1436   :  { %v3516_v53 = vpop.eup %3515  ;;  %v2531_v38 = vmul.f32 1.442695, %v2517_v33 }
0x1437   :  { %v2510_v61 = vpop.permute.xlu1 %2509  ;;  %v2612_v50 = vsel %vm98_vm0, %v3516_v53, 0.0  ;;  %v2572_v32 = vmul.f32 %v3516_v53, %v2565_v52 }
0x1438   :  { %3525 = vpow2.f32 %v2531_v38  ;;  %v2518_v19 = vsub.f32 %v2472_v28, %v2510_v61  ;;  %2613 = vadd.xlane.f32.xlu0 %v2612_v50 }
0x1439   :  { %v2588_v29 = vsel %vm98_vm0, %v2572_v32, 0.0 }
0x143a   :  { %v3518_v6 = vpop.eup %3517  ;;  %v2533_v21 = vmul.f32 1.442695, %v2518_v19 }
0x143b   :  { %v3520_v15 = vpop.eup %3519  ;;  %v2603_v23 = vsel %vm98_vm0, %v3518_v6, 0.0  ;;  %v2569_v45 = vmul.f32 %v3518_v6, %v2561_v13 }
0x143c   :  { %3527 = vpow2.f32 %v2533_v21  ;;  %2604 = vadd.xlane.f32.xlu1 %v2603_v23  ;;  %v2570_v54 = vmul.f32 %v3520_v15, %v2561_v13  ;;  %v2606_v2 = vsel %vm98_vm0, %v3520_v15, 0.0 }
0x143d   :  { %v2579_v60 = vsel %vm98_vm0, %v2569_v45, 0.0 }
0x143e   :  { %v3522_v26 = vpop.eup %3521  ;;  %v2582_v37 = vsel %vm98_vm0, %v2570_v54, 0.0 }
0x143f   :  { %v3524_v51 = vpop.eup %3523  ;;  %v2615_v18 = vsel %vm98_vm0, %v3522_v26, 0.0  ;;  %v2573_v56 = vmul.f32 %v3522_v26, %v2565_v52 }
0x1440   :  { %2616 = vadd.xlane.f32.xlu0 %v2615_v18  ;;  %v2571_v57 = vmul.f32 %v3524_v51, %v2561_v13  ;;  %v2609_v24 = vsel %vm98_vm0, %v3524_v51, 0.0 }
0x1441   :  { %v2591_v1 = vsel %vm98_vm0, %v2573_v56, 0.0 }
0x1442   :  { %v3526_v59 = vpop.eup %3525  ;;  %v2585_v22 = vsel %vm98_vm0, %v2571_v57, 0.0 }
0x1443   :  { %v2618_v55 = vsel %vm98_vm0, %v3526_v59, 0.0  ;;  %v2574_v10 = vmul.f32 %v3526_v59, %v2565_v52 }
0x1444   :  { %2619 = vadd.xlane.f32.xlu1 %v2618_v55  ;;  %2607 = vadd.xlane.f32.xlu0 %v2606_v2 }
0x1445   :  { %v2594_v41 = vsel %vm98_vm0, %v2574_v10, 0.0 }
0x1446   :  { %v3528_v62 = vpop.eup %3527 }
0x1447   :  { %v2621_v58 = vsel %vm98_vm0, %v3528_v62, 0.0  ;;  %v2575_v35 = vmul.f32 %v3528_v62, %v2565_v52 }
0x1448   :  { %2622 = vadd.xlane.f32.xlu1 %v2621_v58  ;;  %2610 = vadd.xlane.f32.xlu0 %v2609_v24 }
0x1449   :  { %v2597_v63 = vsel %vm98_vm0, %v2575_v35, 0.0 }
0x144c   :  { %2580 = vadd.xlane.f32.xlu1 %v2579_v60  ;;  %2577 = vadd.xlane.f32.xlu0 %v2576_v25 }
0x1450   :  { %2592 = vadd.xlane.f32.xlu1 %v2591_v1  ;;  %2589 = vadd.xlane.f32.xlu0 %v2588_v29 }
0x1454   :  { %2595 = vadd.xlane.f32.xlu1 %v2594_v41  ;;  %2583 = vadd.xlane.f32.xlu0 %v2582_v37  ;;  %v3583_v41 = vld [vmem:[#allocation2 + $0xc] sm:$0x3] }
0x1455   :  { %v2777_v37 = vsel %vm317_vm2, %v3583_v41, -inf }
0x1458   :  { %2598 = vadd.xlane.f32.xlu1 %v2597_v63  ;;  %2586 = vadd.xlane.f32.xlu0 %v2585_v22 }
0x14c1   :  { %v2602_v42 = vpop.xlane.xlu0 %2601 }
0x14c2   :  { %3529 = vrcp.f32 %v2602_v42 }
0x14c5   :  { %v2614_v0 = vpop.xlane.xlu0 %2613 }
0x14c6   :  { %3531 = vrcp.f32 %v2614_v0 }
0x14c9   :  { %v2605_v7 = vpop.xlane.xlu1 %2604 }
0x14ca   :  { %3533 = vrcp.f32 %v2605_v7 }
0x14cc   :  { %v3530_v4 = vpop.eup %3529 }
0x14cd   :  { %v2617_v11 = vpop.xlane.xlu0 %2616 }
0x14ce   :  { %3535 = vrcp.f32 %v2617_v11  ;;  %v2780_v11 = vsel %vm317_vm2, %v3583_v41, inf }
0x14d0   :  { %v3532_v47 = vpop.eup %3531 }
0x14d1   :  { %v2620_v34 = vpop.xlane.xlu1 %2619  ;;  %v2608_v40 = vpop.xlane.xlu0 %2607 }
0x14d2   :  { %3537 = vrcp.f32 %v2620_v34 }
0x14d3   :  { %3539 = vrcp.f32 %v2608_v40 }
0x14d4   :  { %v3534_v49 = vpop.eup %3533 }
0x14d5   :  { %v2623_v43 = vpop.xlane.xlu1 %2622  ;;  %v2611_v12 = vpop.xlane.xlu0 %2610 }
0x14d6   :  { %3541 = vrcp.f32 %v2623_v43 }
0x14d7   :  { %3543 = vrcp.f32 %v2611_v12 }
0x14d8   :  { %v3536_v48 = vpop.eup %3535 }
0x14d9   :  { %v2581_v13 = vpop.xlane.xlu1 %2580  ;;  %v2578_v16 = vpop.xlane.xlu0 %2577 }
0x14da   :  { %v2633_v33 = vmul.f32 %v3534_v49, %v2581_v13  ;;  %v2632_v52 = vmul.f32 %v3530_v4, %v2578_v16  ;;  %v3584_v16 = vld [vmem:[%s4442_s3] ss:$0 sm:$0xff]  ;;  %s3740_s3 = smov [#allocation13]  }
0x14db   :  { %s3089_s27 = sshll.u32 %s3740_s3, 4  ;;  %s3090_s27 = int_to_ptr.vmem [resolvable:$true] %s3089_s27 }
0x14dc   :  { %v3538_v20 = vpop.eup %3537  ;;  %v2655_v21 = vrot.slane %v2633_v33, %v4033_v27  ;;  %v2651_v15 = vrot.slane %v2632_v52, %v4030_v14  ;;  %s3699_s29 = scalar_lea.vmem %s3090_s27, 32  ;;  %p3704_p13 = scmp.lt.s32.totalorder %s3090_s27, %s3090_s27 }
0x14dd   :  { %v2593_v8 = vpop.xlane.xlu1 %2592  ;;  %v2590_v17 = vpop.xlane.xlu0 %2589  ;;  %p3700_p12 = scmp.ne.s32.totalorder %s3090_s27, %s3699_s29  ;;  %p3705_p0 = scmp.lt.s32.totalorder %s3699_s29, %s3699_s29 }
0x14de   :  { %v2637_v53 = vmul.f32 %v3536_v48, %v2593_v8  ;;  %v2636_v28 = vmul.f32 %v3532_v47, %v2590_v17  ;;  %v3540_v38 = vpop.eup %3539  ;;  %v2656_v55 = vsel %vm685_vm5, %v2655_v21, %v2651_v15  ;;  %v2851_v21 = vrot.slane %v2840_v44, %v3967_v31 }
0x14df   :  { %p3706_p1 = por %p3705_p0, %p3704_p13 }
0x14e0   :  { %v3542_v6 = vpop.eup %3541  ;;  %v2674_v23 = vrot.slane %v2637_v53, %v4033_v27  ;;  %v2670_v45 = vrot.slane %v2636_v28, %v4030_v14 }
0x14e1   :  { %v2596_v61 = vpop.xlane.xlu1 %2595  ;;  %v2584_v50 = vpop.xlane.xlu0 %2583  ;;  %p3707_p2 = pnand %p3706_p1, %p3700_p12 }
0x14e2   :  { %v2638_v32 = vmul.f32 %v3538_v20, %v2596_v61  ;;  %v2634_v19 = vmul.f32 %v3540_v38, %v2584_v50  ;;  %v3544_v54 = vpop.eup %3543  ;;  %v2675_v2 = vsel %vm685_vm5, %v2674_v23, %v2670_v45  ;;  %v2855_v45 = vrot.slane %v3998_v46, %v3967_v31 }
0x14e4   :  { %v2679_v26 = vrot.slane %v2638_v32, %v4036_v30  ;;  %v2660_v51 = vrot.slane %v2634_v19, %v4036_v30 }
0x14e5   :  { %v2599_v18 = vpop.xlane.xlu1 %2598  ;;  %v2587_v56 = vpop.xlane.xlu0 %2586 }
0x14e6   :  { %v2639_v57 = vmul.f32 %v3542_v6, %v2599_v18  ;;  %v2635_v59 = vmul.f32 %v3544_v54, %v2587_v56  ;;  %v2680_v58 = vsel %vm692_vm6, %v2679_v26, %v2675_v2  ;;  %v2661_v24 = vsel %vm692_vm6, %v2660_v51, %v2656_v55 }
0x14e8   :  { %v2684_v10 = vrot.slane %v2639_v57, %v4039_v3  ;;  %v2665_v62 = vrot.slane %v2635_v59, %v4039_v3 }
0x14ea   :  { %v2685_v35 = vsel %vm699_vm7, %v2684_v10, %v2680_v58  ;;  %v2666_v60 = vsel %vm699_vm7, %v2665_v62, %v2661_v24  ;;  %v3120_v10 = vld.sshfl [vmem:[#allocation3 + $0xc] sm:$0x11 pattern:$0x75316420] }
0x14eb   :  { %v2686_v25 = vsel %vm720_vm8, %v2685_v35, %v2666_v60  ;;  %v2943_v24 = vrot.slane %v3120_v10, %v3916_v9  ;;  %v2936_v35 = vcombine.high %v3120_v10, %v3120_v10 }
0x14ec   :  { %v4368_v1 = vadd.f32 %v2686_v25, %v4312_v5 }
0x14ee   :  { %v2691_v29 = vsel %vm317_vm2, %v4368_v1, 0.0 }
0x14ef   :  { %2692 = vadd.xlane.f32.xlu0 %v2691_v29 }
0x14f3   :  { %2778 = vmax.xlane.f32.xlu0 %v2777_v37 }
0x157c   :  { %v2693_v63 = vpop.xlane.xlu0 %2692 }
0x157d   :  { %v2694_v22 = vmul.f32 0.03125, %v2693_v63 }
0x157f   :  { %v2695_v42 = vsub.f32 %v4368_v1, %v2694_v22 }
0x1580   :  { %v2779_v17 = vpop.xlane.xlu0 %2778 }
0x1581   :  { %v2696_v0 = vmul.f32 %v2695_v42, %v2695_v42 }
0x1583   :  { %v2697_v7 = vsel %vm317_vm2, %v2696_v0, 0.0  ;;  %v2950_v0 = vrot.slane %v2936_v35, %v3916_v9 }
0x1584   :  { %2698 = vadd.xlane.f32.xlu1 %v2697_v7 }
0x1588   :  { %2781 = vmin.xlane.f32.xlu1 %v2780_v11 }
0x1611   :  { %v2699_v5 = vpop.xlane.xlu1 %2698 }
0x1612   :  { %v2700_v34 = vmul.f32 0.03125, %v2699_v5 }
0x1614   :  { %v2701_v40 = vadd.f32 1e-05, %v2700_v34 }
0x1615   :  { %v2782_v49 = vpop.xlane.xlu1 %2781 }
0x1616   :  { %3545 = vrsqrt.f32 %v2701_v40 }
0x1620   :  { %v3546_v43 = vpop.eup %3545 }
0x1621   :  { %v2703_v12 = vmul.f32 %v3546_v43, %v2695_v42  ;;  %v2954_v42 = vrot.slane %v2943_v24, %v3967_v31 }
0x1623   :  { %3265 = vmatmul.mubr.msk.f32.vlgmr.msra.gmra.mrb[8].mxu0 %vm98_vm0, %v2703_v12 }
0x16f6   :  { %v2773_v13 = vpop.f32.mrb[8].mxu0 }
0x16f7   :  { %v2774_v4 = vadd.f32 %v3584_v16, %v2773_v13  ;;  %v3266_v47 = vpop.f32.mrb[9].mxu0  ;;  %v2958_v16 = vrot.slane %v2950_v0, %v3967_v31 }
0x16f9   :  { %v2790_v8 = vrot.slane %v2774_v4, %v3967_v31  ;;  %v2809_v48 = vrot.slane %v2774_v4, %v3983_v39  ;;  %v2784_v20 = vmul.f32 %v2779_v17, %v2774_v4  ;;  %v2785_v33 = vmul.f32 %v2782_v49, %v2774_v4 }
0x16fa   :  { %vm2783_vm14 = vcmp.ge.f32.partialorder %v2774_v4, 0.0 }
0x16fb   :  { %2796 = vbcast.lane.b32.xlu1 %v2790_v8, 264  ;;  %2792 = vbcast.lane.b32.xlu0 %v2790_v8, 256  ;;  %v2786_v52 = vsel %vm2783_vm14, %v2784_v20, %v2785_v33 }
0x16fc   :  { %v2869_v53 = vrot.slane %v2786_v52, %v3967_v31  ;;  %v2888_v28 = vrot.slane %v2786_v52, %v3983_v39 }
0x16ff   :  { %2811 = vbcast.lane.b32.xlu1 %v2809_v48, 256  ;;  %2800 = vbcast.lane.b32.xlu0 %v2790_v8, 272 }
0x1703   :  { %2815 = vbcast.lane.b32.xlu1 %v2809_v48, 264  ;;  %2804 = vbcast.lane.b32.xlu0 %v2790_v8, 280 }
0x1707   :  { %2819 = vbcast.lane.b32.xlu1 %v2809_v48, 272  ;;  %2871 = vbcast.lane.b32.xlu0 %v2869_v53, 256 }
0x170b   :  { %2823 = vbcast.lane.b32.xlu1 %v2809_v48, 280  ;;  %2890 = vbcast.lane.b32.xlu0 %v2888_v28, 256 }
0x170f   :  { %2875 = vbcast.lane.b32.xlu1 %v2869_v53, 264  ;;  %2879 = vbcast.lane.b32.xlu0 %v2869_v53, 272 }
0x1713   :  { %2894 = vbcast.lane.b32.xlu1 %v2888_v28, 264  ;;  %2883 = vbcast.lane.b32.xlu0 %v2869_v53, 280 }
0x1717   :  { %2898 = vbcast.lane.b32.xlu1 %v2888_v28, 272 }
0x171b   :  { %2902 = vbcast.lane.b32.xlu1 %v2888_v28, 280 }
0x176d   :  { %v2797_v38 = vpop.permute.xlu1 %2796  ;;  %v2793_v61 = vpop.permute.xlu0 %2792 }
0x176e   :  { %v2858_v39 = vmul.f32 %v2851_v21, %v2793_v61  ;;  %v2859_v59 = vmul.f32 %v2851_v21, %v2797_v38 }
0x1771   :  { %v2812_v50 = vpop.permute.xlu1 %2811  ;;  %v2801_v32 = vpop.permute.xlu0 %2800 }
0x1772   :  { %v2862_v26 = vmul.f32 %v2855_v45, %v2812_v50  ;;  %v2860_v55 = vmul.f32 %v2851_v21, %v2801_v32 }
0x1775   :  { %v2816_v19 = vpop.permute.xlu1 %2815  ;;  %v2805_v6 = vpop.permute.xlu0 %2804 }
0x1776   :  { %v2863_v46 = vmul.f32 %v2855_v45, %v2816_v19  ;;  %v2861_v60 = vmul.f32 %v2851_v21, %v2805_v6 }
0x1779   :  { %v2820_v15 = vpop.permute.xlu1 %2819  ;;  %v2872_v23 = vpop.permute.xlu0 %2871 }
0x177a   :  { %v2904_v54 = vsub.f32 %v2858_v39, %v2872_v23  ;;  %v2864_v11 = vmul.f32 %v2855_v45, %v2820_v15 }
0x177c   :  { %v2912_v51 = vmul.f32 1.442695, %v2904_v54 }
0x177d   :  { %v2824_v18 = vpop.permute.xlu1 %2823  ;;  %v2891_v56 = vpop.permute.xlu0 %2890 }
0x177e   :  { %3547 = vpow2.f32 %v2912_v51  ;;  %v2908_v57 = vsub.f32 %v2862_v26, %v2891_v56  ;;  %v2865_v47 = vmul.f32 %v2855_v45, %v2824_v18 }
0x1780   :  { %v2920_v2 = vmul.f32 1.442695, %v2908_v57 }
0x1781   :  { %v2876_v62 = vpop.permute.xlu1 %2875  ;;  %v2880_v36 = vpop.permute.xlu0 %2879 }
0x1782   :  { %3549 = vpow2.f32 %v2920_v2  ;;  %v2905_v44 = vsub.f32 %v2859_v59, %v2876_v62  ;;  %v2906_v58 = vsub.f32 %v2860_v55, %v2880_v36 }
0x1784   :  { %v2914_v25 = vmul.f32 1.442695, %v2905_v44  ;;  %v2916_v29 = vmul.f32 1.442695, %v2906_v58 }
0x1785   :  { %v2895_v41 = vpop.permute.xlu1 %2894  ;;  %v2884_v37 = vpop.permute.xlu0 %2883 }
0x1786   :  { %3551 = vpow2.f32 %v2914_v25  ;;  %v2909_v63 = vsub.f32 %v2863_v46, %v2895_v41  ;;  %v2907_v22 = vsub.f32 %v2861_v60, %v2884_v37 }
0x1787   :  { %3553 = vpow2.f32 %v2916_v29 }
0x1788   :  { %v3548_v7 = vpop.eup %3547  ;;  %v2922_v5 = vmul.f32 1.442695, %v2909_v63  ;;  %v2918_v34 = vmul.f32 1.442695, %v2907_v22 }
0x1789   :  { %v2899_v40 = vpop.permute.xlu1 %2898  ;;  %v2993_v43 = vsel %vm98_vm0, %v3548_v7, 0.0  ;;  %v2961_v12 = vmul.f32 %v3548_v7, %v2954_v42 }
0x178a   :  { %3555 = vpow2.f32 %v2922_v5  ;;  %v2910_v13 = vsub.f32 %v2864_v11, %v2899_v40  ;;  %2994 = vadd.xlane.f32.xlu0 %v2993_v43 }
0x178b   :  { %3557 = vpow2.f32 %v2918_v34  ;;  %v2969_v18 = vsel %vm98_vm0, %v2961_v12, 0.0 }
0x178c   :  { %v3550_v4 = vpop.eup %3549  ;;  %v2924_v8 = vmul.f32 1.442695, %v2910_v13 }
0x178d   :  { %v2903_v17 = vpop.permute.xlu1 %2902  ;;  %v3005_v9 = vsel %vm98_vm0, %v3550_v4, 0.0  ;;  %v2965_v49 = vmul.f32 %v3550_v4, %v2958_v16 }
0x178e   :  { %3559 = vpow2.f32 %v2924_v8  ;;  %v2911_v48 = vsub.f32 %v2865_v47, %v2903_v17  ;;  %3006 = vadd.xlane.f32.xlu0 %v3005_v9 }
0x178f   :  { %v2981_v57 = vsel %vm98_vm0, %v2965_v49, 0.0 }
0x1790   :  { %v3552_v20 = vpop.eup %3551  ;;  %v2926_v33 = vmul.f32 1.442695, %v2911_v48 }
0x1791   :  { %v3554_v52 = vpop.eup %3553  ;;  %v2996_v53 = vsel %vm98_vm0, %v3552_v20, 0.0  ;;  %v2962_v28 = vmul.f32 %v3552_v20, %v2954_v42 }
0x1792   :  { %3561 = vpow2.f32 %v2926_v33  ;;  %2997 = vadd.xlane.f32.xlu1 %v2996_v53  ;;  %v2963_v38 = vmul.f32 %v3554_v52, %v2954_v42  ;;  %v2999_v39 = vsel %vm98_vm0, %v3554_v52, 0.0 }
0x1793   :  { %v2972_v51 = vsel %vm98_vm0, %v2962_v28, 0.0 }
0x1794   :  { %v3556_v31 = vpop.eup %3555  ;;  %v2975_v55 = vsel %vm98_vm0, %v2963_v38, 0.0 }
0x1795   :  { %v3558_v61 = vpop.eup %3557  ;;  %v3008_v50 = vsel %vm98_vm0, %v3556_v31, 0.0  ;;  %v2966_v32 = vmul.f32 %v3556_v31, %v2958_v16 }
0x1796   :  { %3009 = vadd.xlane.f32.xlu0 %v3008_v50  ;;  %v2964_v19 = vmul.f32 %v3558_v61, %v2954_v42  ;;  %v3002_v54 = vsel %vm98_vm0, %v3558_v61, 0.0 }
0x1797   :  { %v2984_v56 = vsel %vm98_vm0, %v2966_v32, 0.0 }
0x1798   :  { %v3560_v6 = vpop.eup %3559  ;;  %v2978_v10 = vsel %vm98_vm0, %v2964_v19, 0.0 }
0x1799   :  { %v3011_v21 = vsel %vm98_vm0, %v3560_v6, 0.0  ;;  %v2967_v15 = vmul.f32 %v3560_v6, %v2958_v16 }
0x179a   :  { %3012 = vadd.xlane.f32.xlu1 %v3011_v21  ;;  %3000 = vadd.xlane.f32.xlu0 %v2999_v39 }
0x179b   :  { %v2987_v59 = vsel %vm98_vm0, %v2967_v15, 0.0 }
0x179c   :  { %v3562_v23 = vpop.eup %3561 }
0x179d   :  { %v3014_v45 = vsel %vm98_vm0, %v3562_v23, 0.0  ;;  %v2968_v26 = vmul.f32 %v3562_v23, %v2958_v16 }
0x179e   :  { %3015 = vadd.xlane.f32.xlu1 %v3014_v45  ;;  %3003 = vadd.xlane.f32.xlu0 %v3002_v54 }
0x179f   :  { %v2990_v2 = vsel %vm98_vm0, %v2968_v26, 0.0 }
0x17a2   :  { %2973 = vadd.xlane.f32.xlu1 %v2972_v51  ;;  %2970 = vadd.xlane.f32.xlu0 %v2969_v18 }
0x17a6   :  { %2985 = vadd.xlane.f32.xlu1 %v2984_v56  ;;  %2982 = vadd.xlane.f32.xlu0 %v2981_v57 }
0x17aa   :  { %2988 = vadd.xlane.f32.xlu1 %v2987_v59  ;;  %2976 = vadd.xlane.f32.xlu0 %v2975_v55 }
0x17ae   :  { %2991 = vadd.xlane.f32.xlu1 %v2990_v2  ;;  %2979 = vadd.xlane.f32.xlu0 %v2978_v10 }
0x1817   :  { %v2995_v62 = vpop.xlane.xlu0 %2994 }
0x1818   :  { %3563 = vrcp.f32 %v2995_v62 }
0x181b   :  { %v3007_v36 = vpop.xlane.xlu0 %3006 }
0x181c   :  { %3565 = vrcp.f32 %v3007_v36 }
0x181f   :  { %v2998_v44 = vpop.xlane.xlu1 %2997 }
0x1820   :  { %3567 = vrcp.f32 %v2998_v44 }
0x1822   :  { %v3564_v41 = vpop.eup %3563 }
0x1823   :  { %v3010_v58 = vpop.xlane.xlu0 %3009 }
0x1824   :  { %3569 = vrcp.f32 %v3010_v58 }
0x1826   :  { %v3566_v37 = vpop.eup %3565 }
0x1827   :  { %v3013_v24 = vpop.xlane.xlu1 %3012  ;;  %v3001_v35 = vpop.xlane.xlu0 %3000 }
0x1828   :  { %3571 = vrcp.f32 %v3013_v24 }
0x1829   :  { %3573 = vrcp.f32 %v3001_v35 }
0x182a   :  { %v3568_v42 = vpop.eup %3567 }
0x182b   :  { %v3016_v46 = vpop.xlane.xlu1 %3015  ;;  %v3004_v60 = vpop.xlane.xlu0 %3003 }
0x182c   :  { %3575 = vrcp.f32 %v3016_v46 }
0x182d   :  { %3577 = vrcp.f32 %v3004_v60 }
0x182e   :  { %v3570_v0 = vpop.eup %3569 }
0x182f   :  { %v2974_v25 = vpop.xlane.xlu1 %2973  ;;  %v2971_v29 = vpop.xlane.xlu0 %2970 }
0x1830   :  { %v3026_v11 = vmul.f32 %v3568_v42, %v2974_v25  ;;  %v3025_v5 = vmul.f32 %v3564_v41, %v2971_v29 }
0x1832   :  { %v3572_v7 = vpop.eup %3571  ;;  %v3048_v8 = vrot.slane %v3026_v11, %v4033_v27  ;;  %v3044_v17 = vrot.slane %v3025_v5, %v4030_v14 }
0x1833   :  { %v2986_v63 = vpop.xlane.xlu1 %2985  ;;  %v2983_v22 = vpop.xlane.xlu0 %2982 }
0x1834   :  { %v3030_v34 = vmul.f32 %v3570_v0, %v2986_v63  ;;  %v3029_v40 = vmul.f32 %v3566_v37, %v2983_v22  ;;  %v3574_v43 = vpop.eup %3573  ;;  %v3049_v31 = vsel %vm685_vm5, %v3048_v8, %v3044_v17 }
0x1836   :  { %v3576_v47 = vpop.eup %3575  ;;  %v3067_v9 = vrot.slane %v3030_v34, %v4033_v27  ;;  %v3063_v49 = vrot.slane %v3029_v40, %v4030_v14 }
0x1837   :  { %v2989_v12 = vpop.xlane.xlu1 %2988  ;;  %v2977_v13 = vpop.xlane.xlu0 %2976 }
0x1838   :  { %v3031_v16 = vmul.f32 %v3572_v7, %v2989_v12  ;;  %v3027_v4 = vmul.f32 %v3574_v43, %v2977_v13  ;;  %v3578_v48 = vpop.eup %3577  ;;  %v3068_v61 = vsel %vm685_vm5, %v3067_v9, %v3063_v49 }
0x183a   :  { %v3072_v20 = vrot.slane %v3031_v16, %v4036_v30  ;;  %v3053_v33 = vrot.slane %v3027_v4, %v4036_v30 }
0x183b   :  { %v2992_v52 = vpop.xlane.xlu1 %2991  ;;  %v2980_v53 = vpop.xlane.xlu0 %2979 }
0x183c   :  { %v3032_v28 = vmul.f32 %v3576_v47, %v2992_v52  ;;  %v3028_v38 = vmul.f32 %v3578_v48, %v2980_v53  ;;  %v3073_v27 = vsel %vm692_vm6, %v3072_v20, %v3068_v61  ;;  %v3054_v14 = vsel %vm692_vm6, %v3053_v33, %v3049_v31 }
0x183e   :  { %v3077_v50 = vrot.slane %v3032_v28, %v4039_v3  ;;  %v3058_v32 = vrot.slane %v3028_v38, %v4039_v3 }
0x1840   :  { %v3078_v30 = vsel %vm699_vm7, %v3077_v50, %v3073_v27  ;;  %v3059_v19 = vsel %vm699_vm7, %v3058_v32, %v3054_v14 }
0x1841   :  { %v3079_v6 = vsel %vm720_vm8, %v3078_v30, %v3059_v19 }
0x1842   :  { %v3081_v21 = vadd.f32 %v3079_v6, %v4368_v1 }
0x1844   :  { %3082 = vst.msk [vmem:[#allocation13] sm:$0x3] %vm317_vm2, %v3081_v21 }
0x1845   :  { %3710 = shalt.err (!%p3707_p2)
}
0x1846   :  { %s3711_s28 = scalar_lea.hbm %s4447_s8, 32 }
0x1847   :  { %p3712_p3 = scmp.ne.s32.totalorder %s4447_s8, %s3711_s28  ;;  %p3715_p4 = scmp.lt.u32.totalorder %s3711_s28, %s4447_s8 }
0x1849   :  { %p3717_p5 = pnand %p3715_p4, %p3712_p3 }
0x184b   :  { %3720 = shalt.err (!%p3717_p5)
}
0x184c   :  { %3092 = dma.vmem_to_hbm [thread:$0]  %s3090_s27, 32, %s4447_s8, [#allocation6]  }
0x184d   :  { %3727 = dma.done.wait [#allocation6], 32  }
0x184e   :  { %3728 = vsyncadd [#allocation6], 4294967264 }
0x184f   :  { %3096 = vsyncpa [#allocation5], 1 }
0x1850   :  { %3097 = vsyncpa [#allocation8], 1 }
0x1851   :  { %3098 = vsyncpa [#allocation11], 1 }
0x1852   :  { %3099 = vsyncpa [#allocation6], 1 }

</bundles_post_ra>
